<compile_context>
chip_gen: v6e
topology: v6e:2x2x1
jax: 0.10.0
libtpu: 0.0.40
codegen_flags: <defaults>
</compile_context>

<pallas_src>
import functools

import jax
import jax.numpy as jnp
from jax.experimental import pallas as pl
from jax.experimental.pallas import tpu as pltpu

EPS = 1e-5


# --------------------------------------------------------------------------
# Conv stage kernel: fused (prev-layer BN affine + ReLU) -> 1x1-conv matmul,
# plus per-channel sum/sumsq and (optionally) per-batch max/min accumulation.
# --------------------------------------------------------------------------
def _conv_stage_kernel(*refs, apply_prev, emit_z, emit_minmax, bf16_mm):
    zp_ref, sc_ref, sh_ref, w_ref = refs[:4]
    outs = refs[4:]
    o = 0
    if emit_z:
        z_out = outs[o]
        o += 1
    s_out, q_out = outs[o], outs[o + 1]
    o += 2
    if emit_minmax:
        mx_out, mn_out = outs[o], outs[o + 1]

    t = pl.program_id(1)

    h = zp_ref[0]                                        # (tile, Cin) f32
    if apply_prev:
        # Fused BatchNorm affine (+ReLU) of the previous layer's raw output.
        h = jnp.maximum(h * sc_ref[...] + sh_ref[...], 0.0)

    lhs = h.astype(jnp.bfloat16) if bf16_mm else h
    z = jnp.dot(lhs, w_ref[...], preferred_element_type=jnp.float32)

    if emit_z:
        z_out[0] = z                                     # raw (pre-BN) conv output

    ps = jnp.sum(z, axis=0, keepdims=True)[None]         # (1, 1, Cout)
    pq = jnp.sum(z * z, axis=0, keepdims=True)[None]

    @pl.when(t == 0)
    def _():
        s_out[...] = ps
        q_out[...] = pq

    @pl.when(t != 0)
    def _():
        s_out[...] += ps
        q_out[...] += pq

    if emit_minmax:
        pmx = jnp.max(z, axis=0, keepdims=True)[None]
        pmn = jnp.min(z, axis=0, keepdims=True)[None]

        @pl.when(t == 0)
        def _():
            mx_out[...] = pmx
            mn_out[...] = pmn

        @pl.when(t != 0)
        def _():
            mx_out[...] = jnp.maximum(mx_out[...], pmx)
            mn_out[...] = jnp.minimum(mn_out[...], pmn)


def _conv_stage(z_prev, scale, shift, w, *, tn, apply_prev, emit_z,
                emit_minmax, bf16_mm):
    B, N, cin = z_prev.shape
    cout = w.shape[1]
    T = N // tn

    in_specs = [
        pl.BlockSpec((1, tn, cin), lambda b, t: (b, t, 0)),    # activation tile
        pl.BlockSpec((1, cin), lambda b, t: (0, 0)),           # prev BN scale (resident)
        pl.BlockSpec((1, cin), lambda b, t: (0, 0)),           # prev BN shift (resident)
        pl.BlockSpec((cin, cout), lambda b, t: (0, 0)),        # weight (resident)
    ]
    stat_spec = pl.BlockSpec((1, 1, cout), lambda b, t: (b, 0, 0))
    stat_shape = jax.ShapeDtypeStruct((B, 1, cout), jnp.float32)

    out_specs, out_shapes = [], []
    if emit_z:
        out_specs.append(pl.BlockSpec((1, tn, cout), lambda b, t: (b, t, 0)))
        out_shapes.append(jax.ShapeDtypeStruct((B, N, cout), jnp.float32))
    n_stats = 4 if emit_minmax else 2
    out_specs += [stat_spec] * n_stats
    out_shapes += [stat_shape] * n_stats

    w_in = w.astype(jnp.bfloat16) if bf16_mm else w
    kernel = functools.partial(_conv_stage_kernel, apply_prev=apply_prev,
                               emit_z=emit_z, emit_minmax=emit_minmax,
                               bf16_mm=bf16_mm)
    return pl.pallas_call(
        kernel,
        grid=(B, T),
        in_specs=in_specs,
        out_specs=tuple(out_specs),
        out_shape=tuple(out_shapes),
        compiler_params=pltpu.CompilerParams(
            dimension_semantics=("parallel", "arbitrary")),
    )(z_prev, scale, shift, w_in)


# --------------------------------------------------------------------------
# Head kernel: max-pool (reconstructed from raw conv4 max/min + BN4 affine),
# fc1/bn5/relu, fc2/bn6/relu, fc3 + identity.  Output is lane-dense (B, 128).
# --------------------------------------------------------------------------
def _head_kernel(mx_ref, mn_ref, sc4_ref, sh4_ref,
                 w5_ref, g5_ref, be5_ref,
                 w6_ref, g6_ref, be6_ref,
                 w7_ref, b7_ref, out_ref, *, bf16_mm):
    sc4 = sc4_ref[...]                                   # (1, 1024)
    sh4 = sh4_ref[...]
    # max_n relu(a*z+b) == relu(a*max_n(z)+b) if a>=0 else relu(a*min_n(z)+b)
    zsel = jnp.where(sc4 >= 0.0, mx_ref[...], mn_ref[...])
    pooled = jnp.maximum(zsel * sc4 + sh4, 0.0)          # (B, 1024)

    def mm(a, wref):
        lhs = a.astype(jnp.bfloat16) if bf16_mm else a
        return jnp.dot(lhs, wref[...], preferred_element_type=jnp.float32)

    def bn_relu(h, g, b):
        mean = jnp.mean(h, axis=0, keepdims=True)
        var = jnp.mean(jnp.square(h - mean), axis=0, keepdims=True)
        s = g * jax.lax.rsqrt(var + EPS)
        return jnp.maximum(h * s + (b - mean * s), 0.0)

    f = bn_relu(mm(pooled, w5_ref), g5_ref[...], be5_ref[...])     # (B, 512)
    f = bn_relu(mm(f, w6_ref), g6_ref[...], be6_ref[...])          # (B, 256)
    out_ref[...] = (jnp.dot(f, w7_ref[...], preferred_element_type=jnp.float32)
                    + b7_ref[...])                                 # (B, pad)


def _head_call(mx, mn, scale4, shift4, params, k, use_bf16):
    B = mx.shape[0]
    kk = k * k
    pad = ((kk + 127) // 128) * 128                      # lane-dense output width
    w7 = params["fc3"]["w"]
    b7 = params["fc3"]["b"] + jnp.eye(k, dtype=jnp.float32).reshape(1, kk)
    w7p = jnp.zeros((w7.shape[0], pad), jnp.float32).at[:, :kk].set(w7)
    b7p = jnp.zeros((1, pad), jnp.float32).at[:, :kk].set(b7)
    w5 = params["fc1"]["w"]
    w6 = params["fc2"]["w"]
    if use_bf16:
        w5 = w5.astype(jnp.bfloat16)
        w6 = w6.astype(jnp.bfloat16)
    args = (mx, mn, scale4, shift4,
            w5, params["fc1"]["g"], params["fc1"]["be"],
            w6, params["fc2"]["g"], params["fc2"]["be"],
            w7p, b7p)
    return pl.pallas_call(
        functools.partial(_head_kernel, bf16_mm=use_bf16),
        out_shape=jax.ShapeDtypeStruct((B, pad), jnp.float32),
        in_specs=[pl.BlockSpec(memory_space=pltpu.MemorySpace.VMEM)] * len(args),
        out_specs=pl.BlockSpec(memory_space=pltpu.MemorySpace.VMEM),
    )(*args)


# --------------------------------------------------------------------------
# Wrapper
# --------------------------------------------------------------------------
def _pick_tile(n, target):
    """Largest point-tile that divides n, is a multiple of 8 and <= target."""
    if n % 8 != 0:
        return n
    t = max(8, (min(int(target), n) // 8) * 8)
    while n % t != 0:
        t -= 8
    return t


@functools.partial(jax.jit, static_argnames=("k", "tile_points", "use_bf16"))
def stnkd_forward(x_ncw, params, k=5, tile_points=1024, use_bf16=True):
    """x_ncw: (B, k, N) float32, the PyTorch Conv1d (NCW) input convention."""
    B, _, N = x_ncw.shape
    # TODO(synk): accept channels-last (B, N, k) input directly so this
    # transpose (an extra HBM round trip before the first kernel) can be dropped.
    x = jnp.transpose(x_ncw, (0, 2, 1)).astype(jnp.float32)        # (B, N, k)
    tn = _pick_tile(N, tile_points)
    count = float(B * N)

    z = x
    scale = jnp.ones((1, k), jnp.float32)      # identity affine before conv1
    shift = jnp.zeros((1, k), jnp.float32)
    mx = mn = None
    names = ("conv1", "conv2", "conv3", "conv4")
    for li, name in enumerate(names):
        lp = params[name]
        last = li == len(names) - 1
        outs = _conv_stage(z, scale, shift, lp["w"], tn=tn,
                           apply_prev=(li > 0), emit_z=not last,
                           emit_minmax=last, bf16_mm=(use_bf16 and last))
        if last:
            s, q, mx, mn = outs
        else:
            z, s, q = outs
        # Training-mode (biased) BatchNorm stats of this layer's raw output,
        # folded into a single per-channel affine applied by the next stage.
        mean = jnp.sum(s, axis=0) / count                          # (1, C)
        ex2 = jnp.sum(q, axis=0) / count
        var = jnp.maximum(ex2 - mean * mean, 0.0)
        scale = lp["g"] * jax.lax.rsqrt(var + EPS)
        shift = lp["be"] - mean * scale

    c4 = params["conv4"]["w"].shape[1]
    out_pad = _head_call(mx.reshape(B, c4), mn.reshape(B, c4),
                         scale, shift, params, k, use_bf16)
    return out_pad[:, :k * k].reshape(B, k, k)


# --------------------------------------------------------------------------
# Pure-JAX reference (mirrors the PyTorch forward, training-mode BN, with the
# redundant pre-BN biases included) and synthetic parameters.
# --------------------------------------------------------------------------
def _bn_relu_ref(h, g, b):
    axes = tuple(range(h.ndim - 1))
    mean = jnp.mean(h, axis=axes, keepdims=True)
    var = jnp.mean(jnp.square(h - mean), axis=axes, keepdims=True)
    return jnp.maximum((h - mean) * jax.lax.rsqrt(var + EPS) * g + b, 0.0)


def stnkd_reference(x_ncw, params, k=5):
    hp = jax.lax.Precision.HIGHEST
    x = jnp.transpose(x_ncw, (0, 2, 1)).astype(jnp.float32)
    for name in ("conv1", "conv2", "conv3", "conv4"):
        l = params[name]
        h = jnp.einsum("bnk,kc->bnc", x, l["w"], precision=hp) + l["b"]
        x = _bn_relu_ref(h, l["g"], l["be"])
    x = jnp.max(x, axis=1)
    for name in ("fc1", "fc2"):
        l = params[name]
        x = _bn_relu_ref(jnp.dot(x, l["w"], precision=hp) + l["b"], l["g"], l["be"])
    x = jnp.dot(x, params["fc3"]["w"], precision=hp) + params["fc3"]["b"]
    x = x + jnp.eye(k, dtype=jnp.float32).reshape(1, k * k)
    return x.reshape(-1, k, k)


def init_params(key, k=5):
    """Deterministic synthetic parameters (shapes match STNkd.__init__)."""
    keys = jax.random.split(key, 32)
    i = iter(range(32))

    def w(shape, scale=0.05):
        return (scale * jax.random.normal(keys[next(i)], shape)).astype(jnp.float32)

    def layer(cin, cout, with_bn=True):
        d = {"w": w((cin, cout)), "b": w((1, cout))}
        if with_bn:
            d["g"] = (1.0 + 0.1 * jax.random.normal(keys[next(i)], (1, cout))
                      ).astype(jnp.float32)
            d["be"] = (0.1 * jax.random.normal(keys[next(i)], (1, cout))
                       ).astype(jnp.float32)
        return d

    return {
        "conv1": layer(k, 64),
        "conv2": layer(64, 64),
        "conv3": layer(64, 128),
        "conv4": layer(128, 1024),
        "fc1": layer(1024, 512),
        "fc2": layer(512, 256),
        "fc3": layer(256, k * k, with_bn=False),
    }


if __name__ == "__main__":
    k = 5
    B, N = 8, 32
    key = jax.random.PRNGKey(0)
    kx, kp = jax.random.split(key)

    # PyTorch-convention input: (batch, channels=k, points=N)
    x_ncw = jax.random.normal(kx, (B, k, N), dtype=jnp.float32)
    params = init_params(kp, k=k)

    ref = stnkd_reference(x_ncw, params, k=k)

    # tile_points=8 -> 4 point-tiles per batch element: exercises the streaming
    # BN-stat and max-pool accumulation across grid steps.
    out_f32 = jax.block_until_ready(
        stnkd_forward(x_ncw, params, k=k, tile_points=8, use_bf16=False))
    assert out_f32.shape == (B, k, k)
    assert jnp.allclose(out_f32, ref, rtol=1e-2, atol=1e-2), "f32 mismatch vs reference"

    out_bf16 = jax.block_until_ready(
        stnkd_forward(x_ncw, params, k=k, tile_points=8, use_bf16=True))
    assert out_bf16.shape == (B, k, k)
    assert jnp.allclose(out_bf16, ref, rtol=3e-2, atol=3e-2), "bf16 mismatch vs reference"

    print("KERNEL_OK")
</pallas_src>

<mosaic_0001>
module attributes {stable_mosaic.version = 11 : i64} {
  func.func @_conv_stage_kernel(%arg0: i32, %arg1: i32, %arg2: memref<1x8x5xf32, #tpu.memory_space<vmem>>, %arg3: memref<1x5xf32, #tpu.memory_space<vmem>>, %arg4: memref<1x5xf32, #tpu.memory_space<vmem>>, %arg5: memref<5x64xf32, #tpu.memory_space<vmem>>, %arg6: memref<1x8x64xf32, #tpu.memory_space<vmem>>, %arg7: memref<1x1x64xf32, #tpu.memory_space<vmem>>, %arg8: memref<1x1x64xf32, #tpu.memory_space<vmem>>) attributes {dimension_semantics = [#tpu.dimension_semantics<parallel>, #tpu.dimension_semantics<arbitrary>], iteration_bounds = array<i64: 8, 4>, scalar_prefetch = 0 : i64, scratch_operands = 0 : i64, tpu.core_type = #tpu.core_type<tc>, window_params = [{transform_indices = @transform_0, window_bounds = array<i64: 1, 8, 5>}, {pipeline_mode = #tpu.pipeline_mode<synchronous>, transform_indices = @transform_1, window_bounds = array<i64: 1, 5>}, {pipeline_mode = #tpu.pipeline_mode<synchronous>, transform_indices = @transform_2, window_bounds = array<i64: 1, 5>}, {pipeline_mode = #tpu.pipeline_mode<synchronous>, transform_indices = @transform_3, window_bounds = array<i64: 5, 64>}, {transform_indices = @transform_4, window_bounds = array<i64: 1, 8, 64>}, {transform_indices = @transform_5, window_bounds = array<i64: 1, 1, 64>}, {transform_indices = @transform_6, window_bounds = array<i64: 1, 1, 64>}]} {
    %c0 = arith.constant 0 : index
    %c0_0 = arith.constant 0 : index
    %c0_1 = arith.constant 0 : index
    %0 = vector.load %arg2[%c0, %c0_0, %c0_1] : memref<1x8x5xf32, #tpu.memory_space<vmem>>, vector<1x8x5xf32>
    %1 = vector.shape_cast %0 : vector<1x8x5xf32> to vector<8x5xf32>
    %c0_2 = arith.constant 0 : index
    %c0_3 = arith.constant 0 : index
    %2 = vector.load %arg5[%c0_2, %c0_3] : memref<5x64xf32, #tpu.memory_space<vmem>>, vector<5x64xf32>
    %cst = arith.constant dense<0.000000e+00> : vector<8x64xf32>
    %3 = tpu.matmul %1, %2, %cst {dimension_numbers = #tpu.dot_dimension_numbers<[1], [0], [0], [1], [0, 0, 1, 1], [], []>} : vector<8x5xf32>, vector<5x64xf32>, vector<8x64xf32> -> vector<8x64xf32>
    %c0_4 = arith.constant 0 : index
    %c0_5 = arith.constant 0 : index
    %c0_6 = arith.constant 0 : index
    %4 = vector.load %arg6[%c0_4, %c0_5, %c0_6] : memref<1x8x64xf32, #tpu.memory_space<vmem>>, vector<1x8x64xf32>
    %5 = vector.shape_cast %4 : vector<1x8x64xf32> to vector<8x64xf32>
    %6 = vector.shape_cast %3 : vector<8x64xf32> to vector<1x8x64xf32>
    tpu.vector_store %arg6[%c0_4, %c0_5, %c0_6], %6 {strides = array<i32>} : memref<1x8x64xf32, #tpu.memory_space<vmem>>, vector<1x8x64xf32>,
    %cst_7 = arith.constant dense<0.000000e+00> : vector<64xf32>
    %7 = vector.multi_reduction <add>, %3, %cst_7 [0] : vector<8x64xf32> to vector<64xf32>
    %8 = vector.shape_cast %7 : vector<64xf32> to vector<1x64xf32>
    %9 = vector.shape_cast %8 : vector<1x64xf32> to vector<1x1x64xf32>
    %10 = arith.mulf %3, %3 : vector<8x64xf32>
    %cst_8 = arith.constant dense<0.000000e+00> : vector<64xf32>
    %11 = vector.multi_reduction <add>, %10, %cst_8 [0] : vector<8x64xf32> to vector<64xf32>
    %12 = vector.shape_cast %11 : vector<64xf32> to vector<1x64xf32>
    %13 = vector.shape_cast %12 : vector<1x64xf32> to vector<1x1x64xf32>
    %c0_i32 = arith.constant 0 : i32
    %14 = arith.cmpi eq, %arg1, %c0_i32 : i32
    %15 = arith.extui %14 : i1 to i32
    %c0_i32_9 = arith.constant 0 : i32
    %16 = arith.cmpi ne, %15, %c0_i32_9 : i32
    scf.if %16 {
      %c0_12 = arith.constant 0 : index
      %c0_13 = arith.constant 0 : index
      %c0_14 = arith.constant 0 : index
      %20 = vector.load %arg7[%c0_12, %c0_13, %c0_14] : memref<1x1x64xf32, #tpu.memory_space<vmem>>, vector<1x1x64xf32>
      tpu.vector_store %arg7[%c0_12, %c0_13, %c0_14], %9 {strides = array<i32>} : memref<1x1x64xf32, #tpu.memory_space<vmem>>, vector<1x1x64xf32>,
      %c0_15 = arith.constant 0 : index
      %c0_16 = arith.constant 0 : index
      %c0_17 = arith.constant 0 : index
      %21 = vector.load %arg8[%c0_15, %c0_16, %c0_17] : memref<1x1x64xf32, #tpu.memory_space<vmem>>, vector<1x1x64xf32>
      tpu.vector_store %arg8[%c0_15, %c0_16, %c0_17], %13 {strides = array<i32>} : memref<1x1x64xf32, #tpu.memory_space<vmem>>, vector<1x1x64xf32>,
    } else {
    }
    %c0_i32_10 = arith.constant 0 : i32
    %17 = arith.cmpi ne, %arg1, %c0_i32_10 : i32
    %18 = arith.extui %17 : i1 to i32
    %c0_i32_11 = arith.constant 0 : i32
    %19 = arith.cmpi ne, %18, %c0_i32_11 : i32
    scf.if %19 {
      %c0_12 = arith.constant 0 : index
      %c0_13 = arith.constant 0 : index
      %c0_14 = arith.constant 0 : index
      %20 = vector.load %arg7[%c0_12, %c0_13, %c0_14] : memref<1x1x64xf32, #tpu.memory_space<vmem>>, vector<1x1x64xf32>
      %21 = arith.addf %20, %9 : vector<1x1x64xf32>
      %c0_15 = arith.constant 0 : index
      %c0_16 = arith.constant 0 : index
      %c0_17 = arith.constant 0 : index
      %22 = vector.load %arg7[%c0_15, %c0_16, %c0_17] : memref<1x1x64xf32, #tpu.memory_space<vmem>>, vector<1x1x64xf32>
      tpu.vector_store %arg7[%c0_15, %c0_16, %c0_17], %21 {strides = array<i32>} : memref<1x1x64xf32, #tpu.memory_space<vmem>>, vector<1x1x64xf32>,
      %c0_18 = arith.constant 0 : index
      %c0_19 = arith.constant 0 : index
      %c0_20 = arith.constant 0 : index
      %23 = vector.load %arg8[%c0_18, %c0_19, %c0_20] : memref<1x1x64xf32, #tpu.memory_space<vmem>>, vector<1x1x64xf32>
      %24 = arith.addf %23, %13 : vector<1x1x64xf32>
      %c0_21 = arith.constant 0 : index
      %c0_22 = arith.constant 0 : index
      %c0_23 = arith.constant 0 : index
      %25 = vector.load %arg8[%c0_21, %c0_22, %c0_23] : memref<1x1x64xf32, #tpu.memory_space<vmem>>, vector<1x1x64xf32>
      tpu.vector_store %arg8[%c0_21, %c0_22, %c0_23], %24 {strides = array<i32>} : memref<1x1x64xf32, #tpu.memory_space<vmem>>, vector<1x1x64xf32>,
    } else {
    }
    return
  }
  func.func @transform_0(%arg0: i32, %arg1: i32) -> (i32, i32, i32) {
    %c0_i32 = arith.constant 0 : i32
    %c0_i32_0 = arith.constant 0 : i32
    return %arg0, %arg1, %c0_i32 : i32, i32, i32
  }
  func.func @transform_1(%arg0: i32, %arg1: i32) -> (i32, i32) {
    %c0_i32 = arith.constant 0 : i32
    %c0_i32_0 = arith.constant 0 : i32
    %c0_i32_1 = arith.constant 0 : i32
    return %c0_i32, %c0_i32_0 : i32, i32
  }
  func.func @transform_2(%arg0: i32, %arg1: i32) -> (i32, i32) {
    %c0_i32 = arith.constant 0 : i32
    %c0_i32_0 = arith.constant 0 : i32
    %c0_i32_1 = arith.constant 0 : i32
    return %c0_i32, %c0_i32_0 : i32, i32
  }
  func.func @transform_3(%arg0: i32, %arg1: i32) -> (i32, i32) {
    %c0_i32 = arith.constant 0 : i32
    %c0_i32_0 = arith.constant 0 : i32
    %c0_i32_1 = arith.constant 0 : i32
    return %c0_i32, %c0_i32_0 : i32, i32
  }
  func.func @transform_4(%arg0: i32, %arg1: i32) -> (i32, i32, i32) {
    %c0_i32 = arith.constant 0 : i32
    %c0_i32_0 = arith.constant 0 : i32
    return %arg0, %arg1, %c0_i32 : i32, i32, i32
  }
  func.func @transform_5(%arg0: i32, %arg1: i32) -> (i32, i32, i32) {
    %c0_i32 = arith.constant 0 : i32
    %c0_i32_0 = arith.constant 0 : i32
    %c0_i32_1 = arith.constant 0 : i32
    return %arg0, %c0_i32, %c0_i32_0 : i32, i32, i32
  }
  func.func @transform_6(%arg0: i32, %arg1: i32) -> (i32, i32, i32) {
    %c0_i32 = arith.constant 0 : i32
    %c0_i32_0 = arith.constant 0 : i32
    %c0_i32_1 = arith.constant 0 : i32
    return %arg0, %c0_i32, %c0_i32_0 : i32, i32, i32
  }
}

module attributes {stable_mosaic.version = 11 : i64} {
  func.func @_conv_stage_kernel(%arg0: i32, %arg1: i32, %arg2: memref<1x8x64xf32, #tpu.memory_space<vmem>>, %arg3: memref<1x64xf32, #tpu.memory_space<vmem>>, %arg4: memref<1x64xf32, #tpu.memory_space<vmem>>, %arg5: memref<64x128xf32, #tpu.memory_space<vmem>>, %arg6: memref<1x8x128xf32, #tpu.memory_space<vmem>>, %arg7: memref<1x1x128xf32, #tpu.memory_space<vmem>>, %arg8: memref<1x1x128xf32, #tpu.memory_space<vmem>>) attributes {dimension_semantics = [#tpu.dimension_semantics<parallel>, #tpu.dimension_semantics<arbitrary>], iteration_bounds = array<i64: 8, 4>, scalar_prefetch = 0 : i64, scratch_operands = 0 : i64, tpu.core_type = #tpu.core_type<tc>, window_params = [{transform_indices = @transform_0, window_bounds = array<i64: 1, 8, 64>}, {pipeline_mode = #tpu.pipeline_mode<synchronous>, transform_indices = @transform_1, window_bounds = array<i64: 1, 64>}, {pipeline_mode = #tpu.pipeline_mode<synchronous>, transform_indices = @transform_2, window_bounds = array<i64: 1, 64>}, {pipeline_mode = #tpu.pipeline_mode<synchronous>, transform_indices = @transform_3, window_bounds = array<i64: 64, 128>}, {transform_indices = @transform_4, window_bounds = array<i64: 1, 8, 128>}, {transform_indices = @transform_5, window_bounds = array<i64: 1, 1, 128>}, {transform_indices = @transform_6, window_bounds = array<i64: 1, 1, 128>}]} {
    %c0 = arith.constant 0 : index
    %c0_0 = arith.constant 0 : index
    %c0_1 = arith.constant 0 : index
    %0 = vector.load %arg2[%c0, %c0_0, %c0_1] : memref<1x8x64xf32, #tpu.memory_space<vmem>>, vector<1x8x64xf32>
    %1 = vector.shape_cast %0 : vector<1x8x64xf32> to vector<8x64xf32>
    %c0_2 = arith.constant 0 : index
    %c0_3 = arith.constant 0 : index
    %2 = vector.load %arg3[%c0_2, %c0_3] : memref<1x64xf32, #tpu.memory_space<vmem>>, vector<1x64xf32>
    %3 = vector.broadcast %2 : vector<1x64xf32> to vector<8x64xf32>
    %4 = arith.mulf %1, %3 : vector<8x64xf32>
    %c0_4 = arith.constant 0 : index
    %c0_5 = arith.constant 0 : index
    %5 = vector.load %arg4[%c0_4, %c0_5] : memref<1x64xf32, #tpu.memory_space<vmem>>, vector<1x64xf32>
    %6 = vector.broadcast %5 : vector<1x64xf32> to vector<8x64xf32>
    %7 = arith.addf %4, %6 : vector<8x64xf32>
    %cst = arith.constant 0.000000e+00 : f32
    %8 = vector.broadcast %cst : f32 to vector<8x64xf32>
    %9 = arith.maximumf %7, %8 : vector<8x64xf32>
    %c0_6 = arith.constant 0 : index
    %c0_7 = arith.constant 0 : index
    %10 = vector.load %arg5[%c0_6, %c0_7] : memref<64x128xf32, #tpu.memory_space<vmem>>, vector<64x128xf32>
    %cst_8 = arith.constant dense<0.000000e+00> : vector<8x128xf32>
    %11 = tpu.matmul %9, %10, %cst_8 {dimension_numbers = #tpu.dot_dimension_numbers<[1], [0], [0], [1], [0, 0, 1, 1], [], []>} : vector<8x64xf32>, vector<64x128xf32>, vector<8x128xf32> -> vector<8x128xf32>
    %c0_9 = arith.constant 0 : index
    %c0_10 = arith.constant 0 : index
    %c0_11 = arith.constant 0 : index
    %12 = vector.load %arg6[%c0_9, %c0_10, %c0_11] : memref<1x8x128xf32, #tpu.memory_space<vmem>>, vector<1x8x128xf32>
    %13 = vector.shape_cast %12 : vector<1x8x128xf32> to vector<8x128xf32>
    %14 = vector.shape_cast %11 : vector<8x128xf32> to vector<1x8x128xf32>
    tpu.vector_store %arg6[%c0_9, %c0_10, %c0_11], %14 {strides = array<i32>} : memref<1x8x128xf32, #tpu.memory_space<vmem>>, vector<1x8x128xf32>,
    %cst_12 = arith.constant dense<0.000000e+00> : vector<128xf32>
    %15 = vector.multi_reduction <add>, %11, %cst_12 [0] : vector<8x128xf32> to vector<128xf32>
    %16 = vector.shape_cast %15 : vector<128xf32> to vector<1x128xf32>
    %17 = vector.shape_cast %16 : vector<1x128xf32> to vector<1x1x128xf32>
    %18 = arith.mulf %11, %11 : vector<8x128xf32>
    %cst_13 = arith.constant dense<0.000000e+00> : vector<128xf32>
    %19 = vector.multi_reduction <add>, %18, %cst_13 [0] : vector<8x128xf32> to vector<128xf32>
    %20 = vector.shape_cast %19 : vector<128xf32> to vector<1x128xf32>
    %21 = vector.shape_cast %20 : vector<1x128xf32> to vector<1x1x128xf32>
    %c0_i32 = arith.constant 0 : i32
    %22 = arith.cmpi eq, %arg1, %c0_i32 : i32
    %23 = arith.extui %22 : i1 to i32
    %c0_i32_14 = arith.constant 0 : i32
    %24 = arith.cmpi ne, %23, %c0_i32_14 : i32
    scf.if %24 {
      %c0_17 = arith.constant 0 : index
      %c0_18 = arith.constant 0 : index
      %c0_19 = arith.constant 0 : index
      %28 = vector.load %arg7[%c0_17, %c0_18, %c0_19] : memref<1x1x128xf32, #tpu.memory_space<vmem>>, vector<1x1x128xf32>
      tpu.vector_store %arg7[%c0_17, %c0_18, %c0_19], %17 {strides = array<i32>} : memref<1x1x128xf32, #tpu.memory_space<vmem>>, vector<1x1x128xf32>,
      %c0_20 = arith.constant 0 : index
      %c0_21 = arith.constant 0 : index
      %c0_22 = arith.constant 0 : index
      %29 = vector.load %arg8[%c0_20, %c0_21, %c0_22] : memref<1x1x128xf32, #tpu.memory_space<vmem>>, vector<1x1x128xf32>
      tpu.vector_store %arg8[%c0_20, %c0_21, %c0_22], %21 {strides = array<i32>} : memref<1x1x128xf32, #tpu.memory_space<vmem>>, vector<1x1x128xf32>,
    } else {
    }
    %c0_i32_15 = arith.constant 0 : i32
    %25 = arith.cmpi ne, %arg1, %c0_i32_15 : i32
    %26 = arith.extui %25 : i1 to i32
    %c0_i32_16 = arith.constant 0 : i32
    %27 = arith.cmpi ne, %26, %c0_i32_16 : i32
    scf.if %27 {
      %c0_17 = arith.constant 0 : index
      %c0_18 = arith.constant 0 : index
      %c0_19 = arith.constant 0 : index
      %28 = vector.load %arg7[%c0_17, %c0_18, %c0_19] : memref<1x1x128xf32, #tpu.memory_space<vmem>>, vector<1x1x128xf32>
      %29 = arith.addf %28, %17 : vector<1x1x128xf32>
      %c0_20 = arith.constant 0 : index
      %c0_21 = arith.constant 0 : index
      %c0_22 = arith.constant 0 : index
      %30 = vector.load %arg7[%c0_20, %c0_21, %c0_22] : memref<1x1x128xf32, #tpu.memory_space<vmem>>, vector<1x1x128xf32>
      tpu.vector_store %arg7[%c0_20, %c0_21, %c0_22], %29 {strides = array<i32>} : memref<1x1x128xf32, #tpu.memory_space<vmem>>, vector<1x1x128xf32>,
      %c0_23 = arith.constant 0 : index
      %c0_24 = arith.constant 0 : index
      %c0_25 = arith.constant 0 : index
      %31 = vector.load %arg8[%c0_23, %c0_24, %c0_25] : memref<1x1x128xf32, #tpu.memory_space<vmem>>, vector<1x1x128xf32>
      %32 = arith.addf %31, %21 : vector<1x1x128xf32>
      %c0_26 = arith.constant 0 : index
      %c0_27 = arith.constant 0 : index
      %c0_28 = arith.constant 0 : index
      %33 = vector.load %arg8[%c0_26, %c0_27, %c0_28] : memref<1x1x128xf32, #tpu.memory_space<vmem>>, vector<1x1x128xf32>
      tpu.vector_store %arg8[%c0_26, %c0_27, %c0_28], %32 {strides = array<i32>} : memref<1x1x128xf32, #tpu.memory_space<vmem>>, vector<1x1x128xf32>,
    } else {
    }
    return
  }
  func.func @transform_0(%arg0: i32, %arg1: i32) -> (i32, i32, i32) {
    %c0_i32 = arith.constant 0 : i32
    %c0_i32_0 = arith.constant 0 : i32
    return %arg0, %arg1, %c0_i32 : i32, i32, i32
  }
  func.func @transform_1(%arg0: i32, %arg1: i32) -> (i32, i32) {
    %c0_i32 = arith.constant 0 : i32
    %c0_i32_0 = arith.constant 0 : i32
    %c0_i32_1 = arith.constant 0 : i32
    return %c0_i32, %c0_i32_0 : i32, i32
  }
  func.func @transform_2(%arg0: i32, %arg1: i32) -> (i32, i32) {
    %c0_i32 = arith.constant 0 : i32
    %c0_i32_0 = arith.constant 0 : i32
    %c0_i32_1 = arith.constant 0 : i32
    return %c0_i32, %c0_i32_0 : i32, i32
  }
  func.func @transform_3(%arg0: i32, %arg1: i32) -> (i32, i32) {
    %c0_i32 = arith.constant 0 : i32
    %c0_i32_0 = arith.constant 0 : i32
    %c0_i32_1 = arith.constant 0 : i32
    return %c0_i32, %c0_i32_0 : i32, i32
  }
  func.func @transform_4(%arg0: i32, %arg1: i32) -> (i32, i32, i32) {
    %c0_i32 = arith.constant 0 : i32
    %c0_i32_0 = arith.constant 0 : i32
    return %arg0, %arg1, %c0_i32 : i32, i32, i32
  }
  func.func @transform_5(%arg0: i32, %arg1: i32) -> (i32, i32, i32) {
    %c0_i32 = arith.constant 0 : i32
    %c0_i32_0 = arith.constant 0 : i32
    %c0_i32_1 = arith.constant 0 : i32
    return %arg0, %c0_i32, %c0_i32_0 : i32, i32, i32
  }
  func.func @transform_6(%arg0: i32, %arg1: i32) -> (i32, i32, i32) {
    %c0_i32 = arith.constant 0 : i32
    %c0_i32_0 = arith.constant 0 : i32
    %c0_i32_1 = arith.constant 0 : i32
    return %arg0, %c0_i32, %c0_i32_0 : i32, i32, i32
  }
}

module attributes {stable_mosaic.version = 11 : i64} {
  func.func @_conv_stage_kernel(%arg0: i32, %arg1: i32, %arg2: memref<1x8x64xf32, #tpu.memory_space<vmem>>, %arg3: memref<1x64xf32, #tpu.memory_space<vmem>>, %arg4: memref<1x64xf32, #tpu.memory_space<vmem>>, %arg5: memref<64x64xf32, #tpu.memory_space<vmem>>, %arg6: memref<1x8x64xf32, #tpu.memory_space<vmem>>, %arg7: memref<1x1x64xf32, #tpu.memory_space<vmem>>, %arg8: memref<1x1x64xf32, #tpu.memory_space<vmem>>) attributes {dimension_semantics = [#tpu.dimension_semantics<parallel>, #tpu.dimension_semantics<arbitrary>], iteration_bounds = array<i64: 8, 4>, scalar_prefetch = 0 : i64, scratch_operands = 0 : i64, tpu.core_type = #tpu.core_type<tc>, window_params = [{transform_indices = @transform_0, window_bounds = array<i64: 1, 8, 64>}, {pipeline_mode = #tpu.pipeline_mode<synchronous>, transform_indices = @transform_1, window_bounds = array<i64: 1, 64>}, {pipeline_mode = #tpu.pipeline_mode<synchronous>, transform_indices = @transform_2, window_bounds = array<i64: 1, 64>}, {pipeline_mode = #tpu.pipeline_mode<synchronous>, transform_indices = @transform_3, window_bounds = array<i64: 64, 64>}, {transform_indices = @transform_4, window_bounds = array<i64: 1, 8, 64>}, {transform_indices = @transform_5, window_bounds = array<i64: 1, 1, 64>}, {transform_indices = @transform_6, window_bounds = array<i64: 1, 1, 64>}]} {
    %c0 = arith.constant 0 : index
    %c0_0 = arith.constant 0 : index
    %c0_1 = arith.constant 0 : index
    %0 = vector.load %arg2[%c0, %c0_0, %c0_1] : memref<1x8x64xf32, #tpu.memory_space<vmem>>, vector<1x8x64xf32>
    %1 = vector.shape_cast %0 : vector<1x8x64xf32> to vector<8x64xf32>
    %c0_2 = arith.constant 0 : index
    %c0_3 = arith.constant 0 : index
    %2 = vector.load %arg3[%c0_2, %c0_3] : memref<1x64xf32, #tpu.memory_space<vmem>>, vector<1x64xf32>
    %3 = vector.broadcast %2 : vector<1x64xf32> to vector<8x64xf32>
    %4 = arith.mulf %1, %3 : vector<8x64xf32>
    %c0_4 = arith.constant 0 : index
    %c0_5 = arith.constant 0 : index
    %5 = vector.load %arg4[%c0_4, %c0_5] : memref<1x64xf32, #tpu.memory_space<vmem>>, vector<1x64xf32>
    %6 = vector.broadcast %5 : vector<1x64xf32> to vector<8x64xf32>
    %7 = arith.addf %4, %6 : vector<8x64xf32>
    %cst = arith.constant 0.000000e+00 : f32
    %8 = vector.broadcast %cst : f32 to vector<8x64xf32>
    %9 = arith.maximumf %7, %8 : vector<8x64xf32>
    %c0_6 = arith.constant 0 : index
    %c0_7 = arith.constant 0 : index
    %10 = vector.load %arg5[%c0_6, %c0_7] : memref<64x64xf32, #tpu.memory_space<vmem>>, vector<64x64xf32>
    %cst_8 = arith.constant dense<0.000000e+00> : vector<8x64xf32>
    %11 = tpu.matmul %9, %10, %cst_8 {dimension_numbers = #tpu.dot_dimension_numbers<[1], [0], [0], [1], [0, 0, 1, 1], [], []>} : vector<8x64xf32>, vector<64x64xf32>, vector<8x64xf32> -> vector<8x64xf32>
    %c0_9 = arith.constant 0 : index
    %c0_10 = arith.constant 0 : index
    %c0_11 = arith.constant 0 : index
    %12 = vector.load %arg6[%c0_9, %c0_10, %c0_11] : memref<1x8x64xf32, #tpu.memory_space<vmem>>, vector<1x8x64xf32>
    %13 = vector.shape_cast %12 : vector<1x8x64xf32> to vector<8x64xf32>
    %14 = vector.shape_cast %11 : vector<8x64xf32> to vector<1x8x64xf32>
    tpu.vector_store %arg6[%c0_9, %c0_10, %c0_11], %14 {strides = array<i32>} : memref<1x8x64xf32, #tpu.memory_space<vmem>>, vector<1x8x64xf32>,
    %cst_12 = arith.constant dense<0.000000e+00> : vector<64xf32>
    %15 = vector.multi_reduction <add>, %11, %cst_12 [0] : vector<8x64xf32> to vector<64xf32>
    %16 = vector.shape_cast %15 : vector<64xf32> to vector<1x64xf32>
    %17 = vector.shape_cast %16 : vector<1x64xf32> to vector<1x1x64xf32>
    %18 = arith.mulf %11, %11 : vector<8x64xf32>
    %cst_13 = arith.constant dense<0.000000e+00> : vector<64xf32>
    %19 = vector.multi_reduction <add>, %18, %cst_13 [0] : vector<8x64xf32> to vector<64xf32>
    %20 = vector.shape_cast %19 : vector<64xf32> to vector<1x64xf32>
    %21 = vector.shape_cast %20 : vector<1x64xf32> to vector<1x1x64xf32>
    %c0_i32 = arith.constant 0 : i32
    %22 = arith.cmpi eq, %arg1, %c0_i32 : i32
    %23 = arith.extui %22 : i1 to i32
    %c0_i32_14 = arith.constant 0 : i32
    %24 = arith.cmpi ne, %23, %c0_i32_14 : i32
    scf.if %24 {
      %c0_17 = arith.constant 0 : index
      %c0_18 = arith.constant 0 : index
      %c0_19 = arith.constant 0 : index
      %28 = vector.load %arg7[%c0_17, %c0_18, %c0_19] : memref<1x1x64xf32, #tpu.memory_space<vmem>>, vector<1x1x64xf32>
      tpu.vector_store %arg7[%c0_17, %c0_18, %c0_19], %17 {strides = array<i32>} : memref<1x1x64xf32, #tpu.memory_space<vmem>>, vector<1x1x64xf32>,
      %c0_20 = arith.constant 0 : index
      %c0_21 = arith.constant 0 : index
      %c0_22 = arith.constant 0 : index
      %29 = vector.load %arg8[%c0_20, %c0_21, %c0_22] : memref<1x1x64xf32, #tpu.memory_space<vmem>>, vector<1x1x64xf32>
      tpu.vector_store %arg8[%c0_20, %c0_21, %c0_22], %21 {strides = array<i32>} : memref<1x1x64xf32, #tpu.memory_space<vmem>>, vector<1x1x64xf32>,
    } else {
    }
    %c0_i32_15 = arith.constant 0 : i32
    %25 = arith.cmpi ne, %arg1, %c0_i32_15 : i32
    %26 = arith.extui %25 : i1 to i32
    %c0_i32_16 = arith.constant 0 : i32
    %27 = arith.cmpi ne, %26, %c0_i32_16 : i32
    scf.if %27 {
      %c0_17 = arith.constant 0 : index
      %c0_18 = arith.constant 0 : index
      %c0_19 = arith.constant 0 : index
      %28 = vector.load %arg7[%c0_17, %c0_18, %c0_19] : memref<1x1x64xf32, #tpu.memory_space<vmem>>, vector<1x1x64xf32>
      %29 = arith.addf %28, %17 : vector<1x1x64xf32>
      %c0_20 = arith.constant 0 : index
      %c0_21 = arith.constant 0 : index
      %c0_22 = arith.constant 0 : index
      %30 = vector.load %arg7[%c0_20, %c0_21, %c0_22] : memref<1x1x64xf32, #tpu.memory_space<vmem>>, vector<1x1x64xf32>
      tpu.vector_store %arg7[%c0_20, %c0_21, %c0_22], %29 {strides = array<i32>} : memref<1x1x64xf32, #tpu.memory_space<vmem>>, vector<1x1x64xf32>,
      %c0_23 = arith.constant 0 : index
      %c0_24 = arith.constant 0 : index
      %c0_25 = arith.constant 0 : index
      %31 = vector.load %arg8[%c0_23, %c0_24, %c0_25] : memref<1x1x64xf32, #tpu.memory_space<vmem>>, vector<1x1x64xf32>
      %32 = arith.addf %31, %21 : vector<1x1x64xf32>
      %c0_26 = arith.constant 0 : index
      %c0_27 = arith.constant 0 : index
      %c0_28 = arith.constant 0 : index
      %33 = vector.load %arg8[%c0_26, %c0_27, %c0_28] : memref<1x1x64xf32, #tpu.memory_space<vmem>>, vector<1x1x64xf32>
      tpu.vector_store %arg8[%c0_26, %c0_27, %c0_28], %32 {strides = array<i32>} : memref<1x1x64xf32, #tpu.memory_space<vmem>>, vector<1x1x64xf32>,
    } else {
    }
    return
  }
  func.func @transform_0(%arg0: i32, %arg1: i32) -> (i32, i32, i32) {
    %c0_i32 = arith.constant 0 : i32
    %c0_i32_0 = arith.constant 0 : i32
    return %arg0, %arg1, %c0_i32 : i32, i32, i32
  }
  func.func @transform_1(%arg0: i32, %arg1: i32) -> (i32, i32) {
    %c0_i32 = arith.constant 0 : i32
    %c0_i32_0 = arith.constant 0 : i32
    %c0_i32_1 = arith.constant 0 : i32
    return %c0_i32, %c0_i32_0 : i32, i32
  }
  func.func @transform_2(%arg0: i32, %arg1: i32) -> (i32, i32) {
    %c0_i32 = arith.constant 0 : i32
    %c0_i32_0 = arith.constant 0 : i32
    %c0_i32_1 = arith.constant 0 : i32
    return %c0_i32, %c0_i32_0 : i32, i32
  }
  func.func @transform_3(%arg0: i32, %arg1: i32) -> (i32, i32) {
    %c0_i32 = arith.constant 0 : i32
    %c0_i32_0 = arith.constant 0 : i32
    %c0_i32_1 = arith.constant 0 : i32
    return %c0_i32, %c0_i32_0 : i32, i32
  }
  func.func @transform_4(%arg0: i32, %arg1: i32) -> (i32, i32, i32) {
    %c0_i32 = arith.constant 0 : i32
    %c0_i32_0 = arith.constant 0 : i32
    return %arg0, %arg1, %c0_i32 : i32, i32, i32
  }
  func.func @transform_5(%arg0: i32, %arg1: i32) -> (i32, i32, i32) {
    %c0_i32 = arith.constant 0 : i32
    %c0_i32_0 = arith.constant 0 : i32
    %c0_i32_1 = arith.constant 0 : i32
    return %arg0, %c0_i32, %c0_i32_0 : i32, i32, i32
  }
  func.func @transform_6(%arg0: i32, %arg1: i32) -> (i32, i32, i32) {
    %c0_i32 = arith.constant 0 : i32
    %c0_i32_0 = arith.constant 0 : i32
    %c0_i32_1 = arith.constant 0 : i32
    return %arg0, %c0_i32, %c0_i32_0 : i32, i32, i32
  }
}

module attributes {stable_mosaic.version = 11 : i64} {
  func.func @_conv_stage_kernel(%arg0: i32, %arg1: i32, %arg2: memref<1x8x128xf32, #tpu.memory_space<vmem>>, %arg3: memref<1x128xf32, #tpu.memory_space<vmem>>, %arg4: memref<1x128xf32, #tpu.memory_space<vmem>>, %arg5: memref<128x1024xf32, #tpu.memory_space<vmem>>, %arg6: memref<1x1x1024xf32, #tpu.memory_space<vmem>>, %arg7: memref<1x1x1024xf32, #tpu.memory_space<vmem>>, %arg8: memref<1x1x1024xf32, #tpu.memory_space<vmem>>, %arg9: memref<1x1x1024xf32, #tpu.memory_space<vmem>>) attributes {dimension_semantics = [#tpu.dimension_semantics<parallel>, #tpu.dimension_semantics<arbitrary>], iteration_bounds = array<i64: 8, 4>, scalar_prefetch = 0 : i64, scratch_operands = 0 : i64, tpu.core_type = #tpu.core_type<tc>, window_params = [{transform_indices = @transform_0, window_bounds = array<i64: 1, 8, 128>}, {pipeline_mode = #tpu.pipeline_mode<synchronous>, transform_indices = @transform_1, window_bounds = array<i64: 1, 128>}, {pipeline_mode = #tpu.pipeline_mode<synchronous>, transform_indices = @transform_2, window_bounds = array<i64: 1, 128>}, {pipeline_mode = #tpu.pipeline_mode<synchronous>, transform_indices = @transform_3, window_bounds = array<i64: 128, 1024>}, {transform_indices = @transform_4, window_bounds = array<i64: 1, 1, 1024>}, {transform_indices = @transform_5, window_bounds = array<i64: 1, 1, 1024>}, {transform_indices = @transform_6, window_bounds = array<i64: 1, 1, 1024>}, {transform_indices = @transform_7, window_bounds = array<i64: 1, 1, 1024>}]} {
    %c0 = arith.constant 0 : index
    %c0_0 = arith.constant 0 : index
    %c0_1 = arith.constant 0 : index
    %0 = vector.load %arg2[%c0, %c0_0, %c0_1] : memref<1x8x128xf32, #tpu.memory_space<vmem>>, vector<1x8x128xf32>
    %1 = vector.shape_cast %0 : vector<1x8x128xf32> to vector<8x128xf32>
    %c0_2 = arith.constant 0 : index
    %c0_3 = arith.constant 0 : index
    %2 = vector.load %arg3[%c0_2, %c0_3] : memref<1x128xf32, #tpu.memory_space<vmem>>, vector<1x128xf32>
    %3 = vector.broadcast %2 : vector<1x128xf32> to vector<8x128xf32>
    %4 = arith.mulf %1, %3 : vector<8x128xf32>
    %c0_4 = arith.constant 0 : index
    %c0_5 = arith.constant 0 : index
    %5 = vector.load %arg4[%c0_4, %c0_5] : memref<1x128xf32, #tpu.memory_space<vmem>>, vector<1x128xf32>
    %6 = vector.broadcast %5 : vector<1x128xf32> to vector<8x128xf32>
    %7 = arith.addf %4, %6 : vector<8x128xf32>
    %cst = arith.constant 0.000000e+00 : f32
    %8 = vector.broadcast %cst : f32 to vector<8x128xf32>
    %9 = arith.maximumf %7, %8 : vector<8x128xf32>
    %c0_6 = arith.constant 0 : index
    %c0_7 = arith.constant 0 : index
    %10 = vector.load %arg5[%c0_6, %c0_7] : memref<128x1024xf32, #tpu.memory_space<vmem>>, vector<128x1024xf32>
    %cst_8 = arith.constant dense<0.000000e+00> : vector<8x1024xf32>
    %11 = tpu.matmul %9, %10, %cst_8 {dimension_numbers = #tpu.dot_dimension_numbers<[1], [0], [0], [1], [0, 0, 1, 1], [], []>} : vector<8x128xf32>, vector<128x1024xf32>, vector<8x1024xf32> -> vector<8x1024xf32>
    %cst_9 = arith.constant dense<0.000000e+00> : vector<1024xf32>
    %12 = vector.multi_reduction <add>, %11, %cst_9 [0] : vector<8x1024xf32> to vector<1024xf32>
    %13 = vector.shape_cast %12 : vector<1024xf32> to vector<1x1024xf32>
    %14 = vector.shape_cast %13 : vector<1x1024xf32> to vector<1x1x1024xf32>
    %15 = arith.mulf %11, %11 : vector<8x1024xf32>
    %cst_10 = arith.constant dense<0.000000e+00> : vector<1024xf32>
    %16 = vector.multi_reduction <add>, %15, %cst_10 [0] : vector<8x1024xf32> to vector<1024xf32>
    %17 = vector.shape_cast %16 : vector<1024xf32> to vector<1x1024xf32>
    %18 = vector.shape_cast %17 : vector<1x1024xf32> to vector<1x1x1024xf32>
    %c0_i32 = arith.constant 0 : i32
    %19 = arith.cmpi eq, %arg1, %c0_i32 : i32
    %20 = arith.extui %19 : i1 to i32
    %c0_i32_11 = arith.constant 0 : i32
    %21 = arith.cmpi ne, %20, %c0_i32_11 : i32
    scf.if %21 {
      %c0_20 = arith.constant 0 : index
      %c0_21 = arith.constant 0 : index
      %c0_22 = arith.constant 0 : index
      %37 = vector.load %arg6[%c0_20, %c0_21, %c0_22] : memref<1x1x1024xf32, #tpu.memory_space<vmem>>, vector<1x1x1024xf32>
      tpu.vector_store %arg6[%c0_20, %c0_21, %c0_22], %14 {strides = array<i32>} : memref<1x1x1024xf32, #tpu.memory_space<vmem>>, vector<1x1x1024xf32>,
      %c0_23 = arith.constant 0 : index
      %c0_24 = arith.constant 0 : index
      %c0_25 = arith.constant 0 : index
      %38 = vector.load %arg7[%c0_23, %c0_24, %c0_25] : memref<1x1x1024xf32, #tpu.memory_space<vmem>>, vector<1x1x1024xf32>
      tpu.vector_store %arg7[%c0_23, %c0_24, %c0_25], %18 {strides = array<i32>} : memref<1x1x1024xf32, #tpu.memory_space<vmem>>, vector<1x1x1024xf32>,
    } else {
    }
    %c0_i32_12 = arith.constant 0 : i32
    %22 = arith.cmpi ne, %arg1, %c0_i32_12 : i32
    %23 = arith.extui %22 : i1 to i32
    %c0_i32_13 = arith.constant 0 : i32
    %24 = arith.cmpi ne, %23, %c0_i32_13 : i32
    scf.if %24 {
      %c0_20 = arith.constant 0 : index
      %c0_21 = arith.constant 0 : index
      %c0_22 = arith.constant 0 : index
      %37 = vector.load %arg6[%c0_20, %c0_21, %c0_22] : memref<1x1x1024xf32, #tpu.memory_space<vmem>>, vector<1x1x1024xf32>
      %38 = arith.addf %37, %14 : vector<1x1x1024xf32>
      %c0_23 = arith.constant 0 : index
      %c0_24 = arith.constant 0 : index
      %c0_25 = arith.constant 0 : index
      %39 = vector.load %arg6[%c0_23, %c0_24, %c0_25] : memref<1x1x1024xf32, #tpu.memory_space<vmem>>, vector<1x1x1024xf32>
      tpu.vector_store %arg6[%c0_23, %c0_24, %c0_25], %38 {strides = array<i32>} : memref<1x1x1024xf32, #tpu.memory_space<vmem>>, vector<1x1x1024xf32>,
      %c0_26 = arith.constant 0 : index
      %c0_27 = arith.constant 0 : index
      %c0_28 = arith.constant 0 : index
      %40 = vector.load %arg7[%c0_26, %c0_27, %c0_28] : memref<1x1x1024xf32, #tpu.memory_space<vmem>>, vector<1x1x1024xf32>
      %41 = arith.addf %40, %18 : vector<1x1x1024xf32>
      %c0_29 = arith.constant 0 : index
      %c0_30 = arith.constant 0 : index
      %c0_31 = arith.constant 0 : index
      %42 = vector.load %arg7[%c0_29, %c0_30, %c0_31] : memref<1x1x1024xf32, #tpu.memory_space<vmem>>, vector<1x1x1024xf32>
      tpu.vector_store %arg7[%c0_29, %c0_30, %c0_31], %41 {strides = array<i32>} : memref<1x1x1024xf32, #tpu.memory_space<vmem>>, vector<1x1x1024xf32>,
    } else {
    }
    %cst_14 = arith.constant dense<0xFF800000> : vector<1024xf32>
    %25 = vector.multi_reduction <maximumf>, %11, %cst_14 [0] : vector<8x1024xf32> to vector<1024xf32>
    %26 = vector.shape_cast %25 : vector<1024xf32> to vector<1x1024xf32>
    %27 = vector.shape_cast %26 : vector<1x1024xf32> to vector<1x1x1024xf32>
    %cst_15 = arith.constant dense<0x7F800000> : vector<1024xf32>
    %28 = vector.multi_reduction <minimumf>, %11, %cst_15 [0] : vector<8x1024xf32> to vector<1024xf32>
    %29 = vector.shape_cast %28 : vector<1024xf32> to vector<1x1024xf32>
    %30 = vector.shape_cast %29 : vector<1x1024xf32> to vector<1x1x1024xf32>
    %c0_i32_16 = arith.constant 0 : i32
    %31 = arith.cmpi eq, %arg1, %c0_i32_16 : i32
    %32 = arith.extui %31 : i1 to i32
    %c0_i32_17 = arith.constant 0 : i32
    %33 = arith.cmpi ne, %32, %c0_i32_17 : i32
    scf.if %33 {
      %c0_20 = arith.constant 0 : index
      %c0_21 = arith.constant 0 : index
      %c0_22 = arith.constant 0 : index
      %37 = vector.load %arg8[%c0_20, %c0_21, %c0_22] : memref<1x1x1024xf32, #tpu.memory_space<vmem>>, vector<1x1x1024xf32>
      tpu.vector_store %arg8[%c0_20, %c0_21, %c0_22], %27 {strides = array<i32>} : memref<1x1x1024xf32, #tpu.memory_space<vmem>>, vector<1x1x1024xf32>,
      %c0_23 = arith.constant 0 : index
      %c0_24 = arith.constant 0 : index
      %c0_25 = arith.constant 0 : index
      %38 = vector.load %arg9[%c0_23, %c0_24, %c0_25] : memref<1x1x1024xf32, #tpu.memory_space<vmem>>, vector<1x1x1024xf32>
      tpu.vector_store %arg9[%c0_23, %c0_24, %c0_25], %30 {strides = array<i32>} : memref<1x1x1024xf32, #tpu.memory_space<vmem>>, vector<1x1x1024xf32>,
    } else {
    }
    %c0_i32_18 = arith.constant 0 : i32
    %34 = arith.cmpi ne, %arg1, %c0_i32_18 : i32
    %35 = arith.extui %34 : i1 to i32
    %c0_i32_19 = arith.constant 0 : i32
    %36 = arith.cmpi ne, %35, %c0_i32_19 : i32
    scf.if %36 {
      %c0_20 = arith.constant 0 : index
      %c0_21 = arith.constant 0 : index
      %c0_22 = arith.constant 0 : index
      %37 = vector.load %arg8[%c0_20, %c0_21, %c0_22] : memref<1x1x1024xf32, #tpu.memory_space<vmem>>, vector<1x1x1024xf32>
      %38 = arith.maximumf %37, %27 : vector<1x1x1024xf32>
      %c0_23 = arith.constant 0 : index
      %c0_24 = arith.constant 0 : index
      %c0_25 = arith.constant 0 : index
      %39 = vector.load %arg8[%c0_23, %c0_24, %c0_25] : memref<1x1x1024xf32, #tpu.memory_space<vmem>>, vector<1x1x1024xf32>
      tpu.vector_store %arg8[%c0_23, %c0_24, %c0_25], %38 {strides = array<i32>} : memref<1x1x1024xf32, #tpu.memory_space<vmem>>, vector<1x1x1024xf32>,
      %c0_26 = arith.constant 0 : index
      %c0_27 = arith.constant 0 : index
      %c0_28 = arith.constant 0 : index
      %40 = vector.load %arg9[%c0_26, %c0_27, %c0_28] : memref<1x1x1024xf32, #tpu.memory_space<vmem>>, vector<1x1x1024xf32>
      %41 = arith.minimumf %40, %30 : vector<1x1x1024xf32>
      %c0_29 = arith.constant 0 : index
      %c0_30 = arith.constant 0 : index
      %c0_31 = arith.constant 0 : index
      %42 = vector.load %arg9[%c0_29, %c0_30, %c0_31] : memref<1x1x1024xf32, #tpu.memory_space<vmem>>, vector<1x1x1024xf32>
      tpu.vector_store %arg9[%c0_29, %c0_30, %c0_31], %41 {strides = array<i32>} : memref<1x1x1024xf32, #tpu.memory_space<vmem>>, vector<1x1x1024xf32>,
    } else {
    }
    return
  }
  func.func @transform_0(%arg0: i32, %arg1: i32) -> (i32, i32, i32) {
    %c0_i32 = arith.constant 0 : i32
    %c0_i32_0 = arith.constant 0 : i32
    return %arg0, %arg1, %c0_i32 : i32, i32, i32
  }
  func.func @transform_1(%arg0: i32, %arg1: i32) -> (i32, i32) {
    %c0_i32 = arith.constant 0 : i32
    %c0_i32_0 = arith.constant 0 : i32
    %c0_i32_1 = arith.constant 0 : i32
    return %c0_i32, %c0_i32_0 : i32, i32
  }
  func.func @transform_2(%arg0: i32, %arg1: i32) -> (i32, i32) {
    %c0_i32 = arith.constant 0 : i32
    %c0_i32_0 = arith.constant 0 : i32
    %c0_i32_1 = arith.constant 0 : i32
    return %c0_i32, %c0_i32_0 : i32, i32
  }
  func.func @transform_3(%arg0: i32, %arg1: i32) -> (i32, i32) {
    %c0_i32 = arith.constant 0 : i32
    %c0_i32_0 = arith.constant 0 : i32
    %c0_i32_1 = arith.constant 0 : i32
    return %c0_i32, %c0_i32_0 : i32, i32
  }
  func.func @transform_4(%arg0: i32, %arg1: i32) -> (i32, i32, i32) {
    %c0_i32 = arith.constant 0 : i32
    %c0_i32_0 = arith.constant 0 : i32
    %c0_i32_1 = arith.constant 0 : i32
    return %arg0, %c0_i32, %c0_i32_0 : i32, i32, i32
  }
  func.func @transform_5(%arg0: i32, %arg1: i32) -> (i32, i32, i32) {
    %c0_i32 = arith.constant 0 : i32
    %c0_i32_0 = arith.constant 0 : i32
    %c0_i32_1 = arith.constant 0 : i32
    return %arg0, %c0_i32, %c0_i32_0 : i32, i32, i32
  }
  func.func @transform_6(%arg0: i32, %arg1: i32) -> (i32, i32, i32) {
    %c0_i32 = arith.constant 0 : i32
    %c0_i32_0 = arith.constant 0 : i32
    %c0_i32_1 = arith.constant 0 : i32
    return %arg0, %c0_i32, %c0_i32_0 : i32, i32, i32
  }
  func.func @transform_7(%arg0: i32, %arg1: i32) -> (i32, i32, i32) {
    %c0_i32 = arith.constant 0 : i32
    %c0_i32_0 = arith.constant 0 : i32
    %c0_i32_1 = arith.constant 0 : i32
    return %arg0, %c0_i32, %c0_i32_0 : i32, i32, i32
  }
}

module attributes {stable_mosaic.version = 11 : i64} {
  func.func @_head_kernel(%arg0: memref<8x1024xf32, #tpu.memory_space<vmem>>, %arg1: memref<8x1024xf32, #tpu.memory_space<vmem>>, %arg2: memref<1x1024xf32, #tpu.memory_space<vmem>>, %arg3: memref<1x1024xf32, #tpu.memory_space<vmem>>, %arg4: memref<1024x512xf32, #tpu.memory_space<vmem>>, %arg5: memref<1x512xf32, #tpu.memory_space<vmem>>, %arg6: memref<1x512xf32, #tpu.memory_space<vmem>>, %arg7: memref<512x256xf32, #tpu.memory_space<vmem>>, %arg8: memref<1x256xf32, #tpu.memory_space<vmem>>, %arg9: memref<1x256xf32, #tpu.memory_space<vmem>>, %arg10: memref<256x128xf32, #tpu.memory_space<vmem>>, %arg11: memref<1x128xf32, #tpu.memory_space<vmem>>, %arg12: memref<8x128xf32, #tpu.memory_space<vmem>>) attributes {dimension_semantics = [], scalar_prefetch = 0 : i64, scratch_operands = 0 : i64, tpu.core_type = #tpu.core_type<tc>} {
    %c0 = arith.constant 0 : index
    %c0_0 = arith.constant 0 : index
    %0 = vector.load %arg2[%c0, %c0_0] : memref<1x1024xf32, #tpu.memory_space<vmem>>, vector<1x1024xf32>
    %c0_1 = arith.constant 0 : index
    %c0_2 = arith.constant 0 : index
    %1 = vector.load %arg3[%c0_1, %c0_2] : memref<1x1024xf32, #tpu.memory_space<vmem>>, vector<1x1024xf32>
    %cst = arith.constant 0.000000e+00 : f32
    %2 = vector.broadcast %cst : f32 to vector<1x1024xf32>
    %3 = arith.cmpf oge, %0, %2 : vector<1x1024xf32>
    %c0_3 = arith.constant 0 : index
    %c0_4 = arith.constant 0 : index
    %4 = vector.load %arg0[%c0_3, %c0_4] : memref<8x1024xf32, #tpu.memory_space<vmem>>, vector<8x1024xf32>
    %c0_5 = arith.constant 0 : index
    %c0_6 = arith.constant 0 : index
    %5 = vector.load %arg1[%c0_5, %c0_6] : memref<8x1024xf32, #tpu.memory_space<vmem>>, vector<8x1024xf32>
    %6 = vector.shape_cast %3 : vector<1x1024xi1> to vector<1x1024xi1>
    %7 = vector.broadcast %6 : vector<1x1024xi1> to vector<8x1024xi1>
    %8 = arith.select %7, %4, %5 : vector<8x1024xi1>, vector<8x1024xf32>
    %9 = vector.broadcast %0 : vector<1x1024xf32> to vector<8x1024xf32>
    %10 = arith.mulf %8, %9 : vector<8x1024xf32>
    %11 = vector.broadcast %1 : vector<1x1024xf32> to vector<8x1024xf32>
    %12 = arith.addf %10, %11 : vector<8x1024xf32>
    %cst_7 = arith.constant 0.000000e+00 : f32
    %13 = vector.broadcast %cst_7 : f32 to vector<8x1024xf32>
    %14 = arith.maximumf %12, %13 : vector<8x1024xf32>
    %c0_8 = arith.constant 0 : index
    %c0_9 = arith.constant 0 : index
    %15 = vector.load %arg4[%c0_8, %c0_9] : memref<1024x512xf32, #tpu.memory_space<vmem>>, vector<1024x512xf32>
    %cst_10 = arith.constant dense<0.000000e+00> : vector<8x512xf32>
    %16 = tpu.matmul %14, %15, %cst_10 {dimension_numbers = #tpu.dot_dimension_numbers<[1], [0], [0], [1], [0, 0, 1, 1], [], []>} : vector<8x1024xf32>, vector<1024x512xf32>, vector<8x512xf32> -> vector<8x512xf32>
    %c0_11 = arith.constant 0 : index
    %c0_12 = arith.constant 0 : index
    %17 = vector.load %arg5[%c0_11, %c0_12] : memref<1x512xf32, #tpu.memory_space<vmem>>, vector<1x512xf32>
    %c0_13 = arith.constant 0 : index
    %c0_14 = arith.constant 0 : index
    %18 = vector.load %arg6[%c0_13, %c0_14] : memref<1x512xf32, #tpu.memory_space<vmem>>, vector<1x512xf32>
    %cst_15 = arith.constant dense<0.000000e+00> : vector<512xf32>
    %19 = vector.multi_reduction <add>, %16, %cst_15 [0] : vector<8x512xf32> to vector<512xf32>
    %20 = vector.shape_cast %19 : vector<512xf32> to vector<1x512xf32>
    %cst_16 = arith.constant 8.000000e+00 : f32
    %21 = vector.broadcast %cst_16 : f32 to vector<1x512xf32>
    %22 = arith.divf %20, %21 : vector<1x512xf32>
    %23 = vector.broadcast %22 : vector<1x512xf32> to vector<8x512xf32>
    %24 = arith.subf %16, %23 : vector<8x512xf32>
    %25 = arith.mulf %24, %24 : vector<8x512xf32>
    %cst_17 = arith.constant dense<0.000000e+00> : vector<512xf32>
    %26 = vector.multi_reduction <add>, %25, %cst_17 [0] : vector<8x512xf32> to vector<512xf32>
    %27 = vector.shape_cast %26 : vector<512xf32> to vector<1x512xf32>
    %cst_18 = arith.constant 8.000000e+00 : f32
    %28 = vector.broadcast %cst_18 : f32 to vector<1x512xf32>
    %29 = arith.divf %27, %28 : vector<1x512xf32>
    %cst_19 = arith.constant 9.99999974E-6 : f32
    %30 = vector.broadcast %cst_19 : f32 to vector<1x512xf32>
    %31 = arith.addf %29, %30 : vector<1x512xf32>
    %32 = math.rsqrt %31 : vector<1x512xf32>
    %33 = arith.mulf %17, %32 : vector<1x512xf32>
    %34 = vector.broadcast %33 : vector<1x512xf32> to vector<8x512xf32>
    %35 = arith.mulf %16, %34 : vector<8x512xf32>
    %36 = arith.mulf %22, %33 : vector<1x512xf32>
    %37 = arith.subf %18, %36 : vector<1x512xf32>
    %38 = vector.broadcast %37 : vector<1x512xf32> to vector<8x512xf32>
    %39 = arith.addf %35, %38 : vector<8x512xf32>
    %cst_20 = arith.constant 0.000000e+00 : f32
    %40 = vector.broadcast %cst_20 : f32 to vector<8x512xf32>
    %41 = arith.maximumf %39, %40 : vector<8x512xf32>
    %c0_21 = arith.constant 0 : index
    %c0_22 = arith.constant 0 : index
    %42 = vector.load %arg7[%c0_21, %c0_22] : memref<512x256xf32, #tpu.memory_space<vmem>>, vector<512x256xf32>
    %cst_23 = arith.constant dense<0.000000e+00> : vector<8x256xf32>
    %43 = tpu.matmul %41, %42, %cst_23 {dimension_numbers = #tpu.dot_dimension_numbers<[1], [0], [0], [1], [0, 0, 1, 1], [], []>} : vector<8x512xf32>, vector<512x256xf32>, vector<8x256xf32> -> vector<8x256xf32>
    %c0_24 = arith.constant 0 : index
    %c0_25 = arith.constant 0 : index
    %44 = vector.load %arg8[%c0_24, %c0_25] : memref<1x256xf32, #tpu.memory_space<vmem>>, vector<1x256xf32>
    %c0_26 = arith.constant 0 : index
    %c0_27 = arith.constant 0 : index
    %45 = vector.load %arg9[%c0_26, %c0_27] : memref<1x256xf32, #tpu.memory_space<vmem>>, vector<1x256xf32>
    %cst_28 = arith.constant dense<0.000000e+00> : vector<256xf32>
    %46 = vector.multi_reduction <add>, %43, %cst_28 [0] : vector<8x256xf32> to vector<256xf32>
    %47 = vector.shape_cast %46 : vector<256xf32> to vector<1x256xf32>
    %cst_29 = arith.constant 8.000000e+00 : f32
    %48 = vector.broadcast %cst_29 : f32 to vector<1x256xf32>
    %49 = arith.divf %47, %48 : vector<1x256xf32>
    %50 = vector.broadcast %49 : vector<1x256xf32> to vector<8x256xf32>
    %51 = arith.subf %43, %50 : vector<8x256xf32>
    %52 = arith.mulf %51, %51 : vector<8x256xf32>
    %cst_30 = arith.constant dense<0.000000e+00> : vector<256xf32>
    %53 = vector.multi_reduction <add>, %52, %cst_30 [0] : vector<8x256xf32> to vector<256xf32>
    %54 = vector.shape_cast %53 : vector<256xf32> to vector<1x256xf32>
    %cst_31 = arith.constant 8.000000e+00 : f32
    %55 = vector.broadcast %cst_31 : f32 to vector<1x256xf32>
    %56 = arith.divf %54, %55 : vector<1x256xf32>
    %cst_32 = arith.constant 9.99999974E-6 : f32
    %57 = vector.broadcast %cst_32 : f32 to vector<1x256xf32>
    %58 = arith.addf %56, %57 : vector<1x256xf32>
    %59 = math.rsqrt %58 : vector<1x256xf32>
    %60 = arith.mulf %44, %59 : vector<1x256xf32>
    %61 = vector.broadcast %60 : vector<1x256xf32> to vector<8x256xf32>
    %62 = arith.mulf %43, %61 : vector<8x256xf32>
    %63 = arith.mulf %49, %60 : vector<1x256xf32>
    %64 = arith.subf %45, %63 : vector<1x256xf32>
    %65 = vector.broadcast %64 : vector<1x256xf32> to vector<8x256xf32>
    %66 = arith.addf %62, %65 : vector<8x256xf32>
    %cst_33 = arith.constant 0.000000e+00 : f32
    %67 = vector.broadcast %cst_33 : f32 to vector<8x256xf32>
    %68 = arith.maximumf %66, %67 : vector<8x256xf32>
    %c0_34 = arith.constant 0 : index
    %c0_35 = arith.constant 0 : index
    %69 = vector.load %arg10[%c0_34, %c0_35] : memref<256x128xf32, #tpu.memory_space<vmem>>, vector<256x128xf32>
    %cst_36 = arith.constant dense<0.000000e+00> : vector<8x128xf32>
    %70 = tpu.matmul %68, %69, %cst_36 {dimension_numbers = #tpu.dot_dimension_numbers<[1], [0], [0], [1], [0, 0, 1, 1], [], []>} : vector<8x256xf32>, vector<256x128xf32>, vector<8x128xf32> -> vector<8x128xf32>
    %c0_37 = arith.constant 0 : index
    %c0_38 = arith.constant 0 : index
    %71 = vector.load %arg11[%c0_37, %c0_38] : memref<1x128xf32, #tpu.memory_space<vmem>>, vector<1x128xf32>
    %72 = vector.broadcast %71 : vector<1x128xf32> to vector<8x128xf32>
    %73 = arith.addf %70, %72 : vector<8x128xf32>
    %c0_39 = arith.constant 0 : index
    %c0_40 = arith.constant 0 : index
    %74 = vector.load %arg12[%c0_39, %c0_40] : memref<8x128xf32, #tpu.memory_space<vmem>>, vector<8x128xf32>
    tpu.vector_store %arg12[%c0_39, %c0_40], %73 {strides = array<i32>} : memref<8x128xf32, #tpu.memory_space<vmem>>, vector<8x128xf32>,
    return
  }
}

</mosaic_0001>

<bundles_post_ra>
// kernel: stnkd_forward.6
= control target key start
LH: loop header
LB: loop body
LE: loop exit
PB: predicated region body
PF: predicated region fallthrough
CT: control target
= control target key end

     0   :  { %12 = vsyncpa [#allocation3], 0  ;;  %s809_s21 = smov 0   ;;  %s811_s22 = smov 0   ;;  %s929_s0 = inlined_call_operand.vmem [shape: f32[8,32,64], index: 0, kind: input, shape index: {}]   ;;  %s930_s1 = inlined_call_operand.vmem [shape: f32[1,64], index: 1, kind: input, shape index: {}]   ;;  %s931_s2 = inlined_call_operand.vmem [shape: f32[1,64], index: 2, kind: input, shape index: {}]   ;;  %s932_s3 = inlined_call_operand.hbm [shape: f32[64,64], index: 3, kind: input, shape index: {}]   ;;  %s933_s4 = inlined_call_operand.vmem [shape: f32[8,32,64], index: 4, kind: output, shape index: {0}]   ;;  %s934_s5 = inlined_call_operand.vmem [shape: f32[8,1,64], index: 5, kind: output, shape index: {1}]   ;;  %s935_s6 = inlined_call_operand.vmem [shape: f32[8,1,64], index: 6, kind: output, shape index: {2}]  }
   0x1   :  { %s813_s23 = smov 0   ;;  %s815_s24 = smov 0  }
   0x2   :  { %s817_s25 = smov 0  }
   0x3 LB: > { %s598_s26 = sadd.s32 4294967295, %s767_s25   ;;  %s27_s27 = sadd.s32 1, %s759_s23  ;;  %s767_s25 = sphi %s817_s25, %s18_s25   ;;  %s763_s24 = sphi %s815_s24, %s942_s24   ;;  %s759_s23 = sphi %s813_s23, %s941_s23   ;;  %s755_s22 = sphi %s811_s22, %s940_s22   ;;  %s751_s21 = sphi %s809_s21, %s939_s21  }
   0x4   : > { %p28_p0 = scmp.ge.s32.totalorder %s27_s27, 4  ;;  %s30_s28 = sadd.s32 1, %s763_s24 }
   0x5   : > { %p600_p1 = scmp.ge.s32.totalorder %s767_s25, 1  ;;  %p206_p2 = scmp.lt.s32.totalorder %s767_s25, 33 }
   0x6   : > { %s944_s27 = smov (%p28_p0, %s27_s27), 0  ;;  %s946_s28 = smov (!%p28_p0, %s30_s28), %s763_s24 }
   0x7   : > { %p842_p3 = pnand %p600_p1, %p206_p2  ;;  %p32_p4 = scmp.ge.s32.totalorder %s946_s28, 8 }
   0x8   : > { %p846_p5 = scmp.eq.s32.totalorder %s598_s26, 0  ;;  %s769_s7 = smov [#allocation2]  }
   0x9   : > { %p648_p6 = pneg %p842_p3  ;;  %s948_s28 = smov (%p32_p4, %s946_s28), 0 }
   0xa   : > { %s224_s8 = sshll.u32 %s769_s7, 4  ;;  %s225_s8 = int_to_ptr.vmem [resolvable:$true] %s224_s8 }
   0xb   : > { %p856_p7 = pnand %p846_p5, %p648_p6  ;;  %s710_s10 = scalar_lea.vmem %s225_s8, 1024 }
   0xc   : > { %p711_p9 = scmp.ne.s32.totalorder %s225_s8, %s710_s10  ;;  %p718_p12 = scmp.lt.s32.totalorder %s225_s8, %s225_s8 }
   0xd   : > { %p701_p8 = pneg %p856_p7  ;;  %p719_p13 = scmp.lt.s32.totalorder %s710_s10, %s710_s10 }
   0xf   : > { %p713_p10 = pnand %p711_p9, %p701_p8  ;;  %p720_p0 = por %p719_p13, %p718_p12 }
  0x11   : > { %p714_p11 = pneg %p713_p10 }
  0x13   : > { %p721_p1 = pnand %p720_p0, %p714_p11 }
  0x15   : > { %724 = shalt.err (!%p721_p1)
}
  0x16   : > { %s770_s11 = smov 128   ;;  %s771_s12 = smov 8  }
  0x17   : > { %651 = dma.hbm_to_vmem [thread:$0]  (!%p856_p7), %s932_s3, 1024, %s225_s8, [#allocation3], %s770_s11, %s770_s11, %s771_s12  }
  0x18   : > { %251 = sbr.rel (%p842_p3) target bundleno = 268 (0x10c), region = 36 }
  0x1d   : > { %746 = dma.done.wait (%p846_p5), [#allocation3], 1024  }
  0x1e   : > { %748 = vsyncadd (%p846_p5), [#allocation3], 4294966272  ;;  %p293_p2 = scmp.lt.s32.totalorder %s755_s22, 7  ;;  %p295_p4 = scmp.lt.s32.totalorder %s751_s21, 3  ;;  %v772_v0 = vmov 0.0   ;;  %vm773_vm0 = vmmov 0  }
  0x1f   : > { %625 = vmatprep.subr.mxu0 %v772_v0  ;;  %641 = vmatprep.mubr.msk.f32.mxu0 %vm773_vm0, %v772_v0  ;;  %v340_v1 = vld [vmem:[#allocation2 + $0x38] sm:$0xff]  ;;  %v339_v2 = vld [vmem:[#allocation2 + $0x30] sm:$0xff]  ;;  %v338_v3 = vld [vmem:[#allocation2 + $0x28] sm:$0xff]  ;;  %vm341_vm1 = vcmask 523264   ;;  %p612_p3 = scmp.ne.s32.totalorder %s751_s21, 0 }
  0x20   : > { %s950_s22 = smov (!%p293_p2, %s755_s22), 7  ;;  %626 = vmatpush3.msra.mxu0 %v340_v1  ;;  %v609_v5 = vld [vmem:[%s930_s1] ss:$0 sm:$0xff]  ;;  %v336_v9 = vld [vmem:[#allocation2 + $0x18] sm:$0xff]  ;;  %v335_v10 = vld [vmem:[#allocation2 + $0x10] sm:$0xff] }
  0x21   : > { %s296_s15 = scalar_select %p295_p4, %s751_s21, 3  ;;  %627 = vmatprep.subr.mxu0 %v772_v0  ;;  %v337_v6 = vld [vmem:[#allocation2 + $0x20] sm:$0xff]  ;;  %v334_v12 = vld [vmem:[#allocation2 + $0x8] sm:$0xff] }
  0x22   : > { %s605_s16 = sshll.u32 %s950_s22, 2  ;;  %s880_s19 = scalar_lea.vmem %s934_s5, %s950_s22  ;;  %628 = vmatpush3.msra.mxu0 %v339_v2  ;;  %v610_v8 = vld [vmem:[%s931_s2] ss:$0 sm:$0xff] }
  0x23   : > { %s882_s20 = sadd.s32 %s605_s16, %s296_s15  ;;  %s887_s30 = scalar_lea.vmem %s935_s6, %s950_s22  ;;  %629 = vmatprep.subr.mxu0 %v772_v0  ;;  %v333_v13 = vld [vmem:[#allocation2] sm:$0xff] }
  0x24   : > { %s606_s7 = sshll.u32 %s882_s20, 3  ;;  %630 = vmatpush3.msra.mxu0 %v338_v3 }
  0x25   : > { %s300_s10 = scalar_lea.vmem %s929_s0, %s606_s7  ;;  %631 = vmatprep.subr.mxu0 %v772_v0  ;;  %s308_s16 = scalar_lea.vmem %s933_s4, %s606_s7 }
  0x26   : > { %v315_v4 = vld [vmem:[%s300_s10] sm:$0xff]  ;;  %632 = vmatpush3.msra.mxu0 %v337_v6 }
  0x27   : > { %v323_v7 = vmul.f32 %v609_v5, %v315_v4  ;;  %633 = vmatprep.subr.mxu0 %v772_v0 }
  0x28   : > { %634 = vmatpush3.msra.mxu0 %v336_v9 }
  0x29   : > { %v331_v11 = vadd.f32 %v610_v8, %v323_v7  ;;  %635 = vmatprep.subr.mxu0 %v772_v0 }
  0x2a   : > { %636 = vmatpush3.msra.mxu0 %v335_v10 }
  0x2b   : > { %637 = vmatprep.subr.mxu0 %v772_v0  ;;  %v332_v14 = vmax.f32 %v331_v11, 0.0 }
  0x2c   : > { %638 = vmatpush3.msra.mxu0 %v334_v12 }
  0x2d   : > { %639 = vmatprep.subr.mxu0 %v772_v0 }
  0x2e   : > { %640 = vmatpush3.msra.mxu0 %v333_v13 }
  0x2f   : > { %642 = vmatmul.mubr.msk.f32.vlgmr.msra.gmra.mxu0 %vm341_vm1, %v332_v14 }
  0xef   : > { %v411_v15 = vpop.f32.mrf.mxu0 }
  0xf0   : > { %415 = vst.msk [vmem:[%s308_s16] sm:$0xff] %vm341_vm1, %v411_v15  ;;  %v416_v16 = vsel %vm341_vm1, %v411_v15, 0.0  ;;  %v423_v17 = vmul.f32 %v411_v15, %v411_v15 }
  0xf1   : > { %v417_v18 = vrot.slane %v416_v16, 4  ;;  %v643_v19 = vpop.f32.mrf.mxu0 }
  0xf2   : > { %v424_v20 = vsel %vm341_vm1, %v423_v17, 0.0 }
  0xf3   : > { %v418_v21 = vadd.f32 %v417_v18, %v416_v16  ;;  %v425_v22 = vrot.slane %v424_v20, 4 }
  0xf5   : > { %v419_v23 = vrot.slane %v418_v21, 2  ;;  %v426_v24 = vadd.f32 %v425_v22, %v424_v20 }
  0xf7   : > { %v420_v25 = vadd.f32 %v419_v23, %v418_v21  ;;  %v427_v26 = vrot.slane %v426_v24, 2 }
  0xf9   : > { %v421_v27 = vrot.slane %v420_v25, 1  ;;  %v428_v28 = vadd.f32 %v427_v26, %v426_v24  ;;  %434 = sbr.rel (%p612_p3) target bundleno = 256 (0x100), region = 44 }
  0xfb   : > { %v422_v29 = vadd.f32 %v421_v27, %v420_v25  ;;  %v429_v30 = vrot.slane %v428_v28, 1 }
  0xfd   : > { %v430_v31 = vadd.f32 %v429_v30, %v428_v28 }
  0xfe   : > { %vm435_vm2 = vcmask 516096  }
  0xff   : > { %436 = vst.msk [vmem:[%s880_s19] sm:$0x1] %vm435_vm2, %v422_v29  ;;  %437 = vst.msk [vmem:[%s887_s30] sm:$0x1] %vm435_vm2, %v430_v31 }
 0x100 PF: > { %p613_p5 = scmp.eq.s32.totalorder %s751_s21, 0 }
 0x102   : > { %441 = sbr.rel (%p613_p5) target bundleno = 268 (0x10c), region = 48 }
 0x107   : > { %v442_v32 = vld [vmem:[%s880_s19] sm:$0x1]  ;;  %vm444_vm3 = vcmask 516096  }
 0x108   : > { %v446_v33 = vld [vmem:[%s887_s30] sm:$0x1]  ;;  %v443_v34 = vadd.f32 %v442_v32, %v422_v29 }
 0x109   : > { %v447_v35 = vadd.f32 %v446_v33, %v430_v31 }
 0x10a   : > { %445 = vst.msk [vmem:[%s880_s19] sm:$0x1] %vm444_vm3, %v443_v34 }
 0x10b   : > { %448 = vst.msk [vmem:[%s887_s30] sm:$0x1] %vm444_vm3, %v447_v35 }
 0x10c PF: > { %s18_s25 = sadd.s32 1, %s767_s25   ;;  %s939_s21 = smov %s759_s23 }
 0x10d   : > { %p15_p6 = scmp.ge.s32.totalorder %s18_s25, 34   ;;  %s940_s22 = smov %s763_s24 }
 0x10e   : > { %s941_s23 = smov %s944_s27  ;;  %s942_s24 = smov %s948_s28 }
 0x10f   :  { %17 = sbr.rel (!%p15_p6) target bundleno = 3 (0x3), region = 103 }
 0x114   :  { %500 = vsyncpa [#allocation3], 1 }
 0x115   :  { %502 = vsyncpa [#allocation3 + $0x1], 1 }

// kernel: stnkd_forward.5
= control target key start
LH: loop header
LB: loop body
LE: loop exit
PB: predicated region body
PF: predicated region fallthrough
CT: control target
= control target key end

     0   :  { %12 = vsyncpa [#allocation3], 0  ;;  %s762_s21 = smov 0   ;;  %s764_s22 = smov 0   ;;  %s861_s0 = inlined_call_operand.vmem [shape: f32[8,32,5], index: 0, kind: input, shape index: {}]   ;;  %s862_s1 = inlined_call_operand.vmem [shape: f32[1,5], index: 1, kind: input, shape index: {}]   ;;  %s863_s2 = inlined_call_operand.vmem [shape: f32[1,5], index: 2, kind: input, shape index: {}]   ;;  %s864_s3 = inlined_call_operand.hbm [shape: f32[5,64], index: 3, kind: input, shape index: {}]   ;;  %s865_s4 = inlined_call_operand.vmem [shape: f32[8,32,64], index: 4, kind: output, shape index: {0}]   ;;  %s866_s5 = inlined_call_operand.vmem [shape: f32[8,1,64], index: 5, kind: output, shape index: {1}]   ;;  %s867_s6 = inlined_call_operand.vmem [shape: f32[8,1,64], index: 6, kind: output, shape index: {2}]  }
   0x1   :  { %s766_s1 = smov 0   ;;  %s768_s2 = smov 0  }
   0x2   :  { %s770_s23 = smov 0  }
   0x3 LB: > { %s577_s24 = sadd.s32 4294967295, %s722_s23   ;;  %s27_s25 = sadd.s32 1, %s714_s1  ;;  %s722_s23 = sphi %s770_s23, %s18_s23   ;;  %s718_s2 = sphi %s768_s2, %s873_s2   ;;  %s714_s1 = sphi %s766_s1, %s872_s1   ;;  %s710_s22 = sphi %s764_s22, %s871_s22   ;;  %s706_s21 = sphi %s762_s21, %s870_s21  }
   0x4   : > { %p28_p0 = scmp.ge.s32.totalorder %s27_s25, 4  ;;  %s30_s26 = sadd.s32 1, %s718_s2 }
   0x5   : > { %p579_p1 = scmp.ge.s32.totalorder %s722_s23, 1  ;;  %p206_p2 = scmp.lt.s32.totalorder %s722_s23, 33 }
   0x6   : > { %s875_s25 = smov (%p28_p0, %s27_s25), 0  ;;  %s877_s26 = smov (!%p28_p0, %s30_s26), %s718_s2 }
   0x7   : > { %p795_p3 = pnand %p579_p1, %p206_p2  ;;  %p32_p4 = scmp.ge.s32.totalorder %s877_s26, 8 }
   0x8   : > { %p799_p5 = scmp.eq.s32.totalorder %s577_s24, 0  ;;  %s724_s29 = smov [#allocation2]  }
   0x9   : > { %p605_p6 = pneg %p795_p3  ;;  %s879_s26 = smov (%p32_p4, %s877_s26), 0 }
   0xa   : > { %s225_s30 = sshll.u32 %s724_s29, 4  ;;  %s226_s30 = int_to_ptr.vmem [resolvable:$true] %s225_s30 }
   0xb   : > { %p606_p7 = pnand %p799_p5, %p605_p6  ;;  %s665_s7 = scalar_lea.vmem %s226_s30, 128 }
   0xc   : > { %p666_p9 = scmp.ne.s32.totalorder %s226_s30, %s665_s7  ;;  %p673_p12 = scmp.lt.s32.totalorder %s226_s30, %s226_s30 }
   0xd   : > { %p656_p8 = pneg %p606_p7  ;;  %p674_p13 = scmp.lt.s32.totalorder %s665_s7, %s665_s7 }
   0xf   : > { %p668_p10 = pnand %p666_p9, %p656_p8  ;;  %p675_p0 = por %p674_p13, %p673_p12 }
  0x11   : > { %p669_p11 = pneg %p668_p10 }
  0x13   : > { %p676_p1 = pnand %p675_p0, %p669_p11 }
  0x15   : > { %679 = shalt.err (!%p676_p1)
}
  0x16   : > { %608 = dma.hbm_to_vmem [thread:$0]  (!%p606_p7), %s864_s3, 128, %s226_s30, [#allocation3]  }
  0x17   : > { %249 = sbr.rel (%p795_p3) target bundleno = 259 (0x103), region = 36 }
  0x1c   : > { %701 = dma.done.wait (%p799_p5), [#allocation3], 128  }
  0x1d   : > { %703 = vsyncadd (%p799_p5), [#allocation3], 4294967168  ;;  %p291_p2 = scmp.lt.s32.totalorder %s710_s22, 7  ;;  %v725_v0 = vmov 0.0   ;;  %vm726_vm0 = vmmov 0   ;;  %p293_p4 = scmp.lt.s32.totalorder %s706_s21, 3 }
  0x1e   : > { %596 = vmatprep.subr.mxu0 %v725_v0  ;;  %598 = vmatprep.mubr.msk.f32.mxu0 %vm726_vm0, %v725_v0  ;;  %vm319_vm1 = vcmask 1044480   ;;  %vm315_vm2 = vcmask 39936   ;;  %v314_v1 = vld [vmem:[#allocation2] sm:$0x1f]  ;;  %vm393_vm3 = vcmask 523264   ;;  %p590_p3 = scmp.ne.s32.totalorder %s706_s21, 0 }
  0x1f   : > { %s881_s22 = smov (!%p291_p2, %s710_s22), 7  ;;  %597 = vmatpush3.msk.msra.mxu0 %vm319_vm1, %v314_v1 }
  0x20   : > { %s294_s10 = scalar_select %p293_p4, %s706_s21, 3 }
  0x21   : > { %s584_s11 = sshll.u32 %s881_s22, 2  ;;  %s825_s14 = scalar_lea.vmem %s866_s5, %s881_s22 }
  0x22   : > { %s296_s15 = sadd.s32 %s584_s11, %s294_s10  ;;  %s830_s18 = scalar_lea.vmem %s867_s6, %s881_s22 }
  0x23   : > { %s585_s19 = sshll.u32 %s296_s15, 3 }
  0x24   : > { %s298_s27 = scalar_lea.vmem %s861_s0, %s585_s19  ;;  %s306_s30 = scalar_lea.vmem %s865_s4, %s585_s19 }
  0x25   : > { %v313_v2 = vld [vmem:[%s298_s27] sm:$0xff] }
  0x26   : > { %599 = vmatmul.mubr.msk.f32.vlgmr.msra.gmra.mxu0 %vm315_vm2, %v313_v2 }
  0xe6   : > { %v389_v3 = vpop.f32.mrf.mxu0 }
  0xe7   : > { %394 = vst.msk [vmem:[%s306_s30] sm:$0xff] %vm393_vm3, %v389_v3  ;;  %v395_v4 = vsel %vm393_vm3, %v389_v3, 0.0  ;;  %v402_v5 = vmul.f32 %v389_v3, %v389_v3 }
  0xe8   : > { %v396_v6 = vrot.slane %v395_v4, 4  ;;  %v600_v7 = vpop.f32.mrf.mxu0 }
  0xe9   : > { %v403_v8 = vsel %vm393_vm3, %v402_v5, 0.0 }
  0xea   : > { %v397_v9 = vadd.f32 %v396_v6, %v395_v4  ;;  %v404_v10 = vrot.slane %v403_v8, 4 }
  0xec   : > { %v398_v11 = vrot.slane %v397_v9, 2  ;;  %v405_v12 = vadd.f32 %v404_v10, %v403_v8 }
  0xee   : > { %v399_v13 = vadd.f32 %v398_v11, %v397_v9  ;;  %v406_v14 = vrot.slane %v405_v12, 2 }
  0xf0   : > { %v400_v15 = vrot.slane %v399_v13, 1  ;;  %v407_v16 = vadd.f32 %v406_v14, %v405_v12  ;;  %413 = sbr.rel (%p590_p3) target bundleno = 247 (0xf7), region = 44 }
  0xf2   : > { %v401_v17 = vadd.f32 %v400_v15, %v399_v13  ;;  %v408_v18 = vrot.slane %v407_v16, 1 }
  0xf4   : > { %v409_v19 = vadd.f32 %v408_v18, %v407_v16 }
  0xf5   : > { %vm414_vm4 = vcmask 516096  }
  0xf6   : > { %415 = vst.msk [vmem:[%s825_s14] sm:$0x1] %vm414_vm4, %v401_v17  ;;  %416 = vst.msk [vmem:[%s830_s18] sm:$0x1] %vm414_vm4, %v409_v19 }
  0xf7 PF: > { %p591_p5 = scmp.eq.s32.totalorder %s706_s21, 0 }
  0xf9   : > { %420 = sbr.rel (%p591_p5) target bundleno = 259 (0x103), region = 48 }
  0xfe   : > { %v421_v20 = vld [vmem:[%s825_s14] sm:$0x1]  ;;  %vm423_vm5 = vcmask 516096  }
  0xff   : > { %v425_v21 = vld [vmem:[%s830_s18] sm:$0x1]  ;;  %v422_v22 = vadd.f32 %v421_v20, %v401_v17 }
 0x100   : > { %v426_v23 = vadd.f32 %v425_v21, %v409_v19 }
 0x101   : > { %424 = vst.msk [vmem:[%s825_s14] sm:$0x1] %vm423_vm5, %v422_v22 }
 0x102   : > { %427 = vst.msk [vmem:[%s830_s18] sm:$0x1] %vm423_vm5, %v426_v23 }
 0x103 PF: > { %s18_s23 = sadd.s32 1, %s722_s23   ;;  %s870_s21 = smov %s714_s1 }
 0x104   : > { %p15_p6 = scmp.ge.s32.totalorder %s18_s23, 34   ;;  %s871_s22 = smov %s718_s2 }
 0x105   : > { %s872_s1 = smov %s875_s25  ;;  %s873_s2 = smov %s879_s26 }
 0x106   :  { %17 = sbr.rel (!%p15_p6) target bundleno = 3 (0x3), region = 103 }
 0x10b   :  { %479 = vsyncpa [#allocation3], 1 }
 0x10c   :  { %481 = vsyncpa [#allocation3 + $0x1], 1 }

// kernel: stnkd_forward.7
= control target key start
LH: loop header
LB: loop body
LE: loop exit
PB: predicated region body
PF: predicated region fallthrough
CT: control target
= control target key end

     0   :  { %12 = vsyncpa [#allocation3], 0  ;;  %s805_s21 = smov 0   ;;  %s807_s22 = smov 0   ;;  %s925_s0 = inlined_call_operand.vmem [shape: f32[8,32,64], index: 0, kind: input, shape index: {}]   ;;  %s926_s1 = inlined_call_operand.vmem [shape: f32[1,64], index: 1, kind: input, shape index: {}]   ;;  %s927_s2 = inlined_call_operand.vmem [shape: f32[1,64], index: 2, kind: input, shape index: {}]   ;;  %s928_s3 = inlined_call_operand.hbm [shape: f32[64,128], index: 3, kind: input, shape index: {}]   ;;  %s929_s4 = inlined_call_operand.vmem [shape: f32[8,32,128], index: 4, kind: output, shape index: {0}]   ;;  %s930_s5 = inlined_call_operand.vmem [shape: f32[8,1,128], index: 5, kind: output, shape index: {1}]   ;;  %s931_s6 = inlined_call_operand.vmem [shape: f32[8,1,128], index: 6, kind: output, shape index: {2}]  }
   0x1   :  { %s809_s23 = smov 0   ;;  %s811_s24 = smov 0  }
   0x2   :  { %s813_s25 = smov 0  }
   0x3 LB: > { %s594_s26 = sadd.s32 4294967295, %s763_s25   ;;  %s27_s27 = sadd.s32 1, %s755_s23  ;;  %s763_s25 = sphi %s813_s25, %s18_s25   ;;  %s759_s24 = sphi %s811_s24, %s938_s24   ;;  %s755_s23 = sphi %s809_s23, %s937_s23   ;;  %s751_s22 = sphi %s807_s22, %s936_s22   ;;  %s747_s21 = sphi %s805_s21, %s935_s21  }
   0x4   : > { %p28_p0 = scmp.ge.s32.totalorder %s27_s27, 4  ;;  %s30_s28 = sadd.s32 1, %s759_s24 }
   0x5   : > { %p596_p1 = scmp.ge.s32.totalorder %s763_s25, 1  ;;  %p206_p2 = scmp.lt.s32.totalorder %s763_s25, 33 }
   0x6   : > { %s940_s27 = smov (%p28_p0, %s27_s27), 0  ;;  %s942_s28 = smov (!%p28_p0, %s30_s28), %s759_s24 }
   0x7   : > { %p838_p3 = pnand %p596_p1, %p206_p2  ;;  %p32_p4 = scmp.ge.s32.totalorder %s942_s28, 8 }
   0x8   : > { %p842_p5 = scmp.eq.s32.totalorder %s594_s26, 0  ;;  %s765_s7 = smov [#allocation2]  }
   0x9   : > { %p644_p6 = pneg %p838_p3  ;;  %s944_s28 = smov (%p32_p4, %s942_s28), 0 }
   0xa   : > { %s224_s8 = sshll.u32 %s765_s7, 4  ;;  %s225_s8 = int_to_ptr.vmem [resolvable:$true] %s224_s8 }
   0xb   : > { %p852_p7 = pnand %p842_p5, %p644_p6  ;;  %s706_s10 = scalar_lea.vmem %s225_s8, 1024 }
   0xc   : > { %p707_p9 = scmp.ne.s32.totalorder %s225_s8, %s706_s10  ;;  %p714_p12 = scmp.lt.s32.totalorder %s225_s8, %s225_s8 }
   0xd   : > { %p697_p8 = pneg %p852_p7  ;;  %p715_p13 = scmp.lt.s32.totalorder %s706_s10, %s706_s10 }
   0xf   : > { %p709_p10 = pnand %p707_p9, %p697_p8  ;;  %p716_p0 = por %p715_p13, %p714_p12 }
  0x11   : > { %p710_p11 = pneg %p709_p10 }
  0x13   : > { %p717_p1 = pnand %p716_p0, %p710_p11 }
  0x15   : > { %720 = shalt.err (!%p717_p1)
}
  0x16   : > { %s766_s11 = smov 128   ;;  %s767_s12 = smov 8  }
  0x17   : > { %647 = dma.hbm_to_vmem [thread:$0]  (!%p852_p7), %s928_s3, 1024, %s225_s8, [#allocation3], %s766_s11, %s766_s11, %s767_s12  }
  0x18   : > { %251 = sbr.rel (%p838_p3) target bundleno = 267 (0x10b), region = 36 }
  0x1d   : > { %742 = dma.done.wait (%p842_p5), [#allocation3], 1024  }
  0x1e   : > { %744 = vsyncadd (%p842_p5), [#allocation3], 4294966272  ;;  %p293_p2 = scmp.lt.s32.totalorder %s751_s22, 7  ;;  %p295_p4 = scmp.lt.s32.totalorder %s747_s21, 3  ;;  %v768_v0 = vmov 0.0   ;;  %vm769_vm0 = vmmov 0  }
  0x1f   : > { %621 = vmatprep.subr.mxu0 %v768_v0  ;;  %637 = vmatprep.mubr.msk.f32.mxu0 %vm769_vm0, %v768_v0  ;;  %v340_v1 = vld [vmem:[#allocation2 + $0x38] sm:$0xff]  ;;  %v339_v2 = vld [vmem:[#allocation2 + $0x30] sm:$0xff]  ;;  %v338_v3 = vld [vmem:[#allocation2 + $0x28] sm:$0xff]  ;;  %vm341_vm1 = vcmask 523264   ;;  %p608_p3 = scmp.ne.s32.totalorder %s747_s21, 0 }
  0x20   : > { %s946_s22 = smov (!%p293_p2, %s751_s22), 7  ;;  %622 = vmatpush3.msra.mxu0 %v340_v1  ;;  %v605_v5 = vld [vmem:[%s926_s1] ss:$0 sm:$0xff]  ;;  %v336_v9 = vld [vmem:[#allocation2 + $0x18] sm:$0xff]  ;;  %v335_v10 = vld [vmem:[#allocation2 + $0x10] sm:$0xff] }
  0x21   : > { %s296_s15 = scalar_select %p295_p4, %s747_s21, 3  ;;  %623 = vmatprep.subr.mxu0 %v768_v0  ;;  %v337_v6 = vld [vmem:[#allocation2 + $0x20] sm:$0xff]  ;;  %v334_v12 = vld [vmem:[#allocation2 + $0x8] sm:$0xff] }
  0x22   : > { %s601_s16 = sshll.u32 %s946_s22, 2  ;;  %s876_s19 = scalar_lea.vmem %s930_s5, %s946_s22  ;;  %624 = vmatpush3.msra.mxu0 %v339_v2  ;;  %v606_v8 = vld [vmem:[%s927_s2] ss:$0 sm:$0xff] }
  0x23   : > { %s878_s20 = sadd.s32 %s601_s16, %s296_s15  ;;  %s883_s30 = scalar_lea.vmem %s931_s6, %s946_s22  ;;  %625 = vmatprep.subr.mxu0 %v768_v0  ;;  %v333_v13 = vld [vmem:[#allocation2] sm:$0xff] }
  0x24   : > { %s602_s7 = sshll.u32 %s878_s20, 3  ;;  %626 = vmatpush3.msra.mxu0 %v338_v3 }
  0x25   : > { %s300_s10 = scalar_lea.vmem %s925_s0, %s602_s7  ;;  %627 = vmatprep.subr.mxu0 %v768_v0  ;;  %s308_s16 = scalar_lea.vmem %s929_s4, %s602_s7 }
  0x26   : > { %v315_v4 = vld [vmem:[%s300_s10] sm:$0xff]  ;;  %628 = vmatpush3.msra.mxu0 %v337_v6 }
  0x27   : > { %v323_v7 = vmul.f32 %v605_v5, %v315_v4  ;;  %629 = vmatprep.subr.mxu0 %v768_v0 }
  0x28   : > { %630 = vmatpush3.msra.mxu0 %v336_v9 }
  0x29   : > { %v331_v11 = vadd.f32 %v606_v8, %v323_v7  ;;  %631 = vmatprep.subr.mxu0 %v768_v0 }
  0x2a   : > { %632 = vmatpush3.msra.mxu0 %v335_v10 }
  0x2b   : > { %633 = vmatprep.subr.mxu0 %v768_v0  ;;  %v332_v14 = vmax.f32 %v331_v11, 0.0 }
  0x2c   : > { %634 = vmatpush3.msra.mxu0 %v334_v12 }
  0x2d   : > { %635 = vmatprep.subr.mxu0 %v768_v0 }
  0x2e   : > { %636 = vmatpush3.msra.mxu0 %v333_v13 }
  0x2f   : > { %638 = vmatmul.mubr.msk.f32.vlgmr.msra.gmra.mxu0 %vm341_vm1, %v332_v14 }
  0xef   : > { %v411_v15 = vpop.f32.mrf.mxu0 }
  0xf0   : > { %415 = vst [vmem:[%s308_s16] sm:$0xff] %v411_v15  ;;  %v416_v16 = vrot.slane %v411_v15, 4  ;;  %v422_v17 = vmul.f32 %v411_v15, %v411_v15 }
  0xf1   : > { %v639_v18 = vpop.f32.mrf.mxu0 }
  0xf2   : > { %v417_v19 = vadd.f32 %v416_v16, %v411_v15  ;;  %v423_v20 = vrot.slane %v422_v17, 4 }
  0xf4   : > { %v418_v21 = vrot.slane %v417_v19, 2  ;;  %v424_v22 = vadd.f32 %v423_v20, %v422_v17 }
  0xf6   : > { %v419_v23 = vadd.f32 %v418_v21, %v417_v19  ;;  %v425_v24 = vrot.slane %v424_v22, 2 }
  0xf8   : > { %v420_v25 = vrot.slane %v419_v23, 1  ;;  %v426_v26 = vadd.f32 %v425_v24, %v424_v22  ;;  %432 = sbr.rel (%p608_p3) target bundleno = 255 (0xff), region = 44 }
  0xfa   : > { %v421_v27 = vadd.f32 %v420_v25, %v419_v23  ;;  %v427_v28 = vrot.slane %v426_v26, 1 }
  0xfc   : > { %v428_v29 = vadd.f32 %v427_v28, %v426_v26 }
  0xfd   : > { %433 = vst [vmem:[%s876_s19] sm:$0x1] %v421_v27 }
  0xfe   : > { %434 = vst [vmem:[%s883_s30] sm:$0x1] %v428_v29 }
  0xff PF: > { %p609_p5 = scmp.eq.s32.totalorder %s747_s21, 0 }
 0x101   : > { %438 = sbr.rel (%p609_p5) target bundleno = 267 (0x10b), region = 48 }
 0x106   : > { %v439_v30 = vld [vmem:[%s876_s19] sm:$0x1] }
 0x107   : > { %v442_v31 = vld [vmem:[%s883_s30] sm:$0x1]  ;;  %v440_v32 = vadd.f32 %v439_v30, %v421_v27 }
 0x108   : > { %v443_v33 = vadd.f32 %v442_v31, %v428_v29 }
 0x109   : > { %441 = vst [vmem:[%s876_s19] sm:$0x1] %v440_v32 }
 0x10a   : > { %444 = vst [vmem:[%s883_s30] sm:$0x1] %v443_v33 }
 0x10b PF: > { %s18_s25 = sadd.s32 1, %s763_s25   ;;  %s935_s21 = smov %s755_s23 }
 0x10c   : > { %p15_p6 = scmp.ge.s32.totalorder %s18_s25, 34   ;;  %s936_s22 = smov %s759_s24 }
 0x10d   : > { %s937_s23 = smov %s940_s27  ;;  %s938_s24 = smov %s944_s28 }
 0x10e   :  { %17 = sbr.rel (!%p15_p6) target bundleno = 3 (0x3), region = 103 }
 0x113   :  { %496 = vsyncpa [#allocation3], 1 }
 0x114   :  { %498 = vsyncpa [#allocation3 + $0x1], 1 }

// kernel: stnkd_forward.8
= control target key start
LH: loop header
LB: loop body
LE: loop exit
PB: predicated region body
PF: predicated region fallthrough
CT: control target
= control target key end

     0   :  { %13 = vsyncpa [#allocation3], 0  ;;  %s1843_s24 = smov 0   ;;  %s1845_s25 = smov 0   ;;  %s2189_s0 = inlined_call_operand.vmem [shape: f32[8,32,128], index: 0, kind: input, shape index: {}]   ;;  %s2190_s1 = inlined_call_operand.vmem [shape: f32[1,128], index: 1, kind: input, shape index: {}]   ;;  %s2191_s2 = inlined_call_operand.vmem [shape: f32[1,128], index: 2, kind: input, shape index: {}]   ;;  %s2192_s3 = inlined_call_operand.hbm [shape: f32[128,1024], index: 3, kind: input, shape index: {}]   ;;  %s2193_s4 = inlined_call_operand.vmem [shape: f32[8,1,1024], index: 4, kind: output, shape index: {0}]   ;;  %s2194_s5 = inlined_call_operand.vmem [shape: f32[8,1,1024], index: 5, kind: output, shape index: {1}]   ;;  %s2195_s6 = inlined_call_operand.vmem [shape: f32[8,1,1024], index: 6, kind: output, shape index: {2}]   ;;  %s2196_s7 = inlined_call_operand.vmem [shape: f32[8,1,1024], index: 7, kind: output, shape index: {3}]  }
   0x1   :  { %s1847_s26 = smov 0   ;;  %s1849_s27 = smov 0  }
   0x2   :  { %s1851_s28 = smov 0  }
   0x3 LB: > { %s1646_s29 = sadd.s32 4294967295, %s1793_s28   ;;  %s28_s30 = sadd.s32 1, %s1785_s26  ;;  %s1793_s28 = sphi %s1851_s28, %s19_s28   ;;  %s1789_s27 = sphi %s1849_s27, %s2203_s27   ;;  %s1785_s26 = sphi %s1847_s26, %s2202_s26   ;;  %s1781_s25 = sphi %s1845_s25, %s2201_s25   ;;  %s1777_s24 = sphi %s1843_s24, %s2200_s24  }
   0x4   : > { %p29_p0 = scmp.ge.s32.totalorder %s28_s30, 4  ;;  %s31_s8 = sadd.s32 1, %s1789_s27 }
   0x5   : > { %p1648_p1 = scmp.ge.s32.totalorder %s1793_s28, 1  ;;  %p231_p2 = scmp.lt.s32.totalorder %s1793_s28, 33 }
   0x6   : > { %s2205_s30 = smov (%p29_p0, %s28_s30), 0  ;;  %s2207_s8 = smov (!%p29_p0, %s31_s8), %s1789_s27 }
   0x7   : > { %p1876_p3 = pnand %p1648_p1, %p231_p2  ;;  %p33_p4 = scmp.ge.s32.totalorder %s2207_s8, 8 }
   0x8   : > { %p1880_p5 = scmp.eq.s32.totalorder %s1646_s29, 0  ;;  %s1795_s11 = smov [#allocation2]  }
   0x9   : > { %p1671_p6 = pneg %p1876_p3  ;;  %s2209_s8 = smov (%p33_p4, %s2207_s8), 0 }
   0xa   : > { %s249_s12 = sshll.u32 %s1795_s11, 4  ;;  %s250_s12 = int_to_ptr.vmem [resolvable:$true] %s249_s12 }
   0xb   : > { %p1890_p7 = pnand %p1880_p5, %p1671_p6  ;;  %s1736_s14 = scalar_lea.vmem %s250_s12, 16384 }
   0xc   : > { %p1737_p9 = scmp.ne.s32.totalorder %s250_s12, %s1736_s14  ;;  %p1744_p12 = scmp.lt.s32.totalorder %s250_s12, %s250_s12 }
   0xd   : > { %p1727_p8 = pneg %p1890_p7  ;;  %p1745_p13 = scmp.lt.s32.totalorder %s1736_s14, %s1736_s14 }
   0xf   : > { %p1739_p10 = pnand %p1737_p9, %p1727_p8  ;;  %p1746_p0 = por %p1745_p13, %p1744_p12 }
  0x11   : > { %p1740_p11 = pneg %p1739_p10 }
  0x13   : > { %p1747_p1 = pnand %p1746_p0, %p1740_p11 }
  0x15   : > { %1750 = shalt.err (!%p1747_p1)
}
  0x16   : > { %s1796_s15 = smov 1024   ;;  %s1797_s16 = smov 64  }
  0x17   : > { %1674 = dma.hbm_to_vmem [thread:$0]  (!%p1890_p7), %s2192_s3, 16384, %s250_s12, [#allocation3], %s1796_s15, %s1796_s15, %s1797_s16  }
  0x18   : > { %276 = sbr.rel (%p1876_p3) target bundleno = 411 (0x19b), region = 36 }
  0x1d   : > { %1772 = dma.done.wait (%p1880_p5), [#allocation3], 16384  }
  0x1e   : > { %1774 = vsyncadd (%p1880_p5), [#allocation3], 4294950912  ;;  %p322_p2 = scmp.lt.s32.totalorder %s1781_s25, 7  ;;  %v1798_v0 = vmov 0.0   ;;  %v485_v1 = vld [vmem:[#allocation2 + $0x3c8] sm:$0xff]  ;;  %v487_v2 = vld [vmem:[#allocation2 + $0x3d8] sm:$0xff] }
  0x1f   : > { %556 = vmatprep.mubr.f32.mxu0 %v1798_v0  ;;  %627 = vmatprep.mubr.f32.mxu1 %v1798_v0  ;;  %v484_v3 = vld [vmem:[#allocation2 + $0x3c0] sm:$0xff]  ;;  %v486_v4 = vld [vmem:[#allocation2 + $0x3d0] sm:$0xff]  ;;  %v477_v5 = vld [vmem:[#allocation2 + $0x388] sm:$0xff]  ;;  %p324_p3 = scmp.lt.s32.totalorder %s1777_s24, 3  ;;  %p1661_p4 = scmp.ne.s32.totalorder %s1777_s24, 0 }
  0x20   : > { %s2211_s25 = smov (!%p322_p2, %s1781_s25), 7  ;;  %492 = vmatprep.subr.mxu0 %v485_v1  ;;  %563 = vmatprep.subr.mxu1 %v487_v2  ;;  %v479_v6 = vld [vmem:[#allocation2 + $0x398] sm:$0xff]  ;;  %v476_v7 = vld [vmem:[#allocation2 + $0x380] sm:$0xff]  ;;  %v478_v8 = vld [vmem:[#allocation2 + $0x390] sm:$0xff] }
  0x21   : > { %s1655_s19 = sshll.u32 %s2211_s25, 3  ;;  %493 = vmatpush1.msra.mxu0 %v484_v3  ;;  %564 = vmatpush1.msra.mxu1 %v486_v4  ;;  %v469_v9 = vld [vmem:[#allocation2 + $0x348] sm:$0xff]  ;;  %v471_v10 = vld [vmem:[#allocation2 + $0x358] sm:$0xff]  ;;  %v468_v11 = vld [vmem:[#allocation2 + $0x340] sm:$0xff]  ;;  %s1653_s17 = sshll.u32 %s2211_s25, 2 }
  0x22   : > { %s1917_s22 = scalar_lea.vmem %s2193_s4, %s1655_s19  ;;  %s1922_s9 = scalar_lea.vmem %s2194_s5, %s1655_s19  ;;  %494 = vmatprep.subr.mxu0 %v477_v5  ;;  %565 = vmatprep.subr.mxu1 %v479_v6  ;;  %v470_v12 = vld [vmem:[#allocation2 + $0x350] sm:$0xff]  ;;  %v461_v13 = vld [vmem:[#allocation2 + $0x308] sm:$0xff]  ;;  %v463_v14 = vld [vmem:[#allocation2 + $0x318] sm:$0xff] }
  0x23   : > { %s1927_s12 = scalar_lea.vmem %s2195_s6, %s1655_s19  ;;  %s1932_s15 = scalar_lea.vmem %s2196_s7, %s1655_s19  ;;  %495 = vmatpush1.msra.mxu0 %v476_v7  ;;  %566 = vmatpush1.msra.mxu1 %v478_v8  ;;  %v460_v15 = vld [vmem:[#allocation2 + $0x300] sm:$0xff]  ;;  %v462_v16 = vld [vmem:[#allocation2 + $0x310] sm:$0xff]  ;;  %v453_v17 = vld [vmem:[#allocation2 + $0x2c8] sm:$0xff] }
  0x24   : > { %496 = vmatprep.subr.mxu0 %v469_v9  ;;  %567 = vmatprep.subr.mxu1 %v471_v10  ;;  %v455_v18 = vld [vmem:[#allocation2 + $0x2d8] sm:$0xff]  ;;  %v452_v19 = vld [vmem:[#allocation2 + $0x2c0] sm:$0xff]  ;;  %v454_v20 = vld [vmem:[#allocation2 + $0x2d0] sm:$0xff]  ;;  %s325_s16 = scalar_select %p324_p3, %s1777_s24, 3 }
  0x25   : > { %497 = vmatpush1.msra.mxu0 %v468_v11  ;;  %568 = vmatpush1.msra.mxu1 %v470_v12  ;;  %v445_v21 = vld [vmem:[#allocation2 + $0x288] sm:$0xff]  ;;  %v447_v22 = vld [vmem:[#allocation2 + $0x298] sm:$0xff]  ;;  %v444_v23 = vld [vmem:[#allocation2 + $0x280] sm:$0xff] }
  0x26   : > { %498 = vmatprep.subr.mxu0 %v461_v13  ;;  %569 = vmatprep.subr.mxu1 %v463_v14  ;;  %v446_v24 = vld [vmem:[#allocation2 + $0x290] sm:$0xff]  ;;  %v437_v25 = vld [vmem:[#allocation2 + $0x248] sm:$0xff]  ;;  %v439_v26 = vld [vmem:[#allocation2 + $0x258] sm:$0xff]  ;;  %s327_s18 = sadd.s32 %s1653_s17, %s325_s16 }
  0x27   : > { %499 = vmatpush1.msra.mxu0 %v460_v15  ;;  %570 = vmatpush1.msra.mxu1 %v462_v16  ;;  %v436_v27 = vld [vmem:[#allocation2 + $0x240] sm:$0xff]  ;;  %v438_v28 = vld [vmem:[#allocation2 + $0x250] sm:$0xff]  ;;  %v429_v29 = vld [vmem:[#allocation2 + $0x208] sm:$0xff]  ;;  %s1654_s25 = sshll.u32 %s327_s18, 3 }
  0x28   : > { %500 = vmatprep.subr.mxu0 %v453_v17  ;;  %571 = vmatprep.subr.mxu1 %v455_v18  ;;  %v431_v30 = vld [vmem:[#allocation2 + $0x218] sm:$0xff]  ;;  %v428_v31 = vld [vmem:[#allocation2 + $0x200] sm:$0xff]  ;;  %v430_v32 = vld [vmem:[#allocation2 + $0x210] sm:$0xff]  ;;  %s329_s21 = scalar_lea.vmem %s2189_s0, %s1654_s25 }
  0x29   : > { %501 = vmatpush1.msra.mxu0 %v452_v19  ;;  %572 = vmatpush1.msra.mxu1 %v454_v20  ;;  %v421_v33 = vld [vmem:[#allocation2 + $0x1c8] sm:$0xff]  ;;  %v423_v34 = vld [vmem:[#allocation2 + $0x1d8] sm:$0xff]  ;;  %v420_v35 = vld [vmem:[#allocation2 + $0x1c0] sm:$0xff] }
  0x2a   : > { %502 = vmatprep.subr.mxu0 %v445_v21  ;;  %573 = vmatprep.subr.mxu1 %v447_v22  ;;  %v422_v36 = vld [vmem:[#allocation2 + $0x1d0] sm:$0xff]  ;;  %v413_v37 = vld [vmem:[#allocation2 + $0x188] sm:$0xff]  ;;  %v415_v38 = vld [vmem:[#allocation2 + $0x198] sm:$0xff] }
  0x2b   : > { %503 = vmatpush1.msra.mxu0 %v444_v23  ;;  %574 = vmatpush1.msra.mxu1 %v446_v24  ;;  %v412_v39 = vld [vmem:[#allocation2 + $0x180] sm:$0xff]  ;;  %v414_v40 = vld [vmem:[#allocation2 + $0x190] sm:$0xff]  ;;  %v405_v41 = vld [vmem:[#allocation2 + $0x148] sm:$0xff] }
  0x2c   : > { %504 = vmatprep.subr.mxu0 %v437_v25  ;;  %575 = vmatprep.subr.mxu1 %v439_v26  ;;  %v407_v42 = vld [vmem:[#allocation2 + $0x158] sm:$0xff]  ;;  %v404_v43 = vld [vmem:[#allocation2 + $0x140] sm:$0xff]  ;;  %v406_v44 = vld [vmem:[#allocation2 + $0x150] sm:$0xff] }
  0x2d   : > { %505 = vmatpush1.msra.mxu0 %v436_v27  ;;  %576 = vmatpush1.msra.mxu1 %v438_v28  ;;  %v397_v45 = vld [vmem:[#allocation2 + $0x108] sm:$0xff]  ;;  %v399_v46 = vld [vmem:[#allocation2 + $0x118] sm:$0xff]  ;;  %v396_v47 = vld [vmem:[#allocation2 + $0x100] sm:$0xff] }
  0x2e   : > { %506 = vmatprep.subr.mxu0 %v429_v29  ;;  %577 = vmatprep.subr.mxu1 %v431_v30  ;;  %v398_v48 = vld [vmem:[#allocation2 + $0x110] sm:$0xff]  ;;  %v346_v49 = vld [vmem:[%s329_s21] sm:$0xff]  ;;  %v389_v51 = vld [vmem:[#allocation2 + $0xc8] sm:$0xff] }
  0x2f   : > { %507 = vmatpush1.msra.mxu0 %v428_v31  ;;  %578 = vmatpush1.msra.mxu1 %v430_v32  ;;  %v1659_v50 = vld [vmem:[%s2190_s1] ss:$0 sm:$0xff]  ;;  %v391_v52 = vld [vmem:[#allocation2 + $0xd8] sm:$0xff]  ;;  %v390_v56 = vld [vmem:[#allocation2 + $0xd0] sm:$0xff] }
  0x30   : > { %508 = vmatprep.subr.mxu0 %v421_v33  ;;  %579 = vmatprep.subr.mxu1 %v423_v34  ;;  %v354_v53 = vmul.f32 %v1659_v50, %v346_v49  ;;  %v1660_v54 = vld [vmem:[%s2191_s2] ss:$0 sm:$0xff]  ;;  %v381_v57 = vld [vmem:[#allocation2 + $0x88] sm:$0xff]  ;;  %v383_v58 = vld [vmem:[#allocation2 + $0x98] sm:$0xff] }
  0x31   : > { %509 = vmatpush1.msra.mxu0 %v420_v35  ;;  %580 = vmatpush1.msra.mxu1 %v422_v36  ;;  %v388_v55 = vld [vmem:[#allocation2 + $0xc0] sm:$0xff]  ;;  %v382_v60 = vld [vmem:[#allocation2 + $0x90] sm:$0xff]  ;;  %v373_v62 = vld [vmem:[#allocation2 + $0x48] sm:$0xff] }
  0x32   : > { %510 = vmatprep.subr.mxu0 %v413_v37  ;;  %581 = vmatprep.subr.mxu1 %v415_v38  ;;  %v380_v59 = vld [vmem:[#allocation2 + $0x80] sm:$0xff]  ;;  %v362_v61 = vadd.f32 %v1660_v54, %v354_v53  ;;  %v375_v63 = vld [vmem:[#allocation2 + $0x58] sm:$0xff]  ;;  %v374_v2 = vld [vmem:[#allocation2 + $0x50] sm:$0xff] }
  0x33   : > { %511 = vmatpush1.msra.mxu0 %v412_v39  ;;  %582 = vmatpush1.msra.mxu1 %v414_v40  ;;  %v372_v1 = vld [vmem:[#allocation2 + $0x40] sm:$0xff]  ;;  %v365_v3 = vld [vmem:[#allocation2 + $0x8] sm:$0xff]  ;;  %v367_v4 = vld [vmem:[#allocation2 + $0x18] sm:$0xff] }
  0x34   : > { %512 = vmatprep.subr.mxu0 %v405_v41  ;;  %583 = vmatprep.subr.mxu1 %v407_v42  ;;  %v364_v5 = vld [vmem:[#allocation2] sm:$0xff]  ;;  %v366_v6 = vld [vmem:[#allocation2 + $0x10] sm:$0xff]  ;;  %v1948_v7 = vmax.f32 %v362_v61, 0.0  ;;  %v489_v8 = vld [vmem:[#allocation2 + $0x3e8] sm:$0xff] }
  0x35   : > { %513 = vmatpush1.msra.mxu0 %v404_v43  ;;  %584 = vmatpush1.msra.mxu1 %v406_v44  ;;  %v491_v9 = vld [vmem:[#allocation2 + $0x3f8] sm:$0xff]  ;;  %v488_v10 = vld [vmem:[#allocation2 + $0x3e0] sm:$0xff]  ;;  %v490_v11 = vld [vmem:[#allocation2 + $0x3f0] sm:$0xff] }
  0x36   : > { %514 = vmatprep.subr.mxu0 %v397_v45  ;;  %585 = vmatprep.subr.mxu1 %v399_v46  ;;  %v481_v12 = vld [vmem:[#allocation2 + $0x3a8] sm:$0xff]  ;;  %v483_v13 = vld [vmem:[#allocation2 + $0x3b8] sm:$0xff]  ;;  %v480_v14 = vld [vmem:[#allocation2 + $0x3a0] sm:$0xff] }
  0x37   : > { %515 = vmatpush1.msra.mxu0 %v396_v47  ;;  %586 = vmatpush1.msra.mxu1 %v398_v48  ;;  %v482_v15 = vld [vmem:[#allocation2 + $0x3b0] sm:$0xff]  ;;  %v473_v16 = vld [vmem:[#allocation2 + $0x368] sm:$0xff]  ;;  %v475_v17 = vld [vmem:[#allocation2 + $0x378] sm:$0xff] }
  0x38   : > { %516 = vmatprep.subr.mxu0 %v389_v51  ;;  %587 = vmatprep.subr.mxu1 %v391_v52  ;;  %v472_v18 = vld [vmem:[#allocation2 + $0x360] sm:$0xff]  ;;  %v474_v19 = vld [vmem:[#allocation2 + $0x370] sm:$0xff]  ;;  %v465_v20 = vld [vmem:[#allocation2 + $0x328] sm:$0xff] }
  0x39   : > { %517 = vmatpush1.msra.mxu0 %v388_v55  ;;  %588 = vmatpush1.msra.mxu1 %v390_v56  ;;  %v467_v21 = vld [vmem:[#allocation2 + $0x338] sm:$0xff]  ;;  %v464_v22 = vld [vmem:[#allocation2 + $0x320] sm:$0xff]  ;;  %v466_v23 = vld [vmem:[#allocation2 + $0x330] sm:$0xff] }
  0x3a   : > { %518 = vmatprep.subr.mxu0 %v381_v57  ;;  %589 = vmatprep.subr.mxu1 %v383_v58  ;;  %v457_v24 = vld [vmem:[#allocation2 + $0x2e8] sm:$0xff]  ;;  %v459_v25 = vld [vmem:[#allocation2 + $0x2f8] sm:$0xff]  ;;  %v456_v26 = vld [vmem:[#allocation2 + $0x2e0] sm:$0xff] }
  0x3b   : > { %519 = vmatpush1.msra.mxu0 %v380_v59  ;;  %590 = vmatpush1.msra.mxu1 %v382_v60  ;;  %v458_v27 = vld [vmem:[#allocation2 + $0x2f0] sm:$0xff]  ;;  %v449_v28 = vld [vmem:[#allocation2 + $0x2a8] sm:$0xff]  ;;  %v451_v29 = vld [vmem:[#allocation2 + $0x2b8] sm:$0xff] }
  0x3c   : > { %520 = vmatprep.subr.mxu0 %v373_v62  ;;  %591 = vmatprep.subr.mxu1 %v375_v63  ;;  %v448_v30 = vld [vmem:[#allocation2 + $0x2a0] sm:$0xff]  ;;  %v450_v31 = vld [vmem:[#allocation2 + $0x2b0] sm:$0xff]  ;;  %v441_v32 = vld [vmem:[#allocation2 + $0x268] sm:$0xff] }
  0x3d   : > { %521 = vmatpush1.msra.mxu0 %v372_v1  ;;  %592 = vmatpush1.msra.mxu1 %v374_v2  ;;  %v443_v33 = vld [vmem:[#allocation2 + $0x278] sm:$0xff]  ;;  %v440_v34 = vld [vmem:[#allocation2 + $0x260] sm:$0xff]  ;;  %v442_v35 = vld [vmem:[#allocation2 + $0x270] sm:$0xff] }
  0x3e   : > { %522 = vmatprep.subr.mxu0 %v365_v3  ;;  %593 = vmatprep.subr.mxu1 %v367_v4  ;;  %v433_v36 = vld [vmem:[#allocation2 + $0x228] sm:$0xff]  ;;  %v435_v37 = vld [vmem:[#allocation2 + $0x238] sm:$0xff]  ;;  %v432_v38 = vld [vmem:[#allocation2 + $0x220] sm:$0xff] }
  0x3f   : > { %523 = vmatpush1.msra.mxu0 %v364_v5  ;;  %594 = vmatpush1.msra.mxu1 %v366_v6  ;;  %v434_v39 = vld [vmem:[#allocation2 + $0x230] sm:$0xff]  ;;  %v425_v40 = vld [vmem:[#allocation2 + $0x1e8] sm:$0xff]  ;;  %v427_v41 = vld [vmem:[#allocation2 + $0x1f8] sm:$0xff] }
  0x40   : > { %557 = vmatmul.mubr.f32.vlgmr.msra.gmra.mxu0 %v1948_v7  ;;  %628 = vmatmul.mubr.f32.vlgmr.msra.gmra.mxu1 %v1948_v7  ;;  %v424_v42 = vld [vmem:[#allocation2 + $0x1e0] sm:$0xff]  ;;  %v426_v43 = vld [vmem:[#allocation2 + $0x1f0] sm:$0xff]  ;;  %v417_v44 = vld [vmem:[#allocation2 + $0x1a8] sm:$0xff] }
  0x41   : > { %634 = vmatprep.subr.mxu0 %v489_v8  ;;  %705 = vmatprep.subr.mxu1 %v491_v9  ;;  %v419_v45 = vld [vmem:[#allocation2 + $0x1b8] sm:$0xff]  ;;  %v416_v46 = vld [vmem:[#allocation2 + $0x1a0] sm:$0xff]  ;;  %v418_v47 = vld [vmem:[#allocation2 + $0x1b0] sm:$0xff] }
  0x42   : > { %635 = vmatpush1.msra.mxu0 %v488_v10  ;;  %706 = vmatpush1.msra.mxu1 %v490_v11  ;;  %v409_v48 = vld [vmem:[#allocation2 + $0x168] sm:$0xff]  ;;  %v411_v49 = vld [vmem:[#allocation2 + $0x178] sm:$0xff]  ;;  %v408_v50 = vld [vmem:[#allocation2 + $0x160] sm:$0xff] }
  0x43   : > { %636 = vmatprep.subr.mxu0 %v481_v12  ;;  %707 = vmatprep.subr.mxu1 %v483_v13  ;;  %v410_v51 = vld [vmem:[#allocation2 + $0x170] sm:$0xff]  ;;  %v401_v52 = vld [vmem:[#allocation2 + $0x128] sm:$0xff]  ;;  %v403_v53 = vld [vmem:[#allocation2 + $0x138] sm:$0xff] }
  0x44   : > { %637 = vmatpush1.msra.mxu0 %v480_v14  ;;  %708 = vmatpush1.msra.mxu1 %v482_v15  ;;  %v400_v54 = vld [vmem:[#allocation2 + $0x120] sm:$0xff]  ;;  %v402_v55 = vld [vmem:[#allocation2 + $0x130] sm:$0xff]  ;;  %v393_v56 = vld [vmem:[#allocation2 + $0xe8] sm:$0xff] }
  0x45   : > { %638 = vmatprep.subr.mxu0 %v473_v16  ;;  %709 = vmatprep.subr.mxu1 %v475_v17  ;;  %v395_v57 = vld [vmem:[#allocation2 + $0xf8] sm:$0xff]  ;;  %v392_v58 = vld [vmem:[#allocation2 + $0xe0] sm:$0xff]  ;;  %v394_v59 = vld [vmem:[#allocation2 + $0xf0] sm:$0xff] }
  0x46   : > { %639 = vmatpush1.msra.mxu0 %v472_v18  ;;  %710 = vmatpush1.msra.mxu1 %v474_v19  ;;  %v385_v60 = vld [vmem:[#allocation2 + $0xa8] sm:$0xff]  ;;  %v387_v61 = vld [vmem:[#allocation2 + $0xb8] sm:$0xff]  ;;  %v384_v62 = vld [vmem:[#allocation2 + $0xa0] sm:$0xff] }
  0x47   : > { %640 = vmatprep.subr.mxu0 %v465_v20  ;;  %711 = vmatprep.subr.mxu1 %v467_v21  ;;  %v386_v63 = vld [vmem:[#allocation2 + $0xb0] sm:$0xff]  ;;  %v377_v1 = vld [vmem:[#allocation2 + $0x68] sm:$0xff]  ;;  %v379_v2 = vld [vmem:[#allocation2 + $0x78] sm:$0xff] }
  0x48   : > { %641 = vmatpush1.msra.mxu0 %v464_v22  ;;  %712 = vmatpush1.msra.mxu1 %v466_v23  ;;  %v376_v3 = vld [vmem:[#allocation2 + $0x60] sm:$0xff]  ;;  %v378_v4 = vld [vmem:[#allocation2 + $0x70] sm:$0xff]  ;;  %v369_v5 = vld [vmem:[#allocation2 + $0x28] sm:$0xff] }
  0x49   : > { %642 = vmatprep.subr.mxu0 %v457_v24  ;;  %713 = vmatprep.subr.mxu1 %v459_v25  ;;  %v371_v6 = vld [vmem:[#allocation2 + $0x38] sm:$0xff]  ;;  %v368_v8 = vld [vmem:[#allocation2 + $0x20] sm:$0xff]  ;;  %v370_v9 = vld [vmem:[#allocation2 + $0x30] sm:$0xff] }
  0x4a   : > { %643 = vmatpush1.msra.mxu0 %v456_v26  ;;  %714 = vmatpush1.msra.mxu1 %v458_v27 }
  0x4b   : > { %644 = vmatprep.subr.mxu0 %v449_v28  ;;  %715 = vmatprep.subr.mxu1 %v451_v29 }
  0x4c   : > { %645 = vmatpush1.msra.mxu0 %v448_v30  ;;  %716 = vmatpush1.msra.mxu1 %v450_v31 }
  0x4d   : > { %646 = vmatprep.subr.mxu0 %v441_v32  ;;  %717 = vmatprep.subr.mxu1 %v443_v33 }
  0x4e   : > { %647 = vmatpush1.msra.mxu0 %v440_v34  ;;  %718 = vmatpush1.msra.mxu1 %v442_v35 }
  0x4f   : > { %648 = vmatprep.subr.mxu0 %v433_v36  ;;  %719 = vmatprep.subr.mxu1 %v435_v37 }
  0x50   : > { %649 = vmatpush1.msra.mxu0 %v432_v38  ;;  %720 = vmatpush1.msra.mxu1 %v434_v39 }
  0x51   : > { %650 = vmatprep.subr.mxu0 %v425_v40  ;;  %721 = vmatprep.subr.mxu1 %v427_v41 }
  0x52   : > { %651 = vmatpush1.msra.mxu0 %v424_v42  ;;  %722 = vmatpush1.msra.mxu1 %v426_v43 }
  0x53   : > { %652 = vmatprep.subr.mxu0 %v417_v44  ;;  %723 = vmatprep.subr.mxu1 %v419_v45 }
  0x54   : > { %653 = vmatpush1.msra.mxu0 %v416_v46  ;;  %724 = vmatpush1.msra.mxu1 %v418_v47 }
  0x55   : > { %654 = vmatprep.subr.mxu0 %v409_v48  ;;  %725 = vmatprep.subr.mxu1 %v411_v49 }
  0x56   : > { %655 = vmatpush1.msra.mxu0 %v408_v50  ;;  %726 = vmatpush1.msra.mxu1 %v410_v51 }
  0x57   : > { %656 = vmatprep.subr.mxu0 %v401_v52  ;;  %727 = vmatprep.subr.mxu1 %v403_v53 }
  0x58   : > { %657 = vmatpush1.msra.mxu0 %v400_v54  ;;  %728 = vmatpush1.msra.mxu1 %v402_v55 }
  0x59   : > { %658 = vmatprep.subr.mxu0 %v393_v56  ;;  %729 = vmatprep.subr.mxu1 %v395_v57 }
  0x5a   : > { %659 = vmatpush1.msra.mxu0 %v392_v58  ;;  %730 = vmatpush1.msra.mxu1 %v394_v59 }
  0x5b   : > { %660 = vmatprep.subr.mxu0 %v385_v60  ;;  %731 = vmatprep.subr.mxu1 %v387_v61 }
  0x5c   : > { %661 = vmatpush1.msra.mxu0 %v384_v62  ;;  %732 = vmatpush1.msra.mxu1 %v386_v63 }
  0x5d   : > { %662 = vmatprep.subr.mxu0 %v377_v1  ;;  %733 = vmatprep.subr.mxu1 %v379_v2 }
  0x5e   : > { %663 = vmatpush1.msra.mxu0 %v376_v3  ;;  %734 = vmatpush1.msra.mxu1 %v378_v4 }
  0x5f   : > { %664 = vmatprep.subr.mxu0 %v369_v5  ;;  %735 = vmatprep.subr.mxu1 %v371_v6 }
  0x60   : > { %665 = vmatpush1.msra.mxu0 %v368_v8  ;;  %698 = vmatprep.mubr.f32.mxu0 %v1798_v0 }
  0x61   : > { %736 = vmatpush1.msra.mxu1 %v370_v9  ;;  %769 = vmatprep.mubr.f32.mxu1 %v1798_v0 }
  0x62   : > { %699 = vmatmul.mubr.f32.vlgmr.msra.gmra.mxu0 %v1948_v7  ;;  %770 = vmatmul.mubr.f32.vlgmr.msra.gmra.mxu1 %v1948_v7 }
 0x100   : > { %v1956_v10 = vpop.f32.mrf.mxu0  ;;  %v1958_v11 = vpop.f32.mrf.mxu1 }
 0x101   : > { %v1961_v12 = vrot.slane %v1956_v10, 4  ;;  %v824_v13 = vmul.f32 %v1956_v10, %v1956_v10  ;;  %v1966_v14 = vrot.slane %v1958_v11, 4  ;;  %v826_v0 = vmul.f32 %v1958_v11, %v1958_v11 }
 0x102   : > { %v1970_v15 = vpop.f32.mrf.mxu0  ;;  %v1972_v16 = vpop.f32.mrf.mxu1 }
 0x103   : > { %v777_v7 = vadd.f32 %v1961_v12, %v1956_v10  ;;  %v832_v17 = vrot.slane %v824_v13, 4  ;;  %v789_v18 = vadd.f32 %v1966_v14, %v1958_v11  ;;  %v844_v19 = vrot.slane %v826_v0, 4 }
 0x104   : > { %v1979_v20 = vrot.slane %v1970_v15, 4  ;;  %v825_v21 = vmul.f32 %v1970_v15, %v1970_v15  ;;  %v1984_v22 = vrot.slane %v1972_v16, 4  ;;  %v827_v23 = vmul.f32 %v1972_v16, %v1972_v16 }
 0x105   : > { %v778_v24 = vrot.slane %v777_v7, 2  ;;  %v833_v25 = vadd.f32 %v832_v17, %v824_v13  ;;  %v790_v26 = vrot.slane %v789_v18, 2  ;;  %v845_v27 = vadd.f32 %v844_v19, %v826_v0 }
 0x106   : > { %v783_v28 = vadd.f32 %v1979_v20, %v1970_v15  ;;  %v838_v29 = vrot.slane %v825_v21, 4  ;;  %v795_v30 = vadd.f32 %v1984_v22, %v1972_v16  ;;  %v850_v31 = vrot.slane %v827_v23, 4 }
 0x107   : > { %v779_v32 = vadd.f32 %v778_v24, %v777_v7  ;;  %v834_v33 = vrot.slane %v833_v25, 2  ;;  %v791_v34 = vadd.f32 %v790_v26, %v789_v18  ;;  %v846_v35 = vrot.slane %v845_v27, 2 }
 0x108   : > { %v784_v36 = vrot.slane %v783_v28, 2  ;;  %v839_v37 = vadd.f32 %v838_v29, %v825_v21  ;;  %v796_v38 = vrot.slane %v795_v30, 2  ;;  %v851_v39 = vadd.f32 %v850_v31, %v827_v23 }
 0x109   : > { %v780_v40 = vrot.slane %v779_v32, 1  ;;  %v835_v41 = vadd.f32 %v834_v33, %v833_v25  ;;  %v792_v42 = vrot.slane %v791_v34, 1  ;;  %v847_v43 = vadd.f32 %v846_v35, %v845_v27 }
 0x10a   : > { %v785_v44 = vadd.f32 %v784_v36, %v783_v28  ;;  %v840_v45 = vrot.slane %v839_v37, 2  ;;  %v797_v46 = vadd.f32 %v796_v38, %v795_v30  ;;  %v852_v47 = vrot.slane %v851_v39, 2 }
 0x10b   : > { %v1992_v48 = vadd.f32 %v780_v40, %v779_v32  ;;  %v836_v49 = vrot.slane %v835_v41, 1  ;;  %v1994_v50 = vadd.f32 %v792_v42, %v791_v34  ;;  %v848_v51 = vrot.slane %v847_v43, 1 }
 0x10c   : > { %v786_v52 = vrot.slane %v785_v44, 1  ;;  %v841_v53 = vadd.f32 %v840_v45, %v839_v37  ;;  %v798_v54 = vrot.slane %v797_v46, 1  ;;  %v853_v55 = vadd.f32 %v852_v47, %v851_v39 }
 0x10d   : > { %v1996_v56 = vadd.f32 %v836_v49, %v835_v41  ;;  %v1998_v57 = vadd.f32 %v848_v51, %v847_v43 }
 0x10e   : > { %v2000_v58 = vadd.f32 %v786_v52, %v785_v44  ;;  %v842_v59 = vrot.slane %v841_v53, 1  ;;  %v2002_v60 = vadd.f32 %v798_v54, %v797_v46  ;;  %v854_v61 = vrot.slane %v853_v55, 1 }
 0x110   : > { %v2004_v62 = vadd.f32 %v842_v59, %v841_v53  ;;  %v2006_v63 = vadd.f32 %v854_v61, %v853_v55 }
 0x122   : > { %v2008_v1 = vpop.f32.mrf.mxu0  ;;  %v2010_v2 = vpop.f32.mrf.mxu1 }
 0x123   : > { %v2013_v3 = vrot.slane %v2008_v1, 4  ;;  %v828_v4 = vmul.f32 %v2008_v1, %v2008_v1  ;;  %v2018_v5 = vrot.slane %v2010_v2, 4  ;;  %v830_v6 = vmul.f32 %v2010_v2, %v2010_v2 }
 0x124   : > { %v2022_v8 = vpop.f32.mrf.mxu0  ;;  %v2024_v9 = vpop.f32.mrf.mxu1 }
 0x125   : > { %v801_v13 = vadd.f32 %v2013_v3, %v2008_v1  ;;  %v856_v0 = vrot.slane %v828_v4, 4  ;;  %v813_v7 = vadd.f32 %v2018_v5, %v2010_v2  ;;  %v868_v17 = vrot.slane %v830_v6, 4 }
 0x126   : > { %v2031_v18 = vrot.slane %v2022_v8, 4  ;;  %v829_v19 = vmul.f32 %v2022_v8, %v2022_v8  ;;  %v2036_v21 = vrot.slane %v2024_v9, 4  ;;  %v831_v23 = vmul.f32 %v2024_v9, %v2024_v9 }
 0x127   : > { %v802_v24 = vrot.slane %v801_v13, 2  ;;  %v857_v25 = vadd.f32 %v856_v0, %v828_v4  ;;  %v814_v26 = vrot.slane %v813_v7, 2  ;;  %v869_v27 = vadd.f32 %v868_v17, %v830_v6 }
 0x128   : > { %v807_v28 = vadd.f32 %v2031_v18, %v2022_v8  ;;  %v862_v29 = vrot.slane %v829_v19, 4  ;;  %v819_v30 = vadd.f32 %v2036_v21, %v2024_v9  ;;  %v874_v31 = vrot.slane %v831_v23, 4 }
 0x129   : > { %v803_v32 = vadd.f32 %v802_v24, %v801_v13  ;;  %v858_v33 = vrot.slane %v857_v25, 2  ;;  %v815_v34 = vadd.f32 %v814_v26, %v813_v7  ;;  %v870_v35 = vrot.slane %v869_v27, 2 }
 0x12a   : > { %v808_v36 = vrot.slane %v807_v28, 2  ;;  %v863_v37 = vadd.f32 %v862_v29, %v829_v19  ;;  %v820_v38 = vrot.slane %v819_v30, 2  ;;  %v875_v39 = vadd.f32 %v874_v31, %v831_v23 }
 0x12b   : > { %v804_v40 = vrot.slane %v803_v32, 1  ;;  %v859_v41 = vadd.f32 %v858_v33, %v857_v25  ;;  %v816_v42 = vrot.slane %v815_v34, 1  ;;  %v871_v43 = vadd.f32 %v870_v35, %v869_v27 }
 0x12c   : > { %v809_v44 = vadd.f32 %v808_v36, %v807_v28  ;;  %v864_v45 = vrot.slane %v863_v37, 2  ;;  %v821_v46 = vadd.f32 %v820_v38, %v819_v30  ;;  %v876_v47 = vrot.slane %v875_v39, 2 }
 0x12d   : > { %v2044_v49 = vadd.f32 %v804_v40, %v803_v32  ;;  %v860_v51 = vrot.slane %v859_v41, 1  ;;  %v2046_v52 = vadd.f32 %v816_v42, %v815_v34  ;;  %v872_v53 = vrot.slane %v871_v43, 1 }
 0x12e   : > { %v810_v54 = vrot.slane %v809_v44, 1  ;;  %v865_v55 = vadd.f32 %v864_v45, %v863_v37  ;;  %v822_v59 = vrot.slane %v821_v46, 1  ;;  %v877_v61 = vadd.f32 %v876_v47, %v875_v39  ;;  %883 = sbr.rel (%p1661_p4) target bundleno = 324 (0x144), region = 44 }
 0x12f   : > { %v2048_v4 = vadd.f32 %v860_v51, %v859_v41  ;;  %v2050_v6 = vadd.f32 %v872_v53, %v871_v43 }
 0x130   : > { %v811_v13 = vadd.f32 %v810_v54, %v809_v44  ;;  %v866_v0 = vrot.slane %v865_v55, 1  ;;  %v823_v7 = vadd.f32 %v822_v59, %v821_v46  ;;  %v878_v17 = vrot.slane %v877_v61, 1 }
 0x132   : > { %v867_v19 = vadd.f32 %v866_v0, %v865_v55  ;;  %v879_v23 = vadd.f32 %v878_v17, %v877_v61 }
 0x133   : > { %v899_v24 = vlaneseq  ;;  %v1799_v25 = vmov 1966171168   ;;  %v892_v27 = vcombine.low %v1992_v48, %v2000_v58  ;;  %v893_v29 = vcombine.low %v1994_v50, %v2002_v60 }
 0x134   : > { %v897_v26 = vunpack.c.l.s4 %v1799_v25  ;;  %v894_v30 = vcombine.low %v2044_v49, %v811_v13  ;;  %v895_v31 = vcombine.low %v2046_v52, %v823_v7  ;;  %v951_v33 = vcombine.low %v1996_v56, %v2004_v62 }
 0x135   : > { %v900_v28 = vshrl.u32 %v899_v24, 7  ;;  %v952_v34 = vcombine.low %v1998_v57, %v2006_v63  ;;  %v953_v35 = vcombine.low %v2048_v4, %v867_v19  ;;  %v954_v36 = vcombine.low %v2050_v6, %v879_v23 }
 0x136   : > { %v898_v32 = vunpack.c.0.s8 %v897_v26 }
 0x138   : > { %v901_v37 = vsub.s32 %v898_v32, %v900_v28 }
 0x13a   : > { %v902_v38 = vrot.slane %v892_v27, %v901_v37  ;;  %v909_v39 = vrot.slane %v893_v29, %v901_v37  ;;  %v916_v40 = vrot.slane %v894_v30, %v901_v37  ;;  %v923_v41 = vrot.slane %v895_v31, %v901_v37 }
 0x13b   : > { %v961_v42 = vrot.slane %v951_v33, %v901_v37  ;;  %v968_v43 = vrot.slane %v952_v34, %v901_v37  ;;  %v975_v44 = vrot.slane %v953_v35, %v901_v37  ;;  %v982_v45 = vrot.slane %v954_v36, %v901_v37 }
 0x13c   : > { %v924_v46 = vcombine.low %v902_v38, %v909_v39  ;;  %v925_v47 = vcombine.low %v916_v40, %v923_v41 }
 0x13d   : > { %v983_v51 = vcombine.low %v961_v42, %v968_v43  ;;  %v984_v53 = vcombine.low %v975_v44, %v982_v45 }
 0x13e   : > { %v932_v54 = vrot.slane %v924_v46, %v901_v37  ;;  %v939_v55 = vrot.slane %v925_v47, %v901_v37 }
 0x13f   : > { %v991_v59 = vrot.slane %v983_v51, %v901_v37  ;;  %v998_v61 = vrot.slane %v984_v53, %v901_v37 }
 0x140   : > { %v940_v0 = vcombine.low %v932_v54, %v939_v55 }
 0x141   : > { %v999_v17 = vcombine.low %v991_v59, %v998_v61 }
 0x142   : > { %942 = vst [vmem:[%s1917_s22] sm:$0xff] %v940_v0 }
 0x143   : > { %1001 = vst [vmem:[%s1922_s9] sm:$0xff] %v999_v17 }
 0x144 PF: > { %p1662_p5 = scmp.eq.s32.totalorder %s1777_s24, 0 }
 0x146   : > { %1005 = sbr.rel (%p1662_p5) target bundleno = 350 (0x15e), region = 48 }
 0x14b   : > { %v1022_v24 = vlaneseq  ;;  %v1800_v25 = vmov 1966171168   ;;  %v1015_v27 = vcombine.low %v1992_v48, %v2000_v58  ;;  %v1016_v29 = vcombine.low %v1994_v50, %v2002_v60  ;;  %v1067_v40 = vld [vmem:[%s1922_s9] sm:$0xff] }
 0x14c   : > { %v1020_v26 = vunpack.c.l.s4 %v1800_v25  ;;  %v1017_v30 = vcombine.low %v2044_v49, %v811_v13  ;;  %v1018_v31 = vcombine.low %v2046_v52, %v823_v7  ;;  %v1076_v33 = vcombine.low %v1996_v56, %v2004_v62 }
 0x14d   : > { %v1023_v28 = vshrl.u32 %v1022_v24, 7  ;;  %v1077_v34 = vcombine.low %v1998_v57, %v2006_v63  ;;  %v1078_v35 = vcombine.low %v2048_v4, %v867_v19  ;;  %v1079_v36 = vcombine.low %v2050_v6, %v879_v23  ;;  %v1006_v6 = vld [vmem:[%s1917_s22] sm:$0xff] }
 0x14e   : > { %v1021_v32 = vunpack.c.0.s8 %v1020_v26 }
 0x150   : > { %v1024_v48 = vsub.s32 %v1021_v32, %v1023_v28 }
 0x152   : > { %v1025_v58 = vrot.slane %v1015_v27, %v1024_v48  ;;  %v1032_v37 = vrot.slane %v1016_v29, %v1024_v48  ;;  %v1039_v50 = vrot.slane %v1017_v30, %v1024_v48  ;;  %v1046_v60 = vrot.slane %v1018_v31, %v1024_v48 }
 0x153   : > { %v1086_v49 = vrot.slane %v1076_v33, %v1024_v48  ;;  %v1093_v52 = vrot.slane %v1077_v34, %v1024_v48  ;;  %v1100_v13 = vrot.slane %v1078_v35, %v1024_v48  ;;  %v1107_v7 = vrot.slane %v1079_v36, %v1024_v48 }
 0x154   : > { %v1047_v56 = vcombine.low %v1025_v58, %v1032_v37  ;;  %v1048_v62 = vcombine.low %v1039_v50, %v1046_v60 }
 0x155   : > { %v1108_v57 = vcombine.low %v1086_v49, %v1093_v52  ;;  %v1109_v63 = vcombine.low %v1100_v13, %v1107_v7 }
 0x156   : > { %v1055_v4 = vrot.slane %v1047_v56, %v1024_v48  ;;  %v1062_v19 = vrot.slane %v1048_v62, %v1024_v48 }
 0x157   : > { %v1116_v23 = vrot.slane %v1108_v57, %v1024_v48  ;;  %v1123_v38 = vrot.slane %v1109_v63, %v1024_v48 }
 0x158   : > { %v1063_v39 = vcombine.low %v1055_v4, %v1062_v19 }
 0x159   : > { %v1124_v41 = vcombine.low %v1116_v23, %v1123_v38 }
 0x15a   : > { %v1065_v42 = vadd.f32 %v1063_v39, %v1006_v6 }
 0x15b   : > { %v1126_v43 = vadd.f32 %v1124_v41, %v1067_v40 }
 0x15c   : > { %1066 = vst [vmem:[%s1917_s22] sm:$0xff] %v1065_v42 }
 0x15d   : > { %1127 = vst [vmem:[%s1922_s9] sm:$0xff] %v1126_v43 }
 0x15e PF: > { %v1129_v44 = vmax.f32 %v1956_v10, %v1961_v12  ;;  %v1135_v45 = vmax.f32 %v1970_v15, %v1979_v20  ;;  %v1141_v46 = vmax.f32 %v1958_v11, %v1966_v14  ;;  %v1147_v47 = vmax.f32 %v1972_v16, %v1984_v22 }
 0x15f   : > { %v1153_v51 = vmax.f32 %v2008_v1, %v2013_v3  ;;  %v1159_v53 = vmax.f32 %v2022_v8, %v2031_v18  ;;  %v1165_v54 = vmax.f32 %v2010_v2, %v2018_v5  ;;  %v1171_v55 = vmax.f32 %v2024_v9, %v2036_v21 }
 0x160   : > { %v1130_v59 = vrot.slane %v1129_v44, 2  ;;  %v1136_v61 = vrot.slane %v1135_v45, 2  ;;  %v1142_v0 = vrot.slane %v1141_v46, 2  ;;  %v1148_v17 = vrot.slane %v1147_v47, 2 }
 0x161   : > { %v1154_v24 = vrot.slane %v1153_v51, 2  ;;  %v1160_v25 = vrot.slane %v1159_v53, 2  ;;  %v1166_v26 = vrot.slane %v1165_v54, 2  ;;  %v1172_v27 = vrot.slane %v1171_v55, 2 }
 0x162   : > { %v1131_v28 = vmax.f32 %v1129_v44, %v1130_v59  ;;  %v1137_v29 = vmax.f32 %v1135_v45, %v1136_v61  ;;  %v1143_v30 = vmax.f32 %v1141_v46, %v1142_v0  ;;  %v1149_v31 = vmax.f32 %v1147_v47, %v1148_v17 }
 0x163   : > { %v1155_v32 = vmax.f32 %v1153_v51, %v1154_v24  ;;  %v1161_v33 = vmax.f32 %v1159_v53, %v1160_v25  ;;  %v1167_v34 = vmax.f32 %v1165_v54, %v1166_v26  ;;  %v1173_v35 = vmax.f32 %v1171_v55, %v1172_v27 }
 0x164   : > { %v1132_v36 = vrot.slane %v1131_v28, 1  ;;  %v1138_v48 = vrot.slane %v1137_v29, 1  ;;  %v1144_v58 = vrot.slane %v1143_v30, 1  ;;  %v1150_v37 = vrot.slane %v1149_v31, 1 }
 0x165   : > { %v1156_v50 = vrot.slane %v1155_v32, 1  ;;  %v1162_v60 = vrot.slane %v1161_v33, 1  ;;  %v1168_v49 = vrot.slane %v1167_v34, 1  ;;  %v1174_v52 = vrot.slane %v1173_v35, 1 }
 0x166   : > { %v2104_v13 = vmax.f32 %v1131_v28, %v1132_v36  ;;  %v2106_v7 = vmax.f32 %v1137_v29, %v1138_v48  ;;  %v2108_v56 = vmax.f32 %v1143_v30, %v1144_v58  ;;  %v2110_v62 = vmax.f32 %v1149_v31, %v1150_v37 }
 0x167   : > { %v2112_v57 = vmax.f32 %v1155_v32, %v1156_v50  ;;  %v2114_v63 = vmax.f32 %v1161_v33, %v1162_v60  ;;  %v2116_v4 = vmax.f32 %v1167_v34, %v1168_v49  ;;  %v2118_v19 = vmax.f32 %v1173_v35, %v1174_v52 }
 0x168   : > { %v1177_v6 = vmin.f32 %v1956_v10, %v1961_v12  ;;  %v1183_v23 = vmin.f32 %v1970_v15, %v1979_v20  ;;  %v1189_v38 = vmin.f32 %v1958_v11, %v1966_v14  ;;  %v1195_v39 = vmin.f32 %v1972_v16, %v1984_v22 }
 0x169   : > { %v1201_v40 = vmin.f32 %v2008_v1, %v2013_v3  ;;  %v1207_v41 = vmin.f32 %v2022_v8, %v2031_v18  ;;  %v1213_v42 = vmin.f32 %v2010_v2, %v2018_v5  ;;  %v1219_v10 = vmin.f32 %v2024_v9, %v2036_v21 }
 0x16a   : > { %v1178_v12 = vrot.slane %v1177_v6, 2  ;;  %v1184_v15 = vrot.slane %v1183_v23, 2  ;;  %v1190_v20 = vrot.slane %v1189_v38, 2  ;;  %v1196_v43 = vrot.slane %v1195_v39, 2 }
 0x16b   : > { %v1202_v11 = vrot.slane %v1201_v40, 2  ;;  %v1208_v14 = vrot.slane %v1207_v41, 2  ;;  %v1214_v44 = vrot.slane %v1213_v42, 2  ;;  %v1220_v16 = vrot.slane %v1219_v10, 2 }
 0x16c   : > { %v1179_v22 = vmin.f32 %v1177_v6, %v1178_v12  ;;  %v1185_v45 = vmin.f32 %v1183_v23, %v1184_v15  ;;  %v1191_v1 = vmin.f32 %v1189_v38, %v1190_v20  ;;  %v1197_v3 = vmin.f32 %v1195_v39, %v1196_v43 }
 0x16d   : > { %v1203_v46 = vmin.f32 %v1201_v40, %v1202_v11  ;;  %v1209_v8 = vmin.f32 %v1207_v41, %v1208_v14  ;;  %v1215_v18 = vmin.f32 %v1213_v42, %v1214_v44  ;;  %v1221_v47 = vmin.f32 %v1219_v10, %v1220_v16  ;;  %1226 = sbr.rel (%p1661_p4) target bundleno = 387 (0x183), region = 52 }
 0x16e   : > { %v1180_v2 = vrot.slane %v1179_v22, 1  ;;  %v1186_v5 = vrot.slane %v1185_v45, 1  ;;  %v1192_v51 = vrot.slane %v1191_v1, 1  ;;  %v1198_v9 = vrot.slane %v1197_v3, 1 }
 0x16f   : > { %v1204_v21 = vrot.slane %v1203_v46, 1  ;;  %v1210_v53 = vrot.slane %v1209_v8, 1  ;;  %v1216_v54 = vrot.slane %v1215_v18, 1  ;;  %v1222_v55 = vrot.slane %v1221_v47, 1 }
 0x170   : > { %v2136_v59 = vmin.f32 %v1179_v22, %v1180_v2  ;;  %v2138_v61 = vmin.f32 %v1185_v45, %v1186_v5  ;;  %v2140_v0 = vmin.f32 %v1191_v1, %v1192_v51  ;;  %v1199_v17 = vmin.f32 %v1197_v3, %v1198_v9 }
 0x171   : > { %v1205_v24 = vmin.f32 %v1203_v46, %v1204_v21  ;;  %v1211_v25 = vmin.f32 %v1209_v8, %v1210_v53  ;;  %v1217_v26 = vmin.f32 %v1215_v18, %v1216_v54  ;;  %v1223_v27 = vmin.f32 %v1221_v47, %v1222_v55 }
 0x172   : > { %v1242_v28 = vlaneseq  ;;  %v1801_v29 = vmov 1966171168   ;;  %v1235_v31 = vcombine.low %v2104_v13, %v2106_v7  ;;  %v1236_v33 = vcombine.low %v2108_v56, %v2110_v62 }
 0x173   : > { %v1240_v30 = vunpack.c.l.s4 %v1801_v29  ;;  %v1237_v34 = vcombine.low %v2112_v57, %v2114_v63  ;;  %v1238_v35 = vcombine.low %v2116_v4, %v2118_v19  ;;  %v1294_v48 = vcombine.low %v2136_v59, %v2138_v61 }
 0x174   : > { %v1243_v32 = vshrl.u32 %v1242_v28, 7  ;;  %v1295_v58 = vcombine.low %v2140_v0, %v1199_v17  ;;  %v1296_v37 = vcombine.low %v1205_v24, %v1211_v25  ;;  %v1297_v50 = vcombine.low %v1217_v26, %v1223_v27 }
 0x175   : > { %v1241_v36 = vunpack.c.0.s8 %v1240_v30 }
 0x177   : > { %v1244_v60 = vsub.s32 %v1241_v36, %v1243_v32 }
 0x179   : > { %v1245_v49 = vrot.slane %v1235_v31, %v1244_v60  ;;  %v1252_v52 = vrot.slane %v1236_v33, %v1244_v60  ;;  %v1259_v6 = vrot.slane %v1237_v34, %v1244_v60  ;;  %v1266_v23 = vrot.slane %v1238_v35, %v1244_v60 }
 0x17a   : > { %v1304_v38 = vrot.slane %v1294_v48, %v1244_v60  ;;  %v1311_v39 = vrot.slane %v1295_v58, %v1244_v60  ;;  %v1318_v40 = vrot.slane %v1296_v37, %v1244_v60  ;;  %v1325_v41 = vrot.slane %v1297_v50, %v1244_v60 }
 0x17b   : > { %v1267_v42 = vcombine.low %v1245_v49, %v1252_v52  ;;  %v1268_v10 = vcombine.low %v1259_v6, %v1266_v23 }
 0x17c   : > { %v1326_v12 = vcombine.low %v1304_v38, %v1311_v39  ;;  %v1327_v15 = vcombine.low %v1318_v40, %v1325_v41 }
 0x17d   : > { %v1275_v20 = vrot.slane %v1267_v42, %v1244_v60  ;;  %v1282_v43 = vrot.slane %v1268_v10, %v1244_v60 }
 0x17e   : > { %v1334_v11 = vrot.slane %v1326_v12, %v1244_v60  ;;  %v1341_v14 = vrot.slane %v1327_v15, %v1244_v60 }
 0x17f   : > { %v1283_v44 = vcombine.low %v1275_v20, %v1282_v43 }
 0x180   : > { %v1342_v16 = vcombine.low %v1334_v11, %v1341_v14 }
 0x181   : > { %1285 = vst [vmem:[%s1927_s12] sm:$0xff] %v1283_v44 }
 0x182   : > { %1344 = vst [vmem:[%s1932_s15] sm:$0xff] %v1342_v16 }
 0x183 PF: > { %1347 = sbr.rel (%p1662_p5) target bundleno = 411 (0x19b), region = 56 }
 0x188   : > { %v1364_v22 = vlaneseq  ;;  %v1802_v45 = vmov 1966171168   ;;  %v1357_v3 = vcombine.low %v2104_v13, %v2106_v7  ;;  %v1358_v8 = vcombine.low %v2108_v56, %v2110_v62 }
 0x189   : > { %v1362_v1 = vunpack.c.l.s4 %v1802_v45  ;;  %v1359_v18 = vcombine.low %v2112_v57, %v2114_v63  ;;  %v1360_v47 = vcombine.low %v2116_v4, %v2118_v19  ;;  %v1418_v5 = vcombine.low %v2136_v59, %v2138_v61  ;;  %v1409_v28 = vld [vmem:[%s1932_s15] sm:$0xff] }
 0x18a   : > { %v1365_v46 = vshrl.u32 %v1364_v22, 7  ;;  %v1419_v51 = vcombine.low %v2140_v0, %v1199_v17  ;;  %v1420_v9 = vcombine.low %v1205_v24, %v1211_v25  ;;  %v1421_v21 = vcombine.low %v1217_v26, %v1223_v27  ;;  %v1348_v24 = vld [vmem:[%s1927_s12] sm:$0xff] }
 0x18b   : > { %v1363_v2 = vunpack.c.0.s8 %v1362_v1 }
 0x18d   : > { %v1366_v13 = vsub.s32 %v1363_v2, %v1365_v46 }
 0x18f   : > { %v1367_v7 = vrot.slane %v1357_v3, %v1366_v13  ;;  %v1374_v53 = vrot.slane %v1358_v8, %v1366_v13  ;;  %v1381_v54 = vrot.slane %v1359_v18, %v1366_v13  ;;  %v1388_v56 = vrot.slane %v1360_v47, %v1366_v13 }
 0x190   : > { %v1428_v62 = vrot.slane %v1418_v5, %v1366_v13  ;;  %v1435_v57 = vrot.slane %v1419_v51, %v1366_v13  ;;  %v1442_v63 = vrot.slane %v1420_v9, %v1366_v13  ;;  %v1449_v4 = vrot.slane %v1421_v21, %v1366_v13 }
 0x191   : > { %v1389_v19 = vcombine.low %v1367_v7, %v1374_v53  ;;  %v1390_v55 = vcombine.low %v1381_v54, %v1388_v56 }
 0x192   : > { %v1450_v59 = vcombine.low %v1428_v62, %v1435_v57  ;;  %v1451_v61 = vcombine.low %v1442_v63, %v1449_v4 }
 0x193   : > { %v1397_v0 = vrot.slane %v1389_v19, %v1366_v13  ;;  %v1404_v17 = vrot.slane %v1390_v55, %v1366_v13 }
 0x194   : > { %v1458_v25 = vrot.slane %v1450_v59, %v1366_v13  ;;  %v1465_v26 = vrot.slane %v1451_v61, %v1366_v13 }
 0x195   : > { %v1405_v27 = vcombine.low %v1397_v0, %v1404_v17 }
 0x196   : > { %v1466_v29 = vcombine.low %v1458_v25, %v1465_v26 }
 0x197   : > { %v1407_v30 = vmax.f32 %v1348_v24, %v1405_v27 }
 0x198   : > { %v1468_v31 = vmin.f32 %v1409_v28, %v1466_v29 }
 0x199   : > { %1408 = vst [vmem:[%s1927_s12] sm:$0xff] %v1407_v30 }
 0x19a   : > { %1469 = vst [vmem:[%s1932_s15] sm:$0xff] %v1468_v31 }
 0x19b PF: > { %s19_s28 = sadd.s32 1, %s1793_s28   ;;  %s2200_s24 = smov %s1785_s26 }
 0x19c   : > { %p16_p6 = scmp.ge.s32.totalorder %s19_s28, 34   ;;  %s2201_s25 = smov %s1789_s27 }
 0x19d   : > { %s2202_s26 = smov %s2205_s30  ;;  %s2203_s27 = smov %s2209_s8 }
 0x19e   :  { %18 = sbr.rel (!%p16_p6) target bundleno = 3 (0x3), region = 123 }
 0x1a3   :  { %1531 = vsyncpa [#allocation3], 1 }
 0x1a4   :  { %1533 = vsyncpa [#allocation3 + $0x1], 1 }

// kernel: stnkd_forward.9
= control target key start
LH: loop header
LB: loop body
LE: loop exit
PB: predicated region body
PF: predicated region fallthrough
CT: control target
= control target key end

     0   :  { %17 = vsyncpa [#allocation3], 0  ;;  %s2068_s21 = smov [#allocation2]   ;;  %s4087_s0 = inlined_call_operand.vmem [shape: f32[8,1024], index: 0, kind: input, shape index: {}]   ;;  %s4088_s1 = inlined_call_operand.vmem [shape: f32[8,1024], index: 1, kind: input, shape index: {}]   ;;  %s4089_s2 = inlined_call_operand.vmem [shape: f32[1,1024], index: 2, kind: input, shape index: {}]   ;;  %s4090_s3 = inlined_call_operand.vmem [shape: f32[1,1024], index: 3, kind: input, shape index: {}]   ;;  %s4091_s4 = inlined_call_operand.vmem [shape: f32[1024,512], index: 4, kind: input, shape index: {}]   ;;  %s4092_s5 = inlined_call_operand.vmem [shape: f32[1,512], index: 5, kind: input, shape index: {}]   ;;  %s4093_s6 = inlined_call_operand.vmem [shape: f32[1,512], index: 6, kind: input, shape index: {}]   ;;  %s4094_s7 = inlined_call_operand.hbm [shape: f32[512,256], index: 7, kind: input, shape index: {}]   ;;  %s4095_s8 = inlined_call_operand.vmem [shape: f32[1,256], index: 8, kind: input, shape index: {}]   ;;  %s4096_s9 = inlined_call_operand.vmem [shape: f32[1,256], index: 9, kind: input, shape index: {}]   ;;  %s4097_s10 = inlined_call_operand.vmem [shape: f32[256,128], index: 10, kind: input, shape index: {}]   ;;  %s4098_s11 = inlined_call_operand.vmem [shape: f32[1,128], index: 11, kind: input, shape index: {}]   ;;  %s4099_s12 = inlined_call_operand.vmem [shape: f32[8,128], index: 12, kind: output, shape index: {}]  }
   0x1   :  { %s37_s22 = sshll.u32 %s2068_s21, 4  ;;  %s38_s22 = int_to_ptr.vmem [resolvable:$true] %s37_s22 }
   0x2   :  { %s2054_s23 = scalar_lea.vmem %s38_s22, 16384  ;;  %p2059_p1 = scmp.lt.s32.totalorder %s38_s22, %s38_s22 }
   0x3   :  { %p2055_p0 = scmp.ne.s32.totalorder %s38_s22, %s2054_s23  ;;  %p2060_p2 = scmp.lt.s32.totalorder %s2054_s23, %s2054_s23 }
   0x5   :  { %p2061_p3 = por %p2060_p2, %p2059_p1 }
   0x7   :  { %p2062_p4 = pnand %p2061_p3, %p2055_p0 }
   0x9   :  { %2065 = shalt.err (!%p2062_p4)
}
   0xa   :  { %s2069_s24 = smov 256   ;;  %s2070_s25 = smov 16  }
   0xb   :  { %43 = dma.hbm_to_vmem [thread:$0]  %s4094_s7, 16384, %s38_s22, [#allocation3], %s2069_s24, %s2069_s24, %s2070_s25  }
   0xc   :  { %2066 = dma.done.wait [#allocation3], 16384  }
   0xd   :  { %2067 = vsyncadd [#allocation3], 4294950912  ;;  %v290_v0 = vld [vmem:[%s4091_s4 + $0x1e8] sm:$0xff]  ;;  %v289_v2 = vld [vmem:[%s4091_s4 + $0x1e0] sm:$0xff] }
   0xe   :  { %v418_v1 = vld [vmem:[%s4091_s4 + $0x5e8] sm:$0xff]  ;;  %741 = vmatprep.subr.mxu0 %v290_v0  ;;  %v417_v3 = vld [vmem:[%s4091_s4 + $0x5e0] sm:$0xff] }
   0xf   :  { %812 = vmatprep.subr.mxu1 %v418_v1  ;;  %v286_v4 = vld [vmem:[%s4091_s4 + $0x1c8] sm:$0xff]  ;;  %742 = vmatpush1.msra.mxu0 %v289_v2  ;;  %v285_v6 = vld [vmem:[%s4091_s4 + $0x1c0] sm:$0xff] }
  0x10   :  { %v414_v5 = vld [vmem:[%s4091_s4 + $0x5c8] sm:$0xff]  ;;  %813 = vmatpush1.msra.mxu1 %v417_v3  ;;  %v413_v7 = vld [vmem:[%s4091_s4 + $0x5c0] sm:$0xff]  ;;  %743 = vmatprep.subr.mxu0 %v286_v4 }
  0x11   :  { %v282_v8 = vld [vmem:[%s4091_s4 + $0x1a8] sm:$0xff]  ;;  %814 = vmatprep.subr.mxu1 %v414_v5  ;;  %v281_v10 = vld [vmem:[%s4091_s4 + $0x1a0] sm:$0xff]  ;;  %744 = vmatpush1.msra.mxu0 %v285_v6 }
  0x12   :  { %v410_v9 = vld [vmem:[%s4091_s4 + $0x5a8] sm:$0xff]  ;;  %v409_v11 = vld [vmem:[%s4091_s4 + $0x5a0] sm:$0xff]  ;;  %815 = vmatpush1.msra.mxu1 %v413_v7  ;;  %745 = vmatprep.subr.mxu0 %v282_v8  ;;  %v75_v8 = vlaneseq }
  0x13   :  { %v278_v12 = vld [vmem:[%s4091_s4 + $0x188] sm:$0xff]  ;;  %816 = vmatprep.subr.mxu1 %v410_v9  ;;  %v277_v14 = vld [vmem:[%s4091_s4 + $0x180] sm:$0xff]  ;;  %746 = vmatpush1.msra.mxu0 %v281_v10 }
  0x14   :  { %v406_v13 = vld [vmem:[%s4091_s4 + $0x588] sm:$0xff]  ;;  %v405_v15 = vld [vmem:[%s4091_s4 + $0x580] sm:$0xff]  ;;  %817 = vmatpush1.msra.mxu1 %v409_v11  ;;  %747 = vmatprep.subr.mxu0 %v278_v12 }
  0x15   :  { %v274_v16 = vld [vmem:[%s4091_s4 + $0x168] sm:$0xff]  ;;  %818 = vmatprep.subr.mxu1 %v406_v13  ;;  %v273_v18 = vld [vmem:[%s4091_s4 + $0x160] sm:$0xff]  ;;  %748 = vmatpush1.msra.mxu0 %v277_v14 }
  0x16   :  { %v402_v17 = vld [vmem:[%s4091_s4 + $0x568] sm:$0xff]  ;;  %v401_v19 = vld [vmem:[%s4091_s4 + $0x560] sm:$0xff]  ;;  %819 = vmatpush1.msra.mxu1 %v405_v15  ;;  %749 = vmatprep.subr.mxu0 %v274_v16 }
  0x17   :  { %v270_v20 = vld [vmem:[%s4091_s4 + $0x148] sm:$0xff]  ;;  %820 = vmatprep.subr.mxu1 %v402_v17  ;;  %v269_v22 = vld [vmem:[%s4091_s4 + $0x140] sm:$0xff]  ;;  %750 = vmatpush1.msra.mxu0 %v273_v18  ;;  %v2381_v17 = vshrl.u32 %v75_v8, 7 }
  0x18   :  { %v398_v21 = vld [vmem:[%s4091_s4 + $0x548] sm:$0xff]  ;;  %v397_v23 = vld [vmem:[%s4091_s4 + $0x540] sm:$0xff]  ;;  %821 = vmatpush1.msra.mxu1 %v401_v19  ;;  %751 = vmatprep.subr.mxu0 %v270_v20 }
  0x19   :  { %v266_v24 = vld [vmem:[%s4091_s4 + $0x128] sm:$0xff]  ;;  %822 = vmatprep.subr.mxu1 %v398_v21  ;;  %v265_v26 = vld [vmem:[%s4091_s4 + $0x120] sm:$0xff]  ;;  %752 = vmatpush1.msra.mxu0 %v269_v22 }
  0x1a   :  { %v394_v25 = vld [vmem:[%s4091_s4 + $0x528] sm:$0xff]  ;;  %v393_v27 = vld [vmem:[%s4091_s4 + $0x520] sm:$0xff]  ;;  %823 = vmatpush1.msra.mxu1 %v397_v23  ;;  %753 = vmatprep.subr.mxu0 %v266_v24 }
  0x1b   :  { %v262_v28 = vld [vmem:[%s4091_s4 + $0x108] sm:$0xff]  ;;  %824 = vmatprep.subr.mxu1 %v394_v25  ;;  %v261_v30 = vld [vmem:[%s4091_s4 + $0x100] sm:$0xff]  ;;  %754 = vmatpush1.msra.mxu0 %v265_v26 }
  0x1c   :  { %v390_v29 = vld [vmem:[%s4091_s4 + $0x508] sm:$0xff]  ;;  %v389_v31 = vld [vmem:[%s4091_s4 + $0x500] sm:$0xff]  ;;  %825 = vmatpush1.msra.mxu1 %v393_v27  ;;  %755 = vmatprep.subr.mxu0 %v262_v28  ;;  %v2411_v27 = vsub.s32 1, %v2381_v17  ;;  %v2414_v28 = vsub.s32 3, %v2381_v17 }
  0x1d   :  { %v258_v32 = vld [vmem:[%s4091_s4 + $0xe8] sm:$0xff]  ;;  %826 = vmatprep.subr.mxu1 %v390_v29  ;;  %v257_v34 = vld [vmem:[%s4091_s4 + $0xe0] sm:$0xff]  ;;  %756 = vmatpush1.msra.mxu0 %v261_v30  ;;  %v2417_v29 = vsub.s32 0, %v2381_v17 }
  0x1e   :  { %v386_v33 = vld [vmem:[%s4091_s4 + $0x4e8] sm:$0xff]  ;;  %v385_v35 = vld [vmem:[%s4091_s4 + $0x4e0] sm:$0xff]  ;;  %827 = vmatpush1.msra.mxu1 %v389_v31  ;;  %757 = vmatprep.subr.mxu0 %v258_v32 }
  0x1f   :  { %v254_v36 = vld [vmem:[%s4091_s4 + $0xc8] sm:$0xff]  ;;  %828 = vmatprep.subr.mxu1 %v386_v33  ;;  %v253_v38 = vld [vmem:[%s4091_s4 + $0xc0] sm:$0xff]  ;;  %758 = vmatpush1.msra.mxu0 %v257_v34  ;;  %v2431_v33 = vsub.s32 2, %v2381_v17 }
  0x20   :  { %v382_v37 = vld [vmem:[%s4091_s4 + $0x4c8] sm:$0xff]  ;;  %v381_v39 = vld [vmem:[%s4091_s4 + $0x4c0] sm:$0xff]  ;;  %829 = vmatpush1.msra.mxu1 %v385_v35  ;;  %759 = vmatprep.subr.mxu0 %v254_v36 }
  0x21   :  { %v250_v40 = vld [vmem:[%s4091_s4 + $0xa8] sm:$0xff]  ;;  %830 = vmatprep.subr.mxu1 %v382_v37  ;;  %v249_v42 = vld [vmem:[%s4091_s4 + $0xa0] sm:$0xff]  ;;  %760 = vmatpush1.msra.mxu0 %v253_v38 }
  0x22   :  { %v378_v41 = vld [vmem:[%s4091_s4 + $0x4a8] sm:$0xff]  ;;  %v377_v43 = vld [vmem:[%s4091_s4 + $0x4a0] sm:$0xff]  ;;  %831 = vmatpush1.msra.mxu1 %v381_v39  ;;  %761 = vmatprep.subr.mxu0 %v250_v40  ;;  %v2071_v40 = vmov 0  }
  0x23   :  { %v246_v44 = vld [vmem:[%s4091_s4 + $0x88] sm:$0xff]  ;;  %832 = vmatprep.subr.mxu1 %v378_v41  ;;  %v245_v46 = vld [vmem:[%s4091_s4 + $0x80] sm:$0xff]  ;;  %762 = vmatpush1.msra.mxu0 %v249_v42 }
  0x24   :  { %v374_v45 = vld [vmem:[%s4091_s4 + $0x488] sm:$0xff]  ;;  %v373_v47 = vld [vmem:[%s4091_s4 + $0x480] sm:$0xff]  ;;  %833 = vmatpush1.msra.mxu1 %v377_v43  ;;  %763 = vmatprep.subr.mxu0 %v246_v44 }
  0x25   :  { %v242_v48 = vld [vmem:[%s4091_s4 + $0x68] sm:$0xff]  ;;  %834 = vmatprep.subr.mxu1 %v374_v45  ;;  %v241_v50 = vld [vmem:[%s4091_s4 + $0x60] sm:$0xff]  ;;  %764 = vmatpush1.msra.mxu0 %v245_v46 }
  0x26   :  { %v370_v49 = vld [vmem:[%s4091_s4 + $0x468] sm:$0xff]  ;;  %v369_v51 = vld [vmem:[%s4091_s4 + $0x460] sm:$0xff]  ;;  %835 = vmatpush1.msra.mxu1 %v373_v47  ;;  %765 = vmatprep.subr.mxu0 %v242_v48 }
  0x27   :  { %v238_v52 = vld [vmem:[%s4091_s4 + $0x48] sm:$0xff]  ;;  %836 = vmatprep.subr.mxu1 %v370_v49  ;;  %v237_v54 = vld [vmem:[%s4091_s4 + $0x40] sm:$0xff]  ;;  %766 = vmatpush1.msra.mxu0 %v241_v50 }
  0x28   :  { %v366_v53 = vld [vmem:[%s4091_s4 + $0x448] sm:$0xff]  ;;  %v365_v55 = vld [vmem:[%s4091_s4 + $0x440] sm:$0xff]  ;;  %837 = vmatpush1.msra.mxu1 %v369_v51  ;;  %767 = vmatprep.subr.mxu0 %v238_v52 }
  0x29   :  { %v234_v56 = vld [vmem:[%s4091_s4 + $0x28] sm:$0xff]  ;;  %838 = vmatprep.subr.mxu1 %v366_v53  ;;  %v233_v58 = vld [vmem:[%s4091_s4 + $0x20] sm:$0xff]  ;;  %768 = vmatpush1.msra.mxu0 %v237_v54  ;;  %v61_v54 = vld [vmem:[%s4087_s0 + $0x18] sm:$0xff] }
  0x2a   :  { %v362_v57 = vld [vmem:[%s4091_s4 + $0x428] sm:$0xff]  ;;  %v361_v59 = vld [vmem:[%s4091_s4 + $0x420] sm:$0xff]  ;;  %839 = vmatpush1.msra.mxu1 %v365_v55  ;;  %769 = vmatprep.subr.mxu0 %v234_v56  ;;  %v69_v55 = vld [vmem:[%s4088_s1 + $0x18] sm:$0xff] }
  0x2b   :  { %v230_v60 = vld [vmem:[%s4091_s4 + $0x8] sm:$0xff]  ;;  %840 = vmatprep.subr.mxu1 %v362_v57  ;;  %v229_v62 = vld [vmem:[%s4091_s4] sm:$0xff]  ;;  %770 = vmatpush1.msra.mxu0 %v233_v58 }
  0x2c   :  { %v358_v61 = vld [vmem:[%s4091_s4 + $0x408] sm:$0xff]  ;;  %v357_v63 = vld [vmem:[%s4091_s4 + $0x400] sm:$0xff]  ;;  %841 = vmatpush1.msra.mxu1 %v361_v59  ;;  %771 = vmatprep.subr.mxu0 %v230_v60 }
  0x2d   :  { %v354_v0 = vld [vmem:[%s4091_s4 + $0x3e8] sm:$0xff]  ;;  %842 = vmatprep.subr.mxu1 %v358_v61  ;;  %v353_v2 = vld [vmem:[%s4091_s4 + $0x3e0] sm:$0xff]  ;;  %772 = vmatpush1.msra.mxu0 %v229_v62  ;;  %v60_v61 = vld [vmem:[%s4087_s0 + $0x10] sm:$0xff] }
  0x2e   :  { %v482_v1 = vld [vmem:[%s4091_s4 + $0x7e8] sm:$0xff]  ;;  %v481_v3 = vld [vmem:[%s4091_s4 + $0x7e0] sm:$0xff]  ;;  %843 = vmatpush1.msra.mxu1 %v357_v63  ;;  %773 = vmatprep.subr.mxu0 %v354_v0  ;;  %v68_v62 = vld [vmem:[%s4088_s1 + $0x10] sm:$0xff] }
  0x2f   :  { %v350_v4 = vld [vmem:[%s4091_s4 + $0x3c8] sm:$0xff]  ;;  %844 = vmatprep.subr.mxu1 %v482_v1  ;;  %v349_v6 = vld [vmem:[%s4091_s4 + $0x3c0] sm:$0xff]  ;;  %774 = vmatpush2.msra.mxu0 %v353_v2 }
  0x30   :  { %v478_v5 = vld [vmem:[%s4091_s4 + $0x7c8] sm:$0xff]  ;;  %v477_v7 = vld [vmem:[%s4091_s4 + $0x7c0] sm:$0xff]  ;;  %845 = vmatpush2.msra.mxu1 %v481_v3  ;;  %775 = vmatprep.subr.mxu0 %v350_v4 }
  0x31   :  { %v346_v9 = vld [vmem:[%s4091_s4 + $0x3a8] sm:$0xff]  ;;  %846 = vmatprep.subr.mxu1 %v478_v5  ;;  %v345_v11 = vld [vmem:[%s4091_s4 + $0x3a0] sm:$0xff]  ;;  %776 = vmatpush2.msra.mxu0 %v349_v6 }
  0x32   :  { %v474_v10 = vld [vmem:[%s4091_s4 + $0x7a8] sm:$0xff]  ;;  %v473_v12 = vld [vmem:[%s4091_s4 + $0x7a0] sm:$0xff]  ;;  %847 = vmatpush2.msra.mxu1 %v477_v7  ;;  %777 = vmatprep.subr.mxu0 %v346_v9 }
  0x33   :  { %v342_v13 = vld [vmem:[%s4091_s4 + $0x388] sm:$0xff]  ;;  %848 = vmatprep.subr.mxu1 %v474_v10  ;;  %v341_v15 = vld [vmem:[%s4091_s4 + $0x380] sm:$0xff]  ;;  %778 = vmatpush2.msra.mxu0 %v345_v11 }
  0x34   :  { %v470_v14 = vld [vmem:[%s4091_s4 + $0x788] sm:$0xff]  ;;  %v469_v16 = vld [vmem:[%s4091_s4 + $0x780] sm:$0xff]  ;;  %849 = vmatpush2.msra.mxu1 %v473_v12  ;;  %779 = vmatprep.subr.mxu0 %v342_v13 }
  0x35   :  { %v338_v18 = vld [vmem:[%s4091_s4 + $0x368] sm:$0xff]  ;;  %850 = vmatprep.subr.mxu1 %v470_v14  ;;  %v337_v20 = vld [vmem:[%s4091_s4 + $0x360] sm:$0xff]  ;;  %780 = vmatpush2.msra.mxu0 %v341_v15 }
  0x36   :  { %v466_v19 = vld [vmem:[%s4091_s4 + $0x768] sm:$0xff]  ;;  %v465_v21 = vld [vmem:[%s4091_s4 + $0x760] sm:$0xff]  ;;  %851 = vmatpush2.msra.mxu1 %v469_v16  ;;  %781 = vmatprep.subr.mxu0 %v338_v18 }
  0x37   :  { %v334_v22 = vld [vmem:[%s4091_s4 + $0x348] sm:$0xff]  ;;  %852 = vmatprep.subr.mxu1 %v466_v19  ;;  %v333_v24 = vld [vmem:[%s4091_s4 + $0x340] sm:$0xff]  ;;  %782 = vmatpush2.msra.mxu0 %v337_v20 }
  0x38   :  { %v462_v23 = vld [vmem:[%s4091_s4 + $0x748] sm:$0xff]  ;;  %v461_v25 = vld [vmem:[%s4091_s4 + $0x740] sm:$0xff]  ;;  %853 = vmatpush2.msra.mxu1 %v465_v21  ;;  %783 = vmatprep.subr.mxu0 %v334_v22 }
  0x39   :  { %v330_v26 = vld [vmem:[%s4091_s4 + $0x328] sm:$0xff]  ;;  %v329_v31 = vld [vmem:[%s4091_s4 + $0x320] sm:$0xff]  ;;  %854 = vmatprep.subr.mxu1 %v462_v23  ;;  %784 = vmatpush2.msra.mxu0 %v333_v24 }
  0x3a   :  { %v458_v30 = vld [vmem:[%s4091_s4 + $0x728] sm:$0xff]  ;;  %v2428_v32 = vld [vmem:[%s4089_s2] sm:$0xff]  ;;  %855 = vmatpush2.msra.mxu1 %v461_v25  ;;  %785 = vmatprep.subr.mxu0 %v330_v26 }
  0x3b   :  { %v457_v34 = vld [vmem:[%s4091_s4 + $0x720] sm:$0xff]  ;;  %v326_v35 = vld [vmem:[%s4091_s4 + $0x308] sm:$0xff]  ;;  %vm57_vm0 = vcmp.ge.f32.partialorder %v2428_v32, 0.0  ;;  %856 = vmatprep.subr.mxu1 %v458_v30  ;;  %786 = vmatpush2.msra.mxu0 %v329_v31  ;;  %v131_v58 = vrot.slane %v2428_v32, %v2411_v27  ;;  %v139_v4 = vrot.slane %v2428_v32, %v2414_v28  ;;  %v127_v8 = vrot.slane %v2428_v32, %v2417_v29 }
  0x3c   :  { %v454_v36 = vld [vmem:[%s4091_s4 + $0x708] sm:$0xff]  ;;  %v325_v37 = vld [vmem:[%s4091_s4 + $0x300] sm:$0xff]  ;;  %v2452_v41 = vsel %vm57_vm0, 1, %v2071_v40  ;;  %857 = vmatpush2.msra.mxu1 %v457_v34  ;;  %787 = vmatprep.subr.mxu0 %v326_v35  ;;  %v135_v9 = vrot.slane %v2428_v32, %v2431_v33 }
  0x3d   :  { %v453_v38 = vld [vmem:[%s4091_s4 + $0x700] sm:$0xff]  ;;  %v322_v39 = vld [vmem:[%s4091_s4 + $0x2e8] sm:$0xff]  ;;  %v82_v45 = vrot.slane %v2452_v41, %v2411_v27  ;;  %v90_v46 = vrot.slane %v2452_v41, %v2414_v28  ;;  %v78_v47 = vrot.slane %v2452_v41, %v2417_v29  ;;  %v86_v52 = vrot.slane %v2452_v41, %v2431_v33  ;;  %858 = vmatprep.subr.mxu1 %v454_v36 }
  0x3e   :  { %v450_v42 = vld [vmem:[%s4091_s4 + $0x6e8] sm:$0xff]  ;;  %v321_v43 = vld [vmem:[%s4091_s4 + $0x2e0] sm:$0xff]  ;;  %788 = vmatpush2.msra.mxu0 %v325_v37  ;;  %859 = vmatpush2.msra.mxu1 %v453_v38 }
  0x3f   :  { %v449_v44 = vld [vmem:[%s4091_s4 + $0x6e0] sm:$0xff]  ;;  %v318_v48 = vld [vmem:[%s4091_s4 + $0x2c8] sm:$0xff]  ;;  %vm2483_vm1 = vcmp.eq.s32.totalorder %v82_v45, 1  ;;  %vm2493_vm2 = vcmp.eq.s32.totalorder %v90_v46, 1  ;;  %vm2505_vm3 = vcmp.eq.s32.totalorder %v78_v47, 1  ;;  %vm2515_vm4 = vcmp.eq.s32.totalorder %v86_v52, 1  ;;  %789 = vmatprep.subr.mxu0 %v322_v39  ;;  %860 = vmatprep.subr.mxu1 %v450_v42 }
  0x40   :  { %v446_v49 = vld [vmem:[%s4091_s4 + $0x6c8] sm:$0xff]  ;;  %v58_v57 = vld [vmem:[%s4087_s0] sm:$0xff]  ;;  %790 = vmatpush2.msra.mxu0 %v321_v43  ;;  %861 = vmatpush2.msra.mxu1 %v449_v44  ;;  %v118_v7 = vsel %vm2493_vm2, %v61_v54, %v69_v55  ;;  %v117_v13 = vsel %vm2515_vm4, %v60_v61, %v68_v62 }
  0x41   :  { %v59_v50 = vld [vmem:[%s4087_s0 + $0x8] sm:$0xff]  ;;  %v66_v59 = vld [vmem:[%s4088_s1] sm:$0xff]  ;;  %791 = vmatprep.subr.mxu0 %v318_v48  ;;  %862 = vmatprep.subr.mxu1 %v446_v49  ;;  %v167_v21 = vmul.f32 %v139_v4, %v118_v7  ;;  %v166_v30 = vmul.f32 %v135_v9, %v117_v13 }
  0x42   :  { %v67_v51 = vld [vmem:[%s4088_s1 + $0x8] sm:$0xff]  ;;  %v317_v0 = vld [vmem:[%s4091_s4 + $0x2c0] sm:$0xff]  ;;  %v115_v12 = vsel %vm2505_vm3, %v58_v57, %v66_v59 }
  0x43   :  { %v445_v1 = vld [vmem:[%s4091_s4 + $0x6c0] sm:$0xff]  ;;  %v116_v3 = vsel %vm2483_vm1, %v59_v50, %v67_v51  ;;  %v314_v5 = vld [vmem:[%s4091_s4 + $0x2a8] sm:$0xff]  ;;  %792 = vmatpush2.msra.mxu0 %v317_v0  ;;  %v164_v26 = vmul.f32 %v127_v8, %v115_v12 }
  0x44   :  { %v2528_v2 = vld [vmem:[%s4090_s3] sm:$0xff]  ;;  %v442_v6 = vld [vmem:[%s4091_s4 + $0x6a8] sm:$0xff]  ;;  %863 = vmatpush2.msra.mxu1 %v445_v1  ;;  %v165_v16 = vmul.f32 %v131_v58, %v116_v3  ;;  %793 = vmatprep.subr.mxu0 %v314_v5 }
  0x45   :  { %v313_v10 = vld [vmem:[%s4091_s4 + $0x2a0] sm:$0xff]  ;;  %v310_v14 = vld [vmem:[%s4091_s4 + $0x288] sm:$0xff]  ;;  %v180_v18 = vrot.slane %v2528_v2, %v2411_v27  ;;  %864 = vmatprep.subr.mxu1 %v442_v6  ;;  %v188_v22 = vrot.slane %v2528_v2, %v2414_v28  ;;  %v176_v23 = vrot.slane %v2528_v2, %v2417_v29  ;;  %v184_v31 = vrot.slane %v2528_v2, %v2431_v33 }
  0x46   :  { %v441_v11 = vld [vmem:[%s4091_s4 + $0x6a0] sm:$0xff]  ;;  %v438_v15 = vld [vmem:[%s4091_s4 + $0x688] sm:$0xff]  ;;  %794 = vmatpush2.msra.mxu0 %v313_v10 }
  0x47   :  { %v309_v19 = vld [vmem:[%s4091_s4 + $0x280] sm:$0xff]  ;;  %865 = vmatpush2.msra.mxu1 %v441_v11  ;;  %v306_v24 = vld [vmem:[%s4091_s4 + $0x268] sm:$0xff]  ;;  %795 = vmatprep.subr.mxu0 %v310_v14  ;;  %v2594_v38 = vadd.f32 %v180_v18, %v165_v16  ;;  %v2602_v42 = vadd.f32 %v188_v22, %v167_v21  ;;  %v2610_v45 = vadd.f32 %v176_v23, %v164_v26 }
  0x48   :  { %v437_v20 = vld [vmem:[%s4091_s4 + $0x680] sm:$0xff]  ;;  %v434_v25 = vld [vmem:[%s4091_s4 + $0x668] sm:$0xff]  ;;  %866 = vmatprep.subr.mxu1 %v438_v15  ;;  %796 = vmatpush2.msra.mxu0 %v309_v19  ;;  %v2612_v46 = vadd.f32 %v184_v31, %v166_v30  ;;  %v2744_v31 = vsub.s32 4, %v2381_v17 }
  0x49   :  { %v305_v34 = vld [vmem:[%s4091_s4 + $0x260] sm:$0xff]  ;;  %867 = vmatpush2.msra.mxu1 %v437_v20  ;;  %v302_v36 = vld [vmem:[%s4091_s4 + $0x248] sm:$0xff]  ;;  %797 = vmatprep.subr.mxu0 %v306_v24  ;;  %v222_v51 = vmax.f32 %v2594_v38, 0.0  ;;  %v224_v53 = vmax.f32 %v2602_v42, 0.0  ;;  %v221_v55 = vmax.f32 %v2610_v45, 0.0  ;;  %v675_v38 = vld [vmem:[%s4091_s4 + $0xdf0] sm:$0xff] }
  0x4a   :  { %v433_v35 = vld [vmem:[%s4091_s4 + $0x660] sm:$0xff]  ;;  %v430_v37 = vld [vmem:[%s4091_s4 + $0x648] sm:$0xff]  ;;  %868 = vmatprep.subr.mxu1 %v434_v25  ;;  %798 = vmatpush2.msra.mxu0 %v305_v34  ;;  %v223_v56 = vmax.f32 %v2612_v46, 0.0  ;;  %v2735_v25 = vsub.s32 5, %v2381_v17  ;;  %v672_v42 = vld [vmem:[%s4091_s4 + $0xdd8] sm:$0xff] }
  0x4b   :  { %v301_v39 = vld [vmem:[%s4091_s4 + $0x240] sm:$0xff]  ;;  %869 = vmatpush2.msra.mxu1 %v433_v35  ;;  %v298_v43 = vld [vmem:[%s4091_s4 + $0x228] sm:$0xff]  ;;  %799 = vmatprep.subr.mxu0 %v302_v36  ;;  %v2753_v36 = vsub.s32 7, %v2381_v17  ;;  %v671_v45 = vld [vmem:[%s4091_s4 + $0xdd0] sm:$0xff] }
  0x4c   :  { %v429_v40 = vld [vmem:[%s4091_s4 + $0x640] sm:$0xff]  ;;  %v426_v44 = vld [vmem:[%s4091_s4 + $0x628] sm:$0xff]  ;;  %870 = vmatprep.subr.mxu1 %v430_v37  ;;  %800 = vmatpush2.msra.mxu0 %v301_v39  ;;  %v540_v46 = vld [vmem:[%s4091_s4 + $0x9b8] sm:$0xff] }
  0x4d   :  { %v297_v47 = vld [vmem:[%s4091_s4 + $0x220] sm:$0xff]  ;;  %871 = vmatpush2.msra.mxu1 %v429_v40  ;;  %v294_v49 = vld [vmem:[%s4091_s4 + $0x208] sm:$0xff]  ;;  %801 = vmatprep.subr.mxu0 %v298_v43  ;;  %v2762_v40 = vsub.s32 6, %v2381_v17 }
  0x4e   :  { %v425_v48 = vld [vmem:[%s4091_s4 + $0x620] sm:$0xff]  ;;  %v422_v50 = vld [vmem:[%s4091_s4 + $0x608] sm:$0xff]  ;;  %872 = vmatprep.subr.mxu1 %v426_v44  ;;  %802 = vmatpush2.msra.mxu0 %v297_v47  ;;  %v98_v47 = vrot.slane %v2452_v41, %v2735_v25 }
  0x4f   :  { %v293_v52 = vld [vmem:[%s4091_s4 + $0x200] sm:$0xff]  ;;  %873 = vmatpush2.msra.mxu1 %v425_v48  ;;  %803 = vmatprep.subr.mxu0 %v294_v49  ;;  %v546_v57 = vld [vmem:[%s4091_s4 + $0x9e8] sm:$0xff] }
  0x50   :  { %v421_v54 = vld [vmem:[%s4091_s4 + $0x600] sm:$0xff]  ;;  %874 = vmatprep.subr.mxu1 %v422_v50  ;;  %804 = vmatpush2.msra.mxu0 %v293_v52  ;;  %v674_v58 = vld [vmem:[%s4091_s4 + $0xde8] sm:$0xff]  ;;  %v94_v50 = vrot.slane %v2452_v41, %v2744_v31  ;;  %vm2811_vm5 = vcmp.eq.s32.totalorder %v98_v47, 1 }
  0x51   :  { %805 = vmatprep.mubr.f32.mxu0 %v222_v51  ;;  %875 = vmatpush2.msra.mxu1 %v421_v54  ;;  %v545_v59 = vld [vmem:[%s4091_s4 + $0x9e0] sm:$0xff]  ;;  %v542_v61 = vld [vmem:[%s4091_s4 + $0x9c8] sm:$0xff] }
  0x52   :  { %876 = vmatprep.mubr.f32.mxu1 %v224_v53  ;;  %v673_v60 = vld [vmem:[%s4091_s4 + $0xde0] sm:$0xff]  ;;  %806 = vmatmul.mubr.f32.vlgmr.msra.gmra.mxu0 %v221_v55  ;;  %v670_v62 = vld [vmem:[%s4091_s4 + $0xdc8] sm:$0xff]  ;;  %vm2826_vm6 = vcmp.eq.s32.totalorder %v94_v50, 1 }
  0x53   :  { %877 = vmatmul.mubr.f32.vlgmr.msra.gmra.mxu1 %v223_v56  ;;  %883 = vmatprep.subr.mxu0 %v546_v57  ;;  %v541_v63 = vld [vmem:[%s4091_s4 + $0x9c0] sm:$0xff]  ;;  %v538_v1 = vld [vmem:[%s4091_s4 + $0x9a8] sm:$0xff] }
  0x54   :  { %954 = vmatprep.subr.mxu1 %v674_v58  ;;  %v669_v0 = vld [vmem:[%s4091_s4 + $0xdc0] sm:$0xff]  ;;  %884 = vmatpush1.msra.mxu0 %v545_v59  ;;  %v666_v3 = vld [vmem:[%s4091_s4 + $0xda8] sm:$0xff]  ;;  %v106_v58 = vrot.slane %v2452_v41, %v2753_v36 }
  0x55   :  { %955 = vmatpush1.msra.mxu1 %v673_v60  ;;  %885 = vmatprep.subr.mxu0 %v542_v61  ;;  %v537_v4 = vld [vmem:[%s4091_s4 + $0x9a0] sm:$0xff]  ;;  %v534_v6 = vld [vmem:[%s4091_s4 + $0x988] sm:$0xff] }
  0x56   :  { %956 = vmatprep.subr.mxu1 %v670_v62  ;;  %v665_v5 = vld [vmem:[%s4091_s4 + $0xda0] sm:$0xff]  ;;  %886 = vmatpush1.msra.mxu0 %v541_v63  ;;  %v662_v7 = vld [vmem:[%s4091_s4 + $0xd88] sm:$0xff]  ;;  %v102_v62 = vrot.slane %v2452_v41, %v2762_v40  ;;  %v147_v41 = vrot.slane %v2428_v32, %v2735_v25  ;;  %vm2843_vm7 = vcmp.eq.s32.totalorder %v106_v58, 1 }
  0x57   :  { %957 = vmatpush1.msra.mxu1 %v669_v0  ;;  %887 = vmatprep.subr.mxu0 %v538_v1  ;;  %v533_v8 = vld [vmem:[%s4091_s4 + $0x980] sm:$0xff]  ;;  %v530_v10 = vld [vmem:[%s4091_s4 + $0x968] sm:$0xff] }
  0x58   :  { %958 = vmatprep.subr.mxu1 %v666_v3  ;;  %v661_v9 = vld [vmem:[%s4091_s4 + $0xd80] sm:$0xff]  ;;  %888 = vmatpush1.msra.mxu0 %v537_v4  ;;  %v658_v11 = vld [vmem:[%s4091_s4 + $0xd68] sm:$0xff]  ;;  %vm2862_vm8 = vcmp.eq.s32.totalorder %v102_v62, 1 }
  0x59   :  { %959 = vmatpush1.msra.mxu1 %v665_v5  ;;  %889 = vmatprep.subr.mxu0 %v534_v6  ;;  %v529_v12 = vld [vmem:[%s4091_s4 + $0x960] sm:$0xff]  ;;  %v526_v14 = vld [vmem:[%s4091_s4 + $0x948] sm:$0xff] }
  0x5a   :  { %960 = vmatprep.subr.mxu1 %v662_v7  ;;  %v657_v13 = vld [vmem:[%s4091_s4 + $0xd60] sm:$0xff]  ;;  %890 = vmatpush1.msra.mxu0 %v533_v8  ;;  %v654_v15 = vld [vmem:[%s4091_s4 + $0xd48] sm:$0xff]  ;;  %v143_v8 = vrot.slane %v2428_v32, %v2744_v31 }
  0x5b   :  { %961 = vmatpush1.msra.mxu1 %v661_v9  ;;  %891 = vmatprep.subr.mxu0 %v530_v10  ;;  %v525_v16 = vld [vmem:[%s4091_s4 + $0x940] sm:$0xff]  ;;  %v522_v19 = vld [vmem:[%s4091_s4 + $0x928] sm:$0xff] }
  0x5c   :  { %962 = vmatprep.subr.mxu1 %v658_v11  ;;  %v653_v18 = vld [vmem:[%s4091_s4 + $0xd40] sm:$0xff]  ;;  %892 = vmatpush1.msra.mxu0 %v529_v12  ;;  %v650_v20 = vld [vmem:[%s4091_s4 + $0xd28] sm:$0xff]  ;;  %v196_v12 = vrot.slane %v2528_v2, %v2735_v25 }
  0x5d   :  { %963 = vmatpush1.msra.mxu1 %v657_v13  ;;  %893 = vmatprep.subr.mxu0 %v526_v14  ;;  %v521_v21 = vld [vmem:[%s4091_s4 + $0x920] sm:$0xff]  ;;  %v518_v23 = vld [vmem:[%s4091_s4 + $0x908] sm:$0xff]  ;;  %v155_v14 = vrot.slane %v2428_v32, %v2753_v36 }
  0x5e   :  { %964 = vmatprep.subr.mxu1 %v654_v15  ;;  %v649_v22 = vld [vmem:[%s4091_s4 + $0xd20] sm:$0xff]  ;;  %894 = vmatpush1.msra.mxu0 %v525_v16  ;;  %v646_v24 = vld [vmem:[%s4091_s4 + $0xd08] sm:$0xff] }
  0x5f   :  { %965 = vmatpush1.msra.mxu1 %v653_v18  ;;  %895 = vmatprep.subr.mxu0 %v522_v19  ;;  %v517_v26 = vld [vmem:[%s4091_s4 + $0x900] sm:$0xff]  ;;  %v514_v34 = vld [vmem:[%s4091_s4 + $0x8e8] sm:$0xff] }
  0x60   :  { %966 = vmatprep.subr.mxu1 %v650_v20  ;;  %v645_v30 = vld [vmem:[%s4091_s4 + $0xd00] sm:$0xff]  ;;  %896 = vmatpush1.msra.mxu0 %v521_v21  ;;  %v642_v35 = vld [vmem:[%s4091_s4 + $0xce8] sm:$0xff]  ;;  %v192_v20 = vrot.slane %v2528_v2, %v2744_v31 }
  0x61   :  { %967 = vmatpush1.msra.mxu1 %v649_v22  ;;  %897 = vmatprep.subr.mxu0 %v518_v23  ;;  %v513_v37 = vld [vmem:[%s4091_s4 + $0x8e0] sm:$0xff]  ;;  %v510_v43 = vld [vmem:[%s4091_s4 + $0x8c8] sm:$0xff]  ;;  %v151_v22 = vrot.slane %v2428_v32, %v2762_v40  ;;  %v204_v32 = vrot.slane %v2528_v2, %v2753_v36  ;;  %v200_v36 = vrot.slane %v2528_v2, %v2762_v40 }
  0x62   :  { %968 = vmatprep.subr.mxu1 %v646_v24  ;;  %v641_v39 = vld [vmem:[%s4091_s4 + $0xce0] sm:$0xff]  ;;  %898 = vmatpush1.msra.mxu0 %v517_v26  ;;  %v638_v44 = vld [vmem:[%s4091_s4 + $0xcc8] sm:$0xff]  ;;  %v65_v26 = vld [vmem:[%s4087_s0 + $0x38] sm:$0xff] }
  0x63   :  { %969 = vmatpush1.msra.mxu1 %v645_v30  ;;  %899 = vmatprep.subr.mxu0 %v514_v34  ;;  %v509_v48 = vld [vmem:[%s4091_s4 + $0x8c0] sm:$0xff]  ;;  %v506_v52 = vld [vmem:[%s4091_s4 + $0x8a8] sm:$0xff]  ;;  %v73_v30 = vld [vmem:[%s4088_s1 + $0x38] sm:$0xff] }
  0x64   :  { %970 = vmatprep.subr.mxu1 %v642_v35  ;;  %v637_v49 = vld [vmem:[%s4091_s4 + $0xcc0] sm:$0xff]  ;;  %900 = vmatpush1.msra.mxu0 %v513_v37  ;;  %v634_v54 = vld [vmem:[%s4091_s4 + $0xca8] sm:$0xff]  ;;  %v122_v35 = vsel %vm2843_vm7, %v65_v26, %v73_v30  ;;  %v64_v37 = vld [vmem:[%s4087_s0 + $0x30] sm:$0xff] }
  0x65   :  { %971 = vmatpush1.msra.mxu1 %v641_v39  ;;  %v505_v57 = vld [vmem:[%s4091_s4 + $0x8a0] sm:$0xff]  ;;  %901 = vmatprep.subr.mxu0 %v510_v43  ;;  %v502_v60 = vld [vmem:[%s4091_s4 + $0x888] sm:$0xff]  ;;  %v72_v39 = vld [vmem:[%s4088_s1 + $0x30] sm:$0xff] }
  0x66   :  { %972 = vmatprep.subr.mxu1 %v638_v44  ;;  %v633_v59 = vld [vmem:[%s4091_s4 + $0xca0] sm:$0xff]  ;;  %v630_v61 = vld [vmem:[%s4091_s4 + $0xc88] sm:$0xff]  ;;  %902 = vmatpush1.msra.mxu0 %v509_v48  ;;  %v171_v48 = vmul.f32 %v155_v14, %v122_v35 }
  0x67   :  { %973 = vmatpush1.msra.mxu1 %v637_v49  ;;  %v501_v63 = vld [vmem:[%s4091_s4 + $0x880] sm:$0xff]  ;;  %v498_v1 = vld [vmem:[%s4091_s4 + $0x868] sm:$0xff]  ;;  %903 = vmatprep.subr.mxu0 %v506_v52  ;;  %v121_v49 = vsel %vm2862_vm8, %v64_v37, %v72_v39 }
  0x68   :  { %v629_v0 = vld [vmem:[%s4091_s4 + $0xc80] sm:$0xff]  ;;  %974 = vmatprep.subr.mxu1 %v634_v54  ;;  %v626_v4 = vld [vmem:[%s4091_s4 + $0xc68] sm:$0xff]  ;;  %904 = vmatpush1.msra.mxu0 %v505_v57  ;;  %v170_v52 = vmul.f32 %v151_v22, %v121_v49  ;;  %v2918_v58 = vadd.f32 %v204_v32, %v171_v48 }
  0x69   :  { %v497_v5 = vld [vmem:[%s4091_s4 + $0x860] sm:$0xff]  ;;  %975 = vmatpush1.msra.mxu1 %v633_v59  ;;  %v494_v9 = vld [vmem:[%s4091_s4 + $0x848] sm:$0xff]  ;;  %905 = vmatprep.subr.mxu0 %v502_v60 }
  0x6a   :  { %v625_v6 = vld [vmem:[%s4091_s4 + $0xc60] sm:$0xff]  ;;  %v63_v10 = vld [vmem:[%s4087_s0 + $0x28] sm:$0xff]  ;;  %976 = vmatprep.subr.mxu1 %v630_v61  ;;  %906 = vmatpush1.msra.mxu0 %v501_v63  ;;  %v2926_v61 = vadd.f32 %v200_v36, %v170_v52 }
  0x6b   :  { %v71_v11 = vld [vmem:[%s4088_s1 + $0x28] sm:$0xff]  ;;  %v62_v18 = vld [vmem:[%s4087_s0 + $0x20] sm:$0xff]  ;;  %977 = vmatpush1.msra.mxu1 %v629_v0  ;;  %907 = vmatprep.subr.mxu0 %v498_v1 }
  0x6c   :  { %v622_v15 = vld [vmem:[%s4091_s4 + $0xc48] sm:$0xff]  ;;  %v120_v16 = vsel %vm2811_vm5, %v63_v10, %v71_v11  ;;  %v70_v19 = vld [vmem:[%s4088_s1 + $0x20] sm:$0xff]  ;;  %978 = vmatprep.subr.mxu1 %v626_v4  ;;  %908 = vmatpush1.msra.mxu0 %v497_v5 }
  0x6d   :  { %v493_v23 = vld [vmem:[%s4091_s4 + $0x840] sm:$0xff]  ;;  %v169_v24 = vmul.f32 %v147_v41, %v120_v16  ;;  %v119_v25 = vsel %vm2826_vm6, %v62_v18, %v70_v19  ;;  %979 = vmatpush1.msra.mxu1 %v625_v6  ;;  %v490_v43 = vld [vmem:[%s4091_s4 + $0x828] sm:$0xff]  ;;  %909 = vmatprep.subr.mxu0 %v494_v9 }
  0x6e   :  { %v621_v31 = vld [vmem:[%s4091_s4 + $0xc40] sm:$0xff]  ;;  %v168_v34 = vmul.f32 %v143_v8, %v119_v25  ;;  %v618_v44 = vld [vmem:[%s4091_s4 + $0xc28] sm:$0xff]  ;;  %980 = vmatprep.subr.mxu1 %v622_v15  ;;  %910 = vmatpush1.msra.mxu0 %v493_v23 }
  0x6f   :  { %v2900_v47 = vadd.f32 %v196_v12, %v169_v24  ;;  %v489_v2 = vld [vmem:[%s4091_s4 + $0x820] sm:$0xff]  ;;  %981 = vmatpush1.msra.mxu1 %v621_v31  ;;  %v486_v54 = vld [vmem:[%s4091_s4 + $0x808] sm:$0xff]  ;;  %911 = vmatprep.subr.mxu0 %v490_v43 }
  0x70   :  { %v617_v40 = vld [vmem:[%s4091_s4 + $0xc20] sm:$0xff]  ;;  %v2910_v50 = vadd.f32 %v192_v20, %v168_v34  ;;  %v614_v57 = vld [vmem:[%s4091_s4 + $0xc08] sm:$0xff]  ;;  %982 = vmatprep.subr.mxu1 %v618_v44  ;;  %912 = vmatpush1.msra.mxu0 %v489_v2 }
  0x71   :  { %v485_v59 = vld [vmem:[%s4091_s4 + $0x800] sm:$0xff]  ;;  %983 = vmatpush1.msra.mxu1 %v617_v40  ;;  %v610_v62 = vld [vmem:[%s4091_s4 + $0xbe8] sm:$0xff]  ;;  %913 = vmatprep.subr.mxu0 %v486_v54 }
  0x72   :  { %v613_v60 = vld [vmem:[%s4091_s4 + $0xc00] sm:$0xff]  ;;  %v738_v63 = vld [vmem:[%s4091_s4 + $0xfe8] sm:$0xff]  ;;  %984 = vmatprep.subr.mxu1 %v614_v57  ;;  %914 = vmatpush1.msra.mxu0 %v485_v59 }
  0x73   :  { %v609_v0 = vld [vmem:[%s4091_s4 + $0xbe0] sm:$0xff]  ;;  %985 = vmatpush1.msra.mxu1 %v613_v60  ;;  %v606_v3 = vld [vmem:[%s4091_s4 + $0xbc8] sm:$0xff]  ;;  %915 = vmatprep.subr.mxu0 %v610_v62 }
  0x74   :  { %v737_v1 = vld [vmem:[%s4091_s4 + $0xfe0] sm:$0xff]  ;;  %v734_v41 = vld [vmem:[%s4091_s4 + $0xfc8] sm:$0xff]  ;;  %986 = vmatprep.subr.mxu1 %v738_v63  ;;  %916 = vmatpush2.msra.mxu0 %v609_v0 }
  0x75   :  { %v605_v4 = vld [vmem:[%s4091_s4 + $0xbc0] sm:$0xff]  ;;  %987 = vmatpush2.msra.mxu1 %v737_v1  ;;  %v602_v6 = vld [vmem:[%s4091_s4 + $0xba8] sm:$0xff]  ;;  %917 = vmatprep.subr.mxu0 %v606_v3 }
  0x76   :  { %v733_v5 = vld [vmem:[%s4091_s4 + $0xfc0] sm:$0xff]  ;;  %v730_v7 = vld [vmem:[%s4091_s4 + $0xfa8] sm:$0xff]  ;;  %988 = vmatprep.subr.mxu1 %v734_v41  ;;  %918 = vmatpush2.msra.mxu0 %v605_v4 }
  0x77   :  { %v601_v8 = vld [vmem:[%s4091_s4 + $0xba0] sm:$0xff]  ;;  %989 = vmatpush2.msra.mxu1 %v733_v5  ;;  %v598_v10 = vld [vmem:[%s4091_s4 + $0xb88] sm:$0xff]  ;;  %919 = vmatprep.subr.mxu0 %v602_v6 }
  0x78   :  { %v729_v9 = vld [vmem:[%s4091_s4 + $0xfa0] sm:$0xff]  ;;  %v726_v11 = vld [vmem:[%s4091_s4 + $0xf88] sm:$0xff]  ;;  %990 = vmatprep.subr.mxu1 %v730_v7  ;;  %920 = vmatpush2.msra.mxu0 %v601_v8 }
  0x79   :  { %v597_v12 = vld [vmem:[%s4091_s4 + $0xb80] sm:$0xff]  ;;  %991 = vmatpush2.msra.mxu1 %v729_v9  ;;  %v594_v14 = vld [vmem:[%s4091_s4 + $0xb68] sm:$0xff]  ;;  %921 = vmatprep.subr.mxu0 %v598_v10 }
  0x7a   :  { %v725_v13 = vld [vmem:[%s4091_s4 + $0xf80] sm:$0xff]  ;;  %v722_v15 = vld [vmem:[%s4091_s4 + $0xf68] sm:$0xff]  ;;  %992 = vmatprep.subr.mxu1 %v726_v11  ;;  %922 = vmatpush2.msra.mxu0 %v597_v12 }
  0x7b   :  { %v593_v16 = vld [vmem:[%s4091_s4 + $0xb60] sm:$0xff]  ;;  %993 = vmatpush2.msra.mxu1 %v725_v13  ;;  %v590_v19 = vld [vmem:[%s4091_s4 + $0xb48] sm:$0xff]  ;;  %923 = vmatprep.subr.mxu0 %v594_v14  ;;  %v226_v13 = vmax.f32 %v2900_v47, 0.0 }
  0x7c   :  { %v721_v18 = vld [vmem:[%s4091_s4 + $0xf60] sm:$0xff]  ;;  %v718_v20 = vld [vmem:[%s4091_s4 + $0xf48] sm:$0xff]  ;;  %994 = vmatprep.subr.mxu1 %v722_v15  ;;  %924 = vmatpush2.msra.mxu0 %v593_v16  ;;  %v225_v15 = vmax.f32 %v2910_v50, 0.0  ;;  %v1529_v50 = vld [vmem:[#allocation2 + $0xd8] sm:$0xff] }
  0x7d   :  { %v589_v21 = vld [vmem:[%s4091_s4 + $0xb40] sm:$0xff]  ;;  %995 = vmatpush2.msra.mxu1 %v721_v18  ;;  %v586_v23 = vld [vmem:[%s4091_s4 + $0xb28] sm:$0xff]  ;;  %925 = vmatprep.subr.mxu0 %v590_v19  ;;  %v228_v18 = vmax.f32 %v2918_v58, 0.0  ;;  %v292_v19 = vld [vmem:[%s4091_s4 + $0x1f8] sm:$0xff] }
  0x7e   :  { %v717_v22 = vld [vmem:[%s4091_s4 + $0xf40] sm:$0xff]  ;;  %v714_v24 = vld [vmem:[%s4091_s4 + $0xf28] sm:$0xff]  ;;  %996 = vmatprep.subr.mxu1 %v718_v20  ;;  %926 = vmatpush2.msra.mxu0 %v589_v21  ;;  %v227_v20 = vmax.f32 %v2926_v61, 0.0  ;;  %v420_v21 = vld [vmem:[%s4091_s4 + $0x5f8] sm:$0xff] }
  0x7f   :  { %v585_v25 = vld [vmem:[%s4091_s4 + $0xb20] sm:$0xff]  ;;  %997 = vmatpush2.msra.mxu1 %v717_v22  ;;  %v582_v30 = vld [vmem:[%s4091_s4 + $0xb08] sm:$0xff]  ;;  %927 = vmatprep.subr.mxu0 %v586_v23  ;;  %v291_v22 = vld [vmem:[%s4091_s4 + $0x1f0] sm:$0xff] }
  0x80   :  { %v713_v26 = vld [vmem:[%s4091_s4 + $0xf20] sm:$0xff]  ;;  %v710_v32 = vld [vmem:[%s4091_s4 + $0xf08] sm:$0xff]  ;;  %998 = vmatprep.subr.mxu1 %v714_v24  ;;  %928 = vmatpush2.msra.mxu0 %v585_v25  ;;  %v419_v23 = vld [vmem:[%s4091_s4 + $0x5f0] sm:$0xff] }
  0x81   :  { %v581_v31 = vld [vmem:[%s4091_s4 + $0xb00] sm:$0xff]  ;;  %999 = vmatpush2.msra.mxu1 %v713_v26  ;;  %v578_v35 = vld [vmem:[%s4091_s4 + $0xae8] sm:$0xff]  ;;  %929 = vmatprep.subr.mxu0 %v582_v30  ;;  %v288_v24 = vld [vmem:[%s4091_s4 + $0x1d8] sm:$0xff] }
  0x82   :  { %v709_v34 = vld [vmem:[%s4091_s4 + $0xf00] sm:$0xff]  ;;  %v706_v37 = vld [vmem:[%s4091_s4 + $0xee8] sm:$0xff]  ;;  %1000 = vmatprep.subr.mxu1 %v710_v32  ;;  %930 = vmatpush2.msra.mxu0 %v581_v31  ;;  %v416_v25 = vld [vmem:[%s4091_s4 + $0x5d8] sm:$0xff] }
  0x83   :  { %v577_v39 = vld [vmem:[%s4091_s4 + $0xae0] sm:$0xff]  ;;  %1001 = vmatpush2.msra.mxu1 %v709_v34  ;;  %v574_v43 = vld [vmem:[%s4091_s4 + $0xac8] sm:$0xff]  ;;  %931 = vmatprep.subr.mxu0 %v578_v35  ;;  %v287_v26 = vld [vmem:[%s4091_s4 + $0x1d0] sm:$0xff] }
  0x84   :  { %v705_v36 = vld [vmem:[%s4091_s4 + $0xee0] sm:$0xff]  ;;  %v702_v44 = vld [vmem:[%s4091_s4 + $0xec8] sm:$0xff]  ;;  %1002 = vmatprep.subr.mxu1 %v706_v37  ;;  %932 = vmatpush2.msra.mxu0 %v577_v39  ;;  %v415_v30 = vld [vmem:[%s4091_s4 + $0x5d0] sm:$0xff] }
  0x85   :  { %v573_v48 = vld [vmem:[%s4091_s4 + $0xac0] sm:$0xff]  ;;  %1003 = vmatpush2.msra.mxu1 %v705_v36  ;;  %v570_v2 = vld [vmem:[%s4091_s4 + $0xaa8] sm:$0xff]  ;;  %933 = vmatprep.subr.mxu0 %v574_v43  ;;  %v284_v32 = vld [vmem:[%s4091_s4 + $0x1b8] sm:$0xff] }
  0x86   :  { %v701_v49 = vld [vmem:[%s4091_s4 + $0xec0] sm:$0xff]  ;;  %v698_v40 = vld [vmem:[%s4091_s4 + $0xea8] sm:$0xff]  ;;  %1004 = vmatprep.subr.mxu1 %v702_v44  ;;  %934 = vmatpush2.msra.mxu0 %v573_v48  ;;  %v412_v31 = vld [vmem:[%s4091_s4 + $0x5b8] sm:$0xff] }
  0x87   :  { %v569_v52 = vld [vmem:[%s4091_s4 + $0xaa0] sm:$0xff]  ;;  %1005 = vmatpush2.msra.mxu1 %v701_v49  ;;  %v566_v57 = vld [vmem:[%s4091_s4 + $0xa88] sm:$0xff]  ;;  %935 = vmatprep.subr.mxu0 %v570_v2  ;;  %v283_v34 = vld [vmem:[%s4091_s4 + $0x1b0] sm:$0xff] }
  0x88   :  { %v697_v54 = vld [vmem:[%s4091_s4 + $0xea0] sm:$0xff]  ;;  %v694_v59 = vld [vmem:[%s4091_s4 + $0xe88] sm:$0xff]  ;;  %1006 = vmatprep.subr.mxu1 %v698_v40  ;;  %936 = vmatpush2.msra.mxu0 %v569_v52  ;;  %v411_v35 = vld [vmem:[%s4091_s4 + $0x5b0] sm:$0xff] }
  0x89   :  { %v565_v60 = vld [vmem:[%s4091_s4 + $0xa80] sm:$0xff]  ;;  %1007 = vmatpush2.msra.mxu1 %v697_v54  ;;  %v562_v63 = vld [vmem:[%s4091_s4 + $0xa68] sm:$0xff]  ;;  %937 = vmatprep.subr.mxu0 %v566_v57  ;;  %v280_v37 = vld [vmem:[%s4091_s4 + $0x198] sm:$0xff] }
  0x8a   :  { %v693_v62 = vld [vmem:[%s4091_s4 + $0xe80] sm:$0xff]  ;;  %v690_v0 = vld [vmem:[%s4091_s4 + $0xe68] sm:$0xff]  ;;  %1008 = vmatprep.subr.mxu1 %v694_v59  ;;  %938 = vmatpush2.msra.mxu0 %v565_v60  ;;  %v408_v39 = vld [vmem:[%s4091_s4 + $0x598] sm:$0xff] }
  0x8b   :  { %v561_v1 = vld [vmem:[%s4091_s4 + $0xa60] sm:$0xff]  ;;  %1009 = vmatpush2.msra.mxu1 %v693_v62  ;;  %v558_v41 = vld [vmem:[%s4091_s4 + $0xa48] sm:$0xff]  ;;  %939 = vmatprep.subr.mxu0 %v562_v63  ;;  %v279_v36 = vld [vmem:[%s4091_s4 + $0x190] sm:$0xff] }
  0x8c   :  { %v689_v3 = vld [vmem:[%s4091_s4 + $0xe60] sm:$0xff]  ;;  %v686_v4 = vld [vmem:[%s4091_s4 + $0xe48] sm:$0xff]  ;;  %1010 = vmatprep.subr.mxu1 %v690_v0  ;;  %940 = vmatpush2.msra.mxu0 %v561_v1  ;;  %v407_v43 = vld [vmem:[%s4091_s4 + $0x590] sm:$0xff] }
  0x8d   :  { %v557_v5 = vld [vmem:[%s4091_s4 + $0xa40] sm:$0xff]  ;;  %1011 = vmatpush2.msra.mxu1 %v689_v3  ;;  %v554_v7 = vld [vmem:[%s4091_s4 + $0xa28] sm:$0xff]  ;;  %941 = vmatprep.subr.mxu0 %v558_v41  ;;  %v276_v44 = vld [vmem:[%s4091_s4 + $0x178] sm:$0xff] }
  0x8e   :  { %v685_v6 = vld [vmem:[%s4091_s4 + $0xe40] sm:$0xff]  ;;  %v682_v8 = vld [vmem:[%s4091_s4 + $0xe28] sm:$0xff]  ;;  %1012 = vmatprep.subr.mxu1 %v686_v4  ;;  %942 = vmatpush2.msra.mxu0 %v557_v5  ;;  %v404_v48 = vld [vmem:[%s4091_s4 + $0x578] sm:$0xff] }
  0x8f   :  { %v553_v9 = vld [vmem:[%s4091_s4 + $0xa20] sm:$0xff]  ;;  %1013 = vmatpush2.msra.mxu1 %v685_v6  ;;  %v550_v11 = vld [vmem:[%s4091_s4 + $0xa08] sm:$0xff]  ;;  %943 = vmatprep.subr.mxu0 %v554_v7  ;;  %v275_v49 = vld [vmem:[%s4091_s4 + $0x170] sm:$0xff] }
  0x90   :  { %v681_v10 = vld [vmem:[%s4091_s4 + $0xe20] sm:$0xff]  ;;  %v678_v12 = vld [vmem:[%s4091_s4 + $0xe08] sm:$0xff]  ;;  %1014 = vmatprep.subr.mxu1 %v682_v8  ;;  %944 = vmatpush2.msra.mxu0 %v553_v9  ;;  %v403_v2 = vld [vmem:[%s4091_s4 + $0x570] sm:$0xff] }
  0x91   :  { %v549_v14 = vld [vmem:[%s4091_s4 + $0xa00] sm:$0xff]  ;;  %1015 = vmatpush2.msra.mxu1 %v681_v10  ;;  %945 = vmatprep.subr.mxu0 %v550_v11  ;;  %v272_v40 = vld [vmem:[%s4091_s4 + $0x158] sm:$0xff]  ;;  %v271_v54 = vld [vmem:[%s4091_s4 + $0x150] sm:$0xff] }
  0x92   :  { %v677_v16 = vld [vmem:[%s4091_s4 + $0xe00] sm:$0xff]  ;;  %1016 = vmatprep.subr.mxu1 %v678_v12  ;;  %946 = vmatpush2.msra.mxu0 %v549_v14  ;;  %v400_v52 = vld [vmem:[%s4091_s4 + $0x558] sm:$0xff]  ;;  %v399_v57 = vld [vmem:[%s4091_s4 + $0x550] sm:$0xff] }
  0x93   :  { %947 = vmatprep.mubr.f32.mxu0 %v226_v13  ;;  %1017 = vmatpush2.msra.mxu1 %v677_v16  ;;  %v268_v59 = vld [vmem:[%s4091_s4 + $0x138] sm:$0xff]  ;;  %v267_v62 = vld [vmem:[%s4091_s4 + $0x130] sm:$0xff]  ;;  %v1531_v47 = vld [vmem:[#allocation2 + $0xe8] sm:$0xff] }
  0x94   :  { %948 = vmatmul.mubr.f32.vlgmr.msra.gmra.mxu0 %v225_v15  ;;  %1018 = vmatprep.mubr.f32.mxu1 %v228_v18  ;;  %v396_v60 = vld [vmem:[%s4091_s4 + $0x538] sm:$0xff]  ;;  %v395_v63 = vld [vmem:[%s4091_s4 + $0x530] sm:$0xff]  ;;  %v1530_v58 = vld [vmem:[#allocation2 + $0xe0] sm:$0xff] }
  0x95   :  { %1025 = vmatprep.subr.mxu0 %v292_v19  ;;  %1096 = vmatprep.subr.mxu1 %v420_v21  ;;  %v264_v0 = vld [vmem:[%s4091_s4 + $0x118] sm:$0xff]  ;;  %v263_v3 = vld [vmem:[%s4091_s4 + $0x110] sm:$0xff] }
  0x96   :  { %1019 = vmatmul.mubr.f32.vlgmr.msra.gmra.mxu1 %v227_v20  ;;  %1026 = vmatpush1.msra.mxu0 %v291_v22  ;;  %v392_v1 = vld [vmem:[%s4091_s4 + $0x518] sm:$0xff]  ;;  %v391_v41 = vld [vmem:[%s4091_s4 + $0x510] sm:$0xff] }
  0x97   :  { %1097 = vmatpush1.msra.mxu1 %v419_v23  ;;  %1027 = vmatprep.subr.mxu0 %v288_v24  ;;  %v260_v4 = vld [vmem:[%s4091_s4 + $0xf8] sm:$0xff]  ;;  %v259_v6 = vld [vmem:[%s4091_s4 + $0xf0] sm:$0xff] }
  0x98   :  { %1098 = vmatprep.subr.mxu1 %v416_v25  ;;  %1028 = vmatpush1.msra.mxu0 %v287_v26  ;;  %v388_v5 = vld [vmem:[%s4091_s4 + $0x4f8] sm:$0xff]  ;;  %v387_v7 = vld [vmem:[%s4091_s4 + $0x4f0] sm:$0xff] }
  0x99   :  { %1099 = vmatpush1.msra.mxu1 %v415_v30  ;;  %1029 = vmatprep.subr.mxu0 %v284_v32  ;;  %v256_v8 = vld [vmem:[%s4091_s4 + $0xd8] sm:$0xff]  ;;  %v255_v10 = vld [vmem:[%s4091_s4 + $0xd0] sm:$0xff] }
  0x9a   :  { %1100 = vmatprep.subr.mxu1 %v412_v31  ;;  %1030 = vmatpush1.msra.mxu0 %v283_v34  ;;  %v384_v9 = vld [vmem:[%s4091_s4 + $0x4d8] sm:$0xff]  ;;  %v383_v11 = vld [vmem:[%s4091_s4 + $0x4d0] sm:$0xff] }
  0x9b   :  { %1101 = vmatpush1.msra.mxu1 %v411_v35  ;;  %1031 = vmatprep.subr.mxu0 %v280_v37  ;;  %v252_v12 = vld [vmem:[%s4091_s4 + $0xb8] sm:$0xff]  ;;  %v251_v16 = vld [vmem:[%s4091_s4 + $0xb0] sm:$0xff] }
  0x9c   :  { %1102 = vmatprep.subr.mxu1 %v408_v39  ;;  %1032 = vmatpush1.msra.mxu0 %v279_v36  ;;  %v380_v14 = vld [vmem:[%s4091_s4 + $0x4b8] sm:$0xff]  ;;  %v379_v19 = vld [vmem:[%s4091_s4 + $0x4b0] sm:$0xff] }
  0x9d   :  { %1103 = vmatpush1.msra.mxu1 %v407_v43  ;;  %1033 = vmatprep.subr.mxu0 %v276_v44  ;;  %v248_v21 = vld [vmem:[%s4091_s4 + $0x98] sm:$0xff]  ;;  %v247_v23 = vld [vmem:[%s4091_s4 + $0x90] sm:$0xff] }
  0x9e   :  { %1104 = vmatprep.subr.mxu1 %v404_v48  ;;  %1034 = vmatpush1.msra.mxu0 %v275_v49  ;;  %v376_v22 = vld [vmem:[%s4091_s4 + $0x498] sm:$0xff]  ;;  %v375_v24 = vld [vmem:[%s4091_s4 + $0x490] sm:$0xff] }
  0x9f   :  { %1105 = vmatpush1.msra.mxu1 %v403_v2  ;;  %1035 = vmatprep.subr.mxu0 %v272_v40  ;;  %v244_v25 = vld [vmem:[%s4091_s4 + $0x78] sm:$0xff]  ;;  %v243_v30 = vld [vmem:[%s4091_s4 + $0x70] sm:$0xff] }
  0xa0   :  { %1106 = vmatprep.subr.mxu1 %v400_v52  ;;  %1036 = vmatpush1.msra.mxu0 %v271_v54  ;;  %v372_v26 = vld [vmem:[%s4091_s4 + $0x478] sm:$0xff]  ;;  %v371_v32 = vld [vmem:[%s4091_s4 + $0x470] sm:$0xff] }
  0xa1   :  { %1107 = vmatpush1.msra.mxu1 %v399_v57  ;;  %1037 = vmatprep.subr.mxu0 %v268_v59  ;;  %v240_v31 = vld [vmem:[%s4091_s4 + $0x58] sm:$0xff]  ;;  %v239_v35 = vld [vmem:[%s4091_s4 + $0x50] sm:$0xff] }
  0xa2   :  { %1108 = vmatprep.subr.mxu1 %v396_v60  ;;  %1038 = vmatpush1.msra.mxu0 %v267_v62  ;;  %v368_v34 = vld [vmem:[%s4091_s4 + $0x458] sm:$0xff]  ;;  %v367_v37 = vld [vmem:[%s4091_s4 + $0x450] sm:$0xff] }
  0xa3   :  { %1109 = vmatpush1.msra.mxu1 %v395_v63  ;;  %1039 = vmatprep.subr.mxu0 %v264_v0  ;;  %v236_v39 = vld [vmem:[%s4091_s4 + $0x38] sm:$0xff]  ;;  %v235_v43 = vld [vmem:[%s4091_s4 + $0x30] sm:$0xff] }
  0xa4   :  { %1110 = vmatprep.subr.mxu1 %v392_v1  ;;  %1040 = vmatpush1.msra.mxu0 %v263_v3  ;;  %v364_v36 = vld [vmem:[%s4091_s4 + $0x438] sm:$0xff]  ;;  %v363_v44 = vld [vmem:[%s4091_s4 + $0x430] sm:$0xff] }
  0xa5   :  { %1111 = vmatpush1.msra.mxu1 %v391_v41  ;;  %1041 = vmatprep.subr.mxu0 %v260_v4  ;;  %v232_v48 = vld [vmem:[%s4091_s4 + $0x18] sm:$0xff]  ;;  %v231_v2 = vld [vmem:[%s4091_s4 + $0x10] sm:$0xff] }
  0xa6   :  { %1112 = vmatprep.subr.mxu1 %v388_v5  ;;  %1042 = vmatpush1.msra.mxu0 %v259_v6  ;;  %v360_v49 = vld [vmem:[%s4091_s4 + $0x418] sm:$0xff]  ;;  %v359_v40 = vld [vmem:[%s4091_s4 + $0x410] sm:$0xff] }
  0xa7   :  { %1113 = vmatpush1.msra.mxu1 %v387_v7  ;;  %1043 = vmatprep.subr.mxu0 %v256_v8  ;;  %v356_v52 = vld [vmem:[%s4091_s4 + $0x3f8] sm:$0xff]  ;;  %v355_v57 = vld [vmem:[%s4091_s4 + $0x3f0] sm:$0xff] }
  0xa8   :  { %1114 = vmatprep.subr.mxu1 %v384_v9  ;;  %1044 = vmatpush1.msra.mxu0 %v255_v10  ;;  %v484_v54 = vld [vmem:[%s4091_s4 + $0x7f8] sm:$0xff]  ;;  %v483_v59 = vld [vmem:[%s4091_s4 + $0x7f0] sm:$0xff] }
  0xa9   :  { %1115 = vmatpush1.msra.mxu1 %v383_v11  ;;  %1045 = vmatprep.subr.mxu0 %v252_v12  ;;  %v352_v60 = vld [vmem:[%s4091_s4 + $0x3d8] sm:$0xff]  ;;  %v351_v63 = vld [vmem:[%s4091_s4 + $0x3d0] sm:$0xff] }
  0xaa   :  { %1116 = vmatprep.subr.mxu1 %v380_v14  ;;  %1046 = vmatpush1.msra.mxu0 %v251_v16  ;;  %v480_v62 = vld [vmem:[%s4091_s4 + $0x7d8] sm:$0xff]  ;;  %v479_v0 = vld [vmem:[%s4091_s4 + $0x7d0] sm:$0xff] }
  0xab   :  { %1117 = vmatpush1.msra.mxu1 %v379_v19  ;;  %1047 = vmatprep.subr.mxu0 %v248_v21  ;;  %v348_v1 = vld [vmem:[%s4091_s4 + $0x3b8] sm:$0xff]  ;;  %v347_v41 = vld [vmem:[%s4091_s4 + $0x3b0] sm:$0xff] }
  0xac   :  { %1118 = vmatprep.subr.mxu1 %v376_v22  ;;  %1048 = vmatpush1.msra.mxu0 %v247_v23  ;;  %v476_v3 = vld [vmem:[%s4091_s4 + $0x7b8] sm:$0xff]  ;;  %v475_v4 = vld [vmem:[%s4091_s4 + $0x7b0] sm:$0xff] }
  0xad   :  { %1119 = vmatpush1.msra.mxu1 %v375_v24  ;;  %1049 = vmatprep.subr.mxu0 %v244_v25  ;;  %v344_v5 = vld [vmem:[%s4091_s4 + $0x398] sm:$0xff]  ;;  %v343_v7 = vld [vmem:[%s4091_s4 + $0x390] sm:$0xff] }
  0xae   :  { %1120 = vmatprep.subr.mxu1 %v372_v26  ;;  %1050 = vmatpush1.msra.mxu0 %v243_v30  ;;  %v472_v6 = vld [vmem:[%s4091_s4 + $0x798] sm:$0xff]  ;;  %v471_v8 = vld [vmem:[%s4091_s4 + $0x790] sm:$0xff] }
  0xaf   :  { %1121 = vmatpush1.msra.mxu1 %v371_v32  ;;  %1051 = vmatprep.subr.mxu0 %v240_v31  ;;  %v340_v9 = vld [vmem:[%s4091_s4 + $0x378] sm:$0xff]  ;;  %v339_v11 = vld [vmem:[%s4091_s4 + $0x370] sm:$0xff] }
  0xb0   :  { %1122 = vmatprep.subr.mxu1 %v368_v34  ;;  %1052 = vmatpush1.msra.mxu0 %v239_v35  ;;  %v468_v10 = vld [vmem:[%s4091_s4 + $0x778] sm:$0xff]  ;;  %v467_v12 = vld [vmem:[%s4091_s4 + $0x770] sm:$0xff] }
  0xb1   :  { %1123 = vmatpush1.msra.mxu1 %v367_v37  ;;  %1053 = vmatprep.subr.mxu0 %v236_v39  ;;  %v336_v14 = vld [vmem:[%s4091_s4 + $0x358] sm:$0xff]  ;;  %v335_v19 = vld [vmem:[%s4091_s4 + $0x350] sm:$0xff] }
  0xb2   :  { %1124 = vmatprep.subr.mxu1 %v364_v36  ;;  %1054 = vmatpush1.msra.mxu0 %v235_v43  ;;  %v464_v16 = vld [vmem:[%s4091_s4 + $0x758] sm:$0xff]  ;;  %v463_v21 = vld [vmem:[%s4091_s4 + $0x750] sm:$0xff] }
  0xb3   :  { %1125 = vmatpush1.msra.mxu1 %v363_v44  ;;  %1055 = vmatprep.subr.mxu0 %v232_v48  ;;  %v332_v22 = vld [vmem:[%s4091_s4 + $0x338] sm:$0xff]  ;;  %v331_v24 = vld [vmem:[%s4091_s4 + $0x330] sm:$0xff] }
  0xb4   :  { %1126 = vmatprep.subr.mxu1 %v360_v49  ;;  %1056 = vmatpush1.msra.mxu0 %v231_v2  ;;  %v460_v23 = vld [vmem:[%s4091_s4 + $0x738] sm:$0xff]  ;;  %v459_v25 = vld [vmem:[%s4091_s4 + $0x730] sm:$0xff] }
  0xb5   :  { %1127 = vmatpush1.msra.mxu1 %v359_v40  ;;  %1057 = vmatprep.subr.mxu0 %v356_v52  ;;  %v328_v26 = vld [vmem:[%s4091_s4 + $0x318] sm:$0xff]  ;;  %v327_v32 = vld [vmem:[%s4091_s4 + $0x310] sm:$0xff] }
  0xb6   :  { %1128 = vmatprep.subr.mxu1 %v484_v54  ;;  %1058 = vmatpush2.msra.mxu0 %v355_v57  ;;  %v456_v30 = vld [vmem:[%s4091_s4 + $0x718] sm:$0xff]  ;;  %v455_v31 = vld [vmem:[%s4091_s4 + $0x710] sm:$0xff] }
  0xb7   :  { %1129 = vmatpush2.msra.mxu1 %v483_v59  ;;  %1059 = vmatprep.subr.mxu0 %v352_v60  ;;  %v324_v34 = vld [vmem:[%s4091_s4 + $0x2f8] sm:$0xff]  ;;  %v323_v37 = vld [vmem:[%s4091_s4 + $0x2f0] sm:$0xff] }
  0xb8   :  { %1130 = vmatprep.subr.mxu1 %v480_v62  ;;  %1060 = vmatpush2.msra.mxu0 %v351_v63  ;;  %v452_v35 = vld [vmem:[%s4091_s4 + $0x6f8] sm:$0xff]  ;;  %v451_v39 = vld [vmem:[%s4091_s4 + $0x6f0] sm:$0xff] }
  0xb9   :  { %1131 = vmatpush2.msra.mxu1 %v479_v0  ;;  %1061 = vmatprep.subr.mxu0 %v348_v1  ;;  %v320_v36 = vld [vmem:[%s4091_s4 + $0x2d8] sm:$0xff]  ;;  %v319_v44 = vld [vmem:[%s4091_s4 + $0x2d0] sm:$0xff] }
  0xba   :  { %1132 = vmatprep.subr.mxu1 %v476_v3  ;;  %1062 = vmatpush2.msra.mxu0 %v347_v41  ;;  %v448_v43 = vld [vmem:[%s4091_s4 + $0x6d8] sm:$0xff]  ;;  %v447_v48 = vld [vmem:[%s4091_s4 + $0x6d0] sm:$0xff] }
  0xbb   :  { %1133 = vmatpush2.msra.mxu1 %v475_v4  ;;  %1063 = vmatprep.subr.mxu0 %v344_v5  ;;  %v316_v49 = vld [vmem:[%s4091_s4 + $0x2b8] sm:$0xff]  ;;  %v315_v40 = vld [vmem:[%s4091_s4 + $0x2b0] sm:$0xff] }
  0xbc   :  { %1134 = vmatprep.subr.mxu1 %v472_v6  ;;  %1064 = vmatpush2.msra.mxu0 %v343_v7  ;;  %v444_v2 = vld [vmem:[%s4091_s4 + $0x6b8] sm:$0xff]  ;;  %v443_v52 = vld [vmem:[%s4091_s4 + $0x6b0] sm:$0xff] }
  0xbd   :  { %1135 = vmatpush2.msra.mxu1 %v471_v8  ;;  %1065 = vmatprep.subr.mxu0 %v340_v9  ;;  %v312_v54 = vld [vmem:[%s4091_s4 + $0x298] sm:$0xff]  ;;  %v311_v59 = vld [vmem:[%s4091_s4 + $0x290] sm:$0xff] }
  0xbe   :  { %1136 = vmatprep.subr.mxu1 %v468_v10  ;;  %1066 = vmatpush2.msra.mxu0 %v339_v11  ;;  %v440_v57 = vld [vmem:[%s4091_s4 + $0x698] sm:$0xff]  ;;  %v439_v60 = vld [vmem:[%s4091_s4 + $0x690] sm:$0xff] }
  0xbf   :  { %1137 = vmatpush2.msra.mxu1 %v467_v12  ;;  %1067 = vmatprep.subr.mxu0 %v336_v14  ;;  %v308_v62 = vld [vmem:[%s4091_s4 + $0x278] sm:$0xff]  ;;  %v307_v0 = vld [vmem:[%s4091_s4 + $0x270] sm:$0xff] }
  0xc0   :  { %1138 = vmatprep.subr.mxu1 %v464_v16  ;;  %1068 = vmatpush2.msra.mxu0 %v335_v19  ;;  %v436_v63 = vld [vmem:[%s4091_s4 + $0x678] sm:$0xff]  ;;  %v435_v1 = vld [vmem:[%s4091_s4 + $0x670] sm:$0xff] }
  0xc1   :  { %1139 = vmatpush2.msra.mxu1 %v463_v21  ;;  %1069 = vmatprep.subr.mxu0 %v332_v22  ;;  %v304_v3 = vld [vmem:[%s4091_s4 + $0x258] sm:$0xff]  ;;  %v303_v4 = vld [vmem:[%s4091_s4 + $0x250] sm:$0xff] }
  0xc2   :  { %1140 = vmatprep.subr.mxu1 %v460_v23  ;;  %1070 = vmatpush2.msra.mxu0 %v331_v24  ;;  %v432_v41 = vld [vmem:[%s4091_s4 + $0x658] sm:$0xff]  ;;  %v431_v5 = vld [vmem:[%s4091_s4 + $0x650] sm:$0xff] }
  0xc3   :  { %1141 = vmatpush2.msra.mxu1 %v459_v25  ;;  %1071 = vmatprep.subr.mxu0 %v328_v26  ;;  %v300_v6 = vld [vmem:[%s4091_s4 + $0x238] sm:$0xff]  ;;  %v299_v8 = vld [vmem:[%s4091_s4 + $0x230] sm:$0xff] }
  0xc4   :  { %1142 = vmatprep.subr.mxu1 %v456_v30  ;;  %1072 = vmatpush2.msra.mxu0 %v327_v32  ;;  %v428_v7 = vld [vmem:[%s4091_s4 + $0x638] sm:$0xff]  ;;  %v427_v9 = vld [vmem:[%s4091_s4 + $0x630] sm:$0xff] }
  0xc5   :  { %1143 = vmatpush2.msra.mxu1 %v455_v31  ;;  %1073 = vmatprep.subr.mxu0 %v324_v34  ;;  %v296_v10 = vld [vmem:[%s4091_s4 + $0x218] sm:$0xff]  ;;  %v295_v12 = vld [vmem:[%s4091_s4 + $0x210] sm:$0xff] }
  0xc6   :  { %1144 = vmatprep.subr.mxu1 %v452_v35  ;;  %1074 = vmatpush2.msra.mxu0 %v323_v37  ;;  %v424_v11 = vld [vmem:[%s4091_s4 + $0x618] sm:$0xff]  ;;  %v423_v14 = vld [vmem:[%s4091_s4 + $0x610] sm:$0xff] }
  0xc7   :  { %1145 = vmatpush2.msra.mxu1 %v451_v39  ;;  %1075 = vmatprep.subr.mxu0 %v320_v36  ;;  %v548_v16 = vld [vmem:[%s4091_s4 + $0x9f8] sm:$0xff]  ;;  %v547_v21 = vld [vmem:[%s4091_s4 + $0x9f0] sm:$0xff] }
  0xc8   :  { %1146 = vmatprep.subr.mxu1 %v448_v43  ;;  %1076 = vmatpush2.msra.mxu0 %v319_v44  ;;  %v676_v19 = vld [vmem:[%s4091_s4 + $0xdf8] sm:$0xff]  ;;  %v667_v22 = vld [vmem:[%s4091_s4 + $0xdb0] sm:$0xff] }
  0xc9   :  { %1147 = vmatpush2.msra.mxu1 %v447_v48  ;;  %1077 = vmatprep.subr.mxu0 %v316_v49  ;;  %v536_v23 = vld [vmem:[%s4091_s4 + $0x998] sm:$0xff]  ;;  %v535_v25 = vld [vmem:[%s4091_s4 + $0x990] sm:$0xff] }
  0xca   :  { %1148 = vmatprep.subr.mxu1 %v444_v2  ;;  %1078 = vmatpush2.msra.mxu0 %v315_v40  ;;  %v664_v24 = vld [vmem:[%s4091_s4 + $0xd98] sm:$0xff]  ;;  %v663_v26 = vld [vmem:[%s4091_s4 + $0xd90] sm:$0xff] }
  0xcb   :  { %1149 = vmatpush2.msra.mxu1 %v443_v52  ;;  %1079 = vmatprep.subr.mxu0 %v312_v54  ;;  %v532_v30 = vld [vmem:[%s4091_s4 + $0x978] sm:$0xff]  ;;  %v531_v31 = vld [vmem:[%s4091_s4 + $0x970] sm:$0xff] }
  0xcc   :  { %1150 = vmatprep.subr.mxu1 %v440_v57  ;;  %1080 = vmatpush2.msra.mxu0 %v311_v59  ;;  %v660_v32 = vld [vmem:[%s4091_s4 + $0xd78] sm:$0xff]  ;;  %v659_v34 = vld [vmem:[%s4091_s4 + $0xd70] sm:$0xff] }
  0xcd   :  { %1151 = vmatpush2.msra.mxu1 %v439_v60  ;;  %1081 = vmatprep.subr.mxu0 %v308_v62  ;;  %v528_v35 = vld [vmem:[%s4091_s4 + $0x958] sm:$0xff]  ;;  %v527_v39 = vld [vmem:[%s4091_s4 + $0x950] sm:$0xff] }
  0xce   :  { %1152 = vmatprep.subr.mxu1 %v436_v63  ;;  %1082 = vmatpush2.msra.mxu0 %v307_v0  ;;  %v656_v37 = vld [vmem:[%s4091_s4 + $0xd58] sm:$0xff]  ;;  %v655_v36 = vld [vmem:[%s4091_s4 + $0xd50] sm:$0xff] }
  0xcf   :  { %1153 = vmatpush2.msra.mxu1 %v435_v1  ;;  %1083 = vmatprep.subr.mxu0 %v304_v3  ;;  %v524_v43 = vld [vmem:[%s4091_s4 + $0x938] sm:$0xff]  ;;  %v523_v48 = vld [vmem:[%s4091_s4 + $0x930] sm:$0xff] }
  0xd0   :  { %1154 = vmatprep.subr.mxu1 %v432_v41  ;;  %1084 = vmatpush2.msra.mxu0 %v303_v4  ;;  %v652_v44 = vld [vmem:[%s4091_s4 + $0xd38] sm:$0xff]  ;;  %v651_v49 = vld [vmem:[%s4091_s4 + $0xd30] sm:$0xff] }
  0xd1   :  { %1155 = vmatpush2.msra.mxu1 %v431_v5  ;;  %1085 = vmatprep.subr.mxu0 %v300_v6  ;;  %v520_v2 = vld [vmem:[%s4091_s4 + $0x918] sm:$0xff]  ;;  %v519_v52 = vld [vmem:[%s4091_s4 + $0x910] sm:$0xff] }
  0xd2   :  { %1156 = vmatprep.subr.mxu1 %v428_v7  ;;  %1086 = vmatpush2.msra.mxu0 %v299_v8  ;;  %v648_v40 = vld [vmem:[%s4091_s4 + $0xd18] sm:$0xff]  ;;  %v647_v54 = vld [vmem:[%s4091_s4 + $0xd10] sm:$0xff] }
  0xd3   :  { %1157 = vmatpush2.msra.mxu1 %v427_v9  ;;  %1087 = vmatprep.subr.mxu0 %v296_v10  ;;  %v516_v57 = vld [vmem:[%s4091_s4 + $0x8f8] sm:$0xff]  ;;  %v515_v60 = vld [vmem:[%s4091_s4 + $0x8f0] sm:$0xff] }
  0xd4   :  { %1158 = vmatprep.subr.mxu1 %v424_v11  ;;  %1088 = vmatpush2.msra.mxu0 %v295_v12  ;;  %v644_v59 = vld [vmem:[%s4091_s4 + $0xcf8] sm:$0xff]  ;;  %v643_v62 = vld [vmem:[%s4091_s4 + $0xcf0] sm:$0xff] }
  0xd5   :  { %1089 = vmatprep.mubr.f32.mxu0 %v222_v51  ;;  %1159 = vmatpush2.msra.mxu1 %v423_v14  ;;  %v544_v51 = vld [vmem:[%s4091_s4 + $0x9d8] sm:$0xff]  ;;  %v511_v1 = vld [vmem:[%s4091_s4 + $0x8d0] sm:$0xff] }
  0xd6   :  { %1160 = vmatprep.mubr.f32.mxu1 %v224_v53  ;;  %1090 = vmatmul.mubr.f32.vlgmr.msra.gmra.mxu0 %v221_v55  ;;  %v543_v53 = vld [vmem:[%s4091_s4 + $0x9d0] sm:$0xff]  ;;  %v668_v55 = vld [vmem:[%s4091_s4 + $0xdb8] sm:$0xff] }
  0xd7   :  { %1161 = vmatmul.mubr.f32.vlgmr.msra.gmra.mxu1 %v223_v56  ;;  %1167 = vmatprep.subr.mxu0 %v548_v16  ;;  %v539_v56 = vld [vmem:[%s4091_s4 + $0x9b0] sm:$0xff]  ;;  %v512_v63 = vld [vmem:[%s4091_s4 + $0x8d8] sm:$0xff] }
  0xd8   :  { %1238 = vmatprep.subr.mxu1 %v676_v19  ;;  %1168 = vmatpush1.msra.mxu0 %v547_v21  ;;  %v640_v0 = vld [vmem:[%s4091_s4 + $0xcd8] sm:$0xff]  ;;  %v639_v3 = vld [vmem:[%s4091_s4 + $0xcd0] sm:$0xff] }
  0xd9   :  { %1239 = vmatpush1.msra.mxu1 %v675_v38  ;;  %1169 = vmatprep.subr.mxu0 %v544_v51  ;;  %v508_v41 = vld [vmem:[%s4091_s4 + $0x8b8] sm:$0xff]  ;;  %v507_v5 = vld [vmem:[%s4091_s4 + $0x8b0] sm:$0xff] }
  0xda   :  { %1240 = vmatprep.subr.mxu1 %v672_v42  ;;  %1170 = vmatpush1.msra.mxu0 %v543_v53  ;;  %v636_v4 = vld [vmem:[%s4091_s4 + $0xcb8] sm:$0xff]  ;;  %v635_v6 = vld [vmem:[%s4091_s4 + $0xcb0] sm:$0xff] }
  0xdb   :  { %1241 = vmatpush1.msra.mxu1 %v671_v45  ;;  %1171 = vmatprep.subr.mxu0 %v540_v46  ;;  %v504_v7 = vld [vmem:[%s4091_s4 + $0x898] sm:$0xff]  ;;  %v503_v9 = vld [vmem:[%s4091_s4 + $0x890] sm:$0xff] }
  0xdc   :  { %1242 = vmatprep.subr.mxu1 %v668_v55  ;;  %1172 = vmatpush1.msra.mxu0 %v539_v56  ;;  %v632_v8 = vld [vmem:[%s4091_s4 + $0xc98] sm:$0xff]  ;;  %v631_v10 = vld [vmem:[%s4091_s4 + $0xc90] sm:$0xff] }
  0xdd   :  { %1243 = vmatpush1.msra.mxu1 %v667_v22  ;;  %1173 = vmatprep.subr.mxu0 %v536_v23  ;;  %v500_v11 = vld [vmem:[%s4091_s4 + $0x878] sm:$0xff]  ;;  %v499_v14 = vld [vmem:[%s4091_s4 + $0x870] sm:$0xff] }
  0xde   :  { %1244 = vmatprep.subr.mxu1 %v664_v24  ;;  %1174 = vmatpush1.msra.mxu0 %v535_v25  ;;  %v628_v12 = vld [vmem:[%s4091_s4 + $0xc78] sm:$0xff]  ;;  %v627_v16 = vld [vmem:[%s4091_s4 + $0xc70] sm:$0xff] }
  0xdf   :  { %1245 = vmatpush1.msra.mxu1 %v663_v26  ;;  %1175 = vmatprep.subr.mxu0 %v532_v30  ;;  %v496_v19 = vld [vmem:[%s4091_s4 + $0x858] sm:$0xff]  ;;  %v495_v38 = vld [vmem:[%s4091_s4 + $0x850] sm:$0xff] }
  0xe0   :  { %1246 = vmatprep.subr.mxu1 %v660_v32  ;;  %1176 = vmatpush1.msra.mxu0 %v531_v31  ;;  %v624_v21 = vld [vmem:[%s4091_s4 + $0xc58] sm:$0xff]  ;;  %v623_v51 = vld [vmem:[%s4091_s4 + $0xc50] sm:$0xff] }
  0xe1   :  { %1247 = vmatpush1.msra.mxu1 %v659_v34  ;;  %1177 = vmatprep.subr.mxu0 %v528_v35  ;;  %v492_v42 = vld [vmem:[%s4091_s4 + $0x838] sm:$0xff]  ;;  %v491_v45 = vld [vmem:[%s4091_s4 + $0x830] sm:$0xff] }
  0xe2   :  { %1248 = vmatprep.subr.mxu1 %v656_v37  ;;  %1178 = vmatpush1.msra.mxu0 %v527_v39  ;;  %v620_v53 = vld [vmem:[%s4091_s4 + $0xc38] sm:$0xff]  ;;  %v619_v46 = vld [vmem:[%s4091_s4 + $0xc30] sm:$0xff] }
  0xe3   :  { %1249 = vmatpush1.msra.mxu1 %v655_v36  ;;  %1179 = vmatprep.subr.mxu0 %v524_v43  ;;  %v488_v55 = vld [vmem:[%s4091_s4 + $0x818] sm:$0xff]  ;;  %v487_v22 = vld [vmem:[%s4091_s4 + $0x810] sm:$0xff] }
  0xe4   :  { %1250 = vmatprep.subr.mxu1 %v652_v44  ;;  %1180 = vmatpush1.msra.mxu0 %v523_v48  ;;  %v616_v56 = vld [vmem:[%s4091_s4 + $0xc18] sm:$0xff]  ;;  %v615_v23 = vld [vmem:[%s4091_s4 + $0xc10] sm:$0xff] }
  0xe5   :  { %1251 = vmatpush1.msra.mxu1 %v651_v49  ;;  %1181 = vmatprep.subr.mxu0 %v520_v2  ;;  %v612_v24 = vld [vmem:[%s4091_s4 + $0xbf8] sm:$0xff]  ;;  %v611_v26 = vld [vmem:[%s4091_s4 + $0xbf0] sm:$0xff] }
  0xe6   :  { %1252 = vmatprep.subr.mxu1 %v648_v40  ;;  %1182 = vmatpush1.msra.mxu0 %v519_v52  ;;  %v740_v25 = vld [vmem:[%s4091_s4 + $0xff8] sm:$0xff]  ;;  %v739_v30 = vld [vmem:[%s4091_s4 + $0xff0] sm:$0xff] }
  0xe7   :  { %1253 = vmatpush1.msra.mxu1 %v647_v54  ;;  %1183 = vmatprep.subr.mxu0 %v516_v57  ;;  %v608_v32 = vld [vmem:[%s4091_s4 + $0xbd8] sm:$0xff]  ;;  %v607_v34 = vld [vmem:[%s4091_s4 + $0xbd0] sm:$0xff] }
  0xe8   :  { %1254 = vmatprep.subr.mxu1 %v644_v59  ;;  %1184 = vmatpush1.msra.mxu0 %v515_v60  ;;  %v736_v31 = vld [vmem:[%s4091_s4 + $0xfd8] sm:$0xff]  ;;  %v735_v35 = vld [vmem:[%s4091_s4 + $0xfd0] sm:$0xff] }
  0xe9   :  { %1255 = vmatpush1.msra.mxu1 %v643_v62  ;;  %1185 = vmatprep.subr.mxu0 %v512_v63  ;;  %v604_v37 = vld [vmem:[%s4091_s4 + $0xbb8] sm:$0xff]  ;;  %v603_v36 = vld [vmem:[%s4091_s4 + $0xbb0] sm:$0xff] }
  0xea   :  { %1256 = vmatprep.subr.mxu1 %v640_v0  ;;  %1186 = vmatpush1.msra.mxu0 %v511_v1  ;;  %v732_v39 = vld [vmem:[%s4091_s4 + $0xfb8] sm:$0xff]  ;;  %v731_v43 = vld [vmem:[%s4091_s4 + $0xfb0] sm:$0xff] }
  0xeb   :  { %1257 = vmatpush1.msra.mxu1 %v639_v3  ;;  %1187 = vmatprep.subr.mxu0 %v508_v41  ;;  %v600_v44 = vld [vmem:[%s4091_s4 + $0xb98] sm:$0xff]  ;;  %v599_v49 = vld [vmem:[%s4091_s4 + $0xb90] sm:$0xff] }
  0xec   :  { %1258 = vmatprep.subr.mxu1 %v636_v4  ;;  %1188 = vmatpush1.msra.mxu0 %v507_v5  ;;  %v728_v48 = vld [vmem:[%s4091_s4 + $0xf98] sm:$0xff]  ;;  %v727_v2 = vld [vmem:[%s4091_s4 + $0xf90] sm:$0xff] }
  0xed   :  { %1259 = vmatpush1.msra.mxu1 %v635_v6  ;;  %1189 = vmatprep.subr.mxu0 %v504_v7  ;;  %v596_v40 = vld [vmem:[%s4091_s4 + $0xb78] sm:$0xff]  ;;  %v595_v54 = vld [vmem:[%s4091_s4 + $0xb70] sm:$0xff] }
  0xee   :  { %1260 = vmatprep.subr.mxu1 %v632_v8  ;;  %1190 = vmatpush1.msra.mxu0 %v503_v9  ;;  %v724_v52 = vld [vmem:[%s4091_s4 + $0xf78] sm:$0xff]  ;;  %v723_v57 = vld [vmem:[%s4091_s4 + $0xf70] sm:$0xff] }
  0xef   :  { %1261 = vmatpush1.msra.mxu1 %v631_v10  ;;  %1191 = vmatprep.subr.mxu0 %v500_v11  ;;  %v592_v59 = vld [vmem:[%s4091_s4 + $0xb58] sm:$0xff]  ;;  %v591_v62 = vld [vmem:[%s4091_s4 + $0xb50] sm:$0xff] }
  0xf0   :  { %1262 = vmatprep.subr.mxu1 %v628_v12  ;;  %1192 = vmatpush1.msra.mxu0 %v499_v14  ;;  %v720_v60 = vld [vmem:[%s4091_s4 + $0xf58] sm:$0xff]  ;;  %v719_v63 = vld [vmem:[%s4091_s4 + $0xf50] sm:$0xff] }
  0xf1   :  { %1263 = vmatpush1.msra.mxu1 %v627_v16  ;;  %1193 = vmatprep.subr.mxu0 %v496_v19  ;;  %v588_v0 = vld [vmem:[%s4091_s4 + $0xb38] sm:$0xff]  ;;  %v587_v3 = vld [vmem:[%s4091_s4 + $0xb30] sm:$0xff] }
  0xf2   :  { %1264 = vmatprep.subr.mxu1 %v624_v21  ;;  %1194 = vmatpush1.msra.mxu0 %v495_v38  ;;  %v716_v1 = vld [vmem:[%s4091_s4 + $0xf38] sm:$0xff]  ;;  %v715_v41 = vld [vmem:[%s4091_s4 + $0xf30] sm:$0xff] }
  0xf3   :  { %1265 = vmatpush1.msra.mxu1 %v623_v51  ;;  %1195 = vmatprep.subr.mxu0 %v492_v42  ;;  %v584_v4 = vld [vmem:[%s4091_s4 + $0xb18] sm:$0xff]  ;;  %v583_v6 = vld [vmem:[%s4091_s4 + $0xb10] sm:$0xff] }
  0xf4   :  { %1266 = vmatprep.subr.mxu1 %v620_v53  ;;  %1196 = vmatpush1.msra.mxu0 %v491_v45  ;;  %v712_v5 = vld [vmem:[%s4091_s4 + $0xf18] sm:$0xff]  ;;  %v711_v7 = vld [vmem:[%s4091_s4 + $0xf10] sm:$0xff] }
  0xf5   :  { %1267 = vmatpush1.msra.mxu1 %v619_v46  ;;  %1197 = vmatprep.subr.mxu0 %v488_v55  ;;  %v580_v8 = vld [vmem:[%s4091_s4 + $0xaf8] sm:$0xff]  ;;  %v579_v10 = vld [vmem:[%s4091_s4 + $0xaf0] sm:$0xff] }
  0xf6   :  { %1268 = vmatprep.subr.mxu1 %v616_v56  ;;  %1198 = vmatpush1.msra.mxu0 %v487_v22  ;;  %v708_v9 = vld [vmem:[%s4091_s4 + $0xef8] sm:$0xff]  ;;  %v707_v11 = vld [vmem:[%s4091_s4 + $0xef0] sm:$0xff] }
  0xf7   :  { %1269 = vmatpush1.msra.mxu1 %v615_v23  ;;  %1199 = vmatprep.subr.mxu0 %v612_v24  ;;  %v576_v12 = vld [vmem:[%s4091_s4 + $0xad8] sm:$0xff]  ;;  %v575_v16 = vld [vmem:[%s4091_s4 + $0xad0] sm:$0xff] }
  0xf8   :  { %1270 = vmatprep.subr.mxu1 %v740_v25  ;;  %1200 = vmatpush2.msra.mxu0 %v611_v26  ;;  %v704_v14 = vld [vmem:[%s4091_s4 + $0xed8] sm:$0xff]  ;;  %v703_v19 = vld [vmem:[%s4091_s4 + $0xed0] sm:$0xff] }
  0xf9   :  { %1271 = vmatpush2.msra.mxu1 %v739_v30  ;;  %1201 = vmatprep.subr.mxu0 %v608_v32  ;;  %v572_v21 = vld [vmem:[%s4091_s4 + $0xab8] sm:$0xff]  ;;  %v571_v51 = vld [vmem:[%s4091_s4 + $0xab0] sm:$0xff] }
  0xfa   :  { %1272 = vmatprep.subr.mxu1 %v736_v31  ;;  %1202 = vmatpush2.msra.mxu0 %v607_v34  ;;  %v700_v38 = vld [vmem:[%s4091_s4 + $0xeb8] sm:$0xff]  ;;  %v699_v42 = vld [vmem:[%s4091_s4 + $0xeb0] sm:$0xff] }
  0xfb   :  { %1273 = vmatpush2.msra.mxu1 %v735_v35  ;;  %1203 = vmatprep.subr.mxu0 %v604_v37  ;;  %v568_v53 = vld [vmem:[%s4091_s4 + $0xa98] sm:$0xff]  ;;  %v567_v46 = vld [vmem:[%s4091_s4 + $0xa90] sm:$0xff] }
  0xfc   :  { %1274 = vmatprep.subr.mxu1 %v732_v39  ;;  %1204 = vmatpush2.msra.mxu0 %v603_v36  ;;  %v696_v45 = vld [vmem:[%s4091_s4 + $0xe98] sm:$0xff]  ;;  %v695_v55 = vld [vmem:[%s4091_s4 + $0xe90] sm:$0xff] }
  0xfd   :  { %1275 = vmatpush2.msra.mxu1 %v731_v43  ;;  %1205 = vmatprep.subr.mxu0 %v600_v44  ;;  %v564_v56 = vld [vmem:[%s4091_s4 + $0xa78] sm:$0xff]  ;;  %v563_v23 = vld [vmem:[%s4091_s4 + $0xa70] sm:$0xff] }
  0xfe   :  { %1276 = vmatprep.subr.mxu1 %v728_v48  ;;  %1206 = vmatpush2.msra.mxu0 %v599_v49  ;;  %v692_v22 = vld [vmem:[%s4091_s4 + $0xe78] sm:$0xff]  ;;  %v691_v24 = vld [vmem:[%s4091_s4 + $0xe70] sm:$0xff] }
  0xff   :  { %1277 = vmatpush2.msra.mxu1 %v727_v2  ;;  %1207 = vmatprep.subr.mxu0 %v596_v40  ;;  %v560_v25 = vld [vmem:[%s4091_s4 + $0xa58] sm:$0xff]  ;;  %v559_v30 = vld [vmem:[%s4091_s4 + $0xa50] sm:$0xff] }
 0x100   :  { %1278 = vmatprep.subr.mxu1 %v724_v52  ;;  %1208 = vmatpush2.msra.mxu0 %v595_v54  ;;  %v688_v26 = vld [vmem:[%s4091_s4 + $0xe58] sm:$0xff]  ;;  %v687_v32 = vld [vmem:[%s4091_s4 + $0xe50] sm:$0xff]  ;;  %v1527_v52 = vld [vmem:[#allocation2 + $0xc8] sm:$0xff] }
 0x101   :  { %1279 = vmatpush2.msra.mxu1 %v723_v57  ;;  %1209 = vmatprep.subr.mxu0 %v592_v59  ;;  %v556_v31 = vld [vmem:[%s4091_s4 + $0xa38] sm:$0xff]  ;;  %v555_v35 = vld [vmem:[%s4091_s4 + $0xa30] sm:$0xff]  ;;  %v1591_v54 = vld [vmem:[#allocation2 + $0x2c8] sm:$0xff] }
 0x102   :  { %1280 = vmatprep.subr.mxu1 %v720_v60  ;;  %1210 = vmatpush2.msra.mxu0 %v591_v62  ;;  %v684_v34 = vld [vmem:[%s4091_s4 + $0xe38] sm:$0xff]  ;;  %v683_v37 = vld [vmem:[%s4091_s4 + $0xe30] sm:$0xff]  ;;  %v1526_v57 = vld [vmem:[#allocation2 + $0xc0] sm:$0xff] }
 0x103   :  { %1281 = vmatpush2.msra.mxu1 %v719_v63  ;;  %1211 = vmatprep.subr.mxu0 %v588_v0  ;;  %v552_v39 = vld [vmem:[%s4091_s4 + $0xa18] sm:$0xff]  ;;  %v551_v43 = vld [vmem:[%s4091_s4 + $0xa10] sm:$0xff]  ;;  %v1590_v59 = vld [vmem:[#allocation2 + $0x2c0] sm:$0xff] }
 0x104   :  { %1282 = vmatprep.subr.mxu1 %v716_v1  ;;  %1212 = vmatpush2.msra.mxu0 %v587_v3  ;;  %v680_v36 = vld [vmem:[%s4091_s4 + $0xe18] sm:$0xff]  ;;  %v679_v44 = vld [vmem:[%s4091_s4 + $0xe10] sm:$0xff]  ;;  %v1523_v1 = vld [vmem:[#allocation2 + $0xa8] sm:$0xff] }
 0x105   :  { %1283 = vmatpush2.msra.mxu1 %v715_v41  ;;  %1213 = vmatprep.subr.mxu0 %v584_v4  ;;  %v1533_v48 = vld [vmem:[#allocation2 + $0xf8] sm:$0xff]  ;;  %v1532_v2 = vld [vmem:[#allocation2 + $0xf0] sm:$0xff]  ;;  %v1587_v3 = vld [vmem:[#allocation2 + $0x2a8] sm:$0xff] }
 0x106   :  { %1284 = vmatprep.subr.mxu1 %v712_v5  ;;  %1214 = vmatpush2.msra.mxu0 %v583_v6  ;;  %v1597_v49 = vld [vmem:[#allocation2 + $0x2f8] sm:$0xff]  ;;  %v1596_v40 = vld [vmem:[#allocation2 + $0x2f0] sm:$0xff]  ;;  %v1522_v41 = vld [vmem:[#allocation2 + $0xa0] sm:$0xff] }
 0x107   :  { %1285 = vmatpush2.msra.mxu1 %v711_v7  ;;  %1215 = vmatprep.subr.mxu0 %v580_v8  ;;  %v1528_v61 = vld [vmem:[#allocation2 + $0xd0] sm:$0xff]  ;;  %v1525_v60 = vld [vmem:[#allocation2 + $0xb8] sm:$0xff]  ;;  %v1586_v4 = vld [vmem:[#allocation2 + $0x2a0] sm:$0xff] }
 0x108   :  { %1286 = vmatprep.subr.mxu1 %v708_v9  ;;  %1216 = vmatpush2.msra.mxu0 %v579_v10  ;;  %v1589_v62 = vld [vmem:[#allocation2 + $0x2b8] sm:$0xff]  ;;  %v1524_v63 = vld [vmem:[#allocation2 + $0xb0] sm:$0xff]  ;;  %v1519_v9 = vld [vmem:[#allocation2 + $0x88] sm:$0xff] }
 0x109   :  { %1287 = vmatpush2.msra.mxu1 %v707_v11  ;;  %1217 = vmatprep.subr.mxu0 %v576_v12  ;;  %v1588_v0 = vld [vmem:[#allocation2 + $0x2b0] sm:$0xff]  ;;  %v1521_v5 = vld [vmem:[#allocation2 + $0x98] sm:$0xff]  ;;  %v1583_v10 = vld [vmem:[#allocation2 + $0x288] sm:$0xff] }
 0x10a   :  { %1288 = vmatprep.subr.mxu1 %v704_v14  ;;  %1218 = vmatpush2.msra.mxu0 %v575_v16  ;;  %v1585_v6 = vld [vmem:[#allocation2 + $0x298] sm:$0xff]  ;;  %v1520_v7 = vld [vmem:[#allocation2 + $0x90] sm:$0xff]  ;;  %v1518_v11 = vld [vmem:[#allocation2 + $0x80] sm:$0xff] }
 0x10b   :  { %1289 = vmatpush2.msra.mxu1 %v703_v19  ;;  %1219 = vmatprep.subr.mxu0 %v572_v21  ;;  %v1584_v8 = vld [vmem:[#allocation2 + $0x290] sm:$0xff]  ;;  %v1582_v12 = vld [vmem:[#allocation2 + $0x280] sm:$0xff]  ;;  %v1517_v14 = vld [vmem:[#allocation2 + $0x78] sm:$0xff] }
 0x10c   :  { %1290 = vmatprep.subr.mxu1 %v700_v38  ;;  %1220 = vmatpush2.msra.mxu0 %v571_v51  ;;  %v1581_v16 = vld [vmem:[#allocation2 + $0x278] sm:$0xff]  ;;  %v1516_v19 = vld [vmem:[#allocation2 + $0x70] sm:$0xff]  ;;  %v1515_v38 = vld [vmem:[#allocation2 + $0x68] sm:$0xff] }
 0x10d   :  { %1291 = vmatpush2.msra.mxu1 %v699_v42  ;;  %1221 = vmatprep.subr.mxu0 %v568_v53  ;;  %v1580_v21 = vld [vmem:[#allocation2 + $0x270] sm:$0xff]  ;;  %v1579_v51 = vld [vmem:[#allocation2 + $0x268] sm:$0xff]  ;;  %v1514_v42 = vld [vmem:[#allocation2 + $0x60] sm:$0xff] }
 0x10e   :  { %1292 = vmatprep.subr.mxu1 %v696_v45  ;;  %1222 = vmatpush2.msra.mxu0 %v567_v46  ;;  %v1578_v53 = vld [vmem:[#allocation2 + $0x260] sm:$0xff]  ;;  %v1513_v45 = vld [vmem:[#allocation2 + $0x58] sm:$0xff] }
 0x10f   :  { %1293 = vmatpush2.msra.mxu1 %v695_v55  ;;  %1223 = vmatprep.subr.mxu0 %v564_v56  ;;  %v1577_v46 = vld [vmem:[#allocation2 + $0x258] sm:$0xff]  ;;  %v1512_v55 = vld [vmem:[#allocation2 + $0x50] sm:$0xff] }
 0x110   :  { %1294 = vmatprep.subr.mxu1 %v692_v22  ;;  %1224 = vmatpush2.msra.mxu0 %v563_v23  ;;  %v1576_v56 = vld [vmem:[#allocation2 + $0x250] sm:$0xff]  ;;  %v1511_v22 = vld [vmem:[#allocation2 + $0x48] sm:$0xff] }
 0x111   :  { %1295 = vmatpush2.msra.mxu1 %v691_v24  ;;  %1225 = vmatprep.subr.mxu0 %v560_v25  ;;  %v1575_v23 = vld [vmem:[#allocation2 + $0x248] sm:$0xff]  ;;  %v1510_v24 = vld [vmem:[#allocation2 + $0x40] sm:$0xff] }
 0x112   :  { %1296 = vmatprep.subr.mxu1 %v688_v26  ;;  %1226 = vmatpush2.msra.mxu0 %v559_v30  ;;  %v1574_v25 = vld [vmem:[#allocation2 + $0x240] sm:$0xff]  ;;  %v1509_v26 = vld [vmem:[#allocation2 + $0x38] sm:$0xff] }
 0x113   :  { %1297 = vmatpush2.msra.mxu1 %v687_v32  ;;  %1227 = vmatprep.subr.mxu0 %v556_v31  ;;  %v1573_v30 = vld [vmem:[#allocation2 + $0x238] sm:$0xff]  ;;  %v1508_v32 = vld [vmem:[#allocation2 + $0x30] sm:$0xff] }
 0x114   :  { %1298 = vmatprep.subr.mxu1 %v684_v34  ;;  %1228 = vmatpush2.msra.mxu0 %v555_v35  ;;  %v1572_v31 = vld [vmem:[#allocation2 + $0x230] sm:$0xff]  ;;  %v1507_v34 = vld [vmem:[#allocation2 + $0x28] sm:$0xff] }
 0x115   :  { %1299 = vmatpush2.msra.mxu1 %v683_v37  ;;  %1229 = vmatprep.subr.mxu0 %v552_v39  ;;  %v1571_v35 = vld [vmem:[#allocation2 + $0x228] sm:$0xff]  ;;  %v1506_v37 = vld [vmem:[#allocation2 + $0x20] sm:$0xff] }
 0x116   :  { %1300 = vmatprep.subr.mxu1 %v680_v36  ;;  %1230 = vmatpush2.msra.mxu0 %v551_v43  ;;  %v1570_v39 = vld [vmem:[#allocation2 + $0x220] sm:$0xff]  ;;  %v1505_v36 = vld [vmem:[#allocation2 + $0x18] sm:$0xff] }
 0x117   :  { %1231 = vmatprep.mubr.f32.mxu0 %v226_v13  ;;  %1301 = vmatpush2.msra.mxu1 %v679_v44  ;;  %v1595_v13 = vld [vmem:[#allocation2 + $0x2e8] sm:$0xff]  ;;  %v1569_v43 = vld [vmem:[#allocation2 + $0x218] sm:$0xff]  ;;  %v1504_v44 = vld [vmem:[#allocation2 + $0x10] sm:$0xff] }
 0x118   :  { %1302 = vmatprep.mubr.f32.mxu1 %v228_v18  ;;  %1232 = vmatmul.mubr.f32.vlgmr.msra.gmra.mxu0 %v225_v15  ;;  %v1594_v18 = vld [vmem:[#allocation2 + $0x2e0] sm:$0xff]  ;;  %v1593_v15 = vld [vmem:[#allocation2 + $0x2d8] sm:$0xff] }
 0x119   :  { %1303 = vmatmul.mubr.f32.vlgmr.msra.gmra.mxu1 %v227_v20  ;;  %1630 = vmatprep.subr.mxu0 %v1533_v48  ;;  %v1592_v20 = vld [vmem:[#allocation2 + $0x2d0] sm:$0xff] }
 0x11a   :  { %1701 = vmatprep.subr.mxu1 %v1597_v49  ;;  %1631 = vmatpush1.msra.mxu0 %v1532_v2  ;;  %v1568_v48 = vld [vmem:[#allocation2 + $0x210] sm:$0xff]  ;;  %v1503_v49 = vld [vmem:[#allocation2 + $0x8] sm:$0xff] }
 0x11b   :  { %1702 = vmatpush1.msra.mxu1 %v1596_v40  ;;  %1632 = vmatprep.subr.mxu0 %v1531_v47  ;;  %v1567_v2 = vld [vmem:[#allocation2 + $0x208] sm:$0xff]  ;;  %v1502_v40 = vld [vmem:[#allocation2] sm:$0xff] }
 0x11c   :  { %1703 = vmatprep.subr.mxu1 %v1595_v13  ;;  %1633 = vmatpush1.msra.mxu0 %v1530_v58  ;;  %v1566_v47 = vld [vmem:[#allocation2 + $0x200] sm:$0xff]  ;;  %v1565_v13 = vld [vmem:[#allocation2 + $0x1f8] sm:$0xff] }
 0x11d   :  { %1704 = vmatpush1.msra.mxu1 %v1594_v18  ;;  %1634 = vmatprep.subr.mxu0 %v1529_v50  ;;  %v1629_v58 = vld [vmem:[#allocation2 + $0x3f8] sm:$0xff]  ;;  %v1564_v18 = vld [vmem:[#allocation2 + $0x1f0] sm:$0xff] }
 0x11e   :  { %1705 = vmatprep.subr.mxu1 %v1593_v15  ;;  %1635 = vmatpush1.msra.mxu0 %v1528_v61  ;;  %v1628_v50 = vld [vmem:[#allocation2 + $0x3f0] sm:$0xff]  ;;  %v1563_v15 = vld [vmem:[#allocation2 + $0x1e8] sm:$0xff] }
 0x11f   :  { %1706 = vmatpush1.msra.mxu1 %v1592_v20  ;;  %1636 = vmatprep.subr.mxu0 %v1527_v52  ;;  %v1627_v61 = vld [vmem:[#allocation2 + $0x3e8] sm:$0xff]  ;;  %v1562_v20 = vld [vmem:[#allocation2 + $0x1e0] sm:$0xff] }
 0x120   :  { %1707 = vmatprep.subr.mxu1 %v1591_v54  ;;  %1637 = vmatpush1.msra.mxu0 %v1526_v57  ;;  %v1626_v52 = vld [vmem:[#allocation2 + $0x3e0] sm:$0xff]  ;;  %v1561_v54 = vld [vmem:[#allocation2 + $0x1d8] sm:$0xff] }
 0x121   :  { %1708 = vmatpush1.msra.mxu1 %v1590_v59  ;;  %1638 = vmatprep.subr.mxu0 %v1525_v60  ;;  %v1625_v57 = vld [vmem:[#allocation2 + $0x3d8] sm:$0xff]  ;;  %v1560_v59 = vld [vmem:[#allocation2 + $0x1d0] sm:$0xff] }
 0x122   :  { %1709 = vmatprep.subr.mxu1 %v1589_v62  ;;  %1639 = vmatpush1.msra.mxu0 %v1524_v63  ;;  %v1624_v60 = vld [vmem:[#allocation2 + $0x3d0] sm:$0xff]  ;;  %v1559_v62 = vld [vmem:[#allocation2 + $0x1c8] sm:$0xff] }
 0x123   :  { %1710 = vmatpush1.msra.mxu1 %v1588_v0  ;;  %1640 = vmatprep.subr.mxu0 %v1523_v1  ;;  %v1623_v63 = vld [vmem:[#allocation2 + $0x3c8] sm:$0xff]  ;;  %v1558_v0 = vld [vmem:[#allocation2 + $0x1c0] sm:$0xff] }
 0x124   :  { %1711 = vmatprep.subr.mxu1 %v1587_v3  ;;  %1641 = vmatpush1.msra.mxu0 %v1522_v41  ;;  %v1622_v1 = vld [vmem:[#allocation2 + $0x3c0] sm:$0xff]  ;;  %v1557_v3 = vld [vmem:[#allocation2 + $0x1b8] sm:$0xff] }
 0x125   :  { %1712 = vmatpush1.msra.mxu1 %v1586_v4  ;;  %1642 = vmatprep.subr.mxu0 %v1521_v5  ;;  %v1621_v41 = vld [vmem:[#allocation2 + $0x3b8] sm:$0xff]  ;;  %v1556_v4 = vld [vmem:[#allocation2 + $0x1b0] sm:$0xff] }
 0x126   :  { %1713 = vmatprep.subr.mxu1 %v1585_v6  ;;  %1643 = vmatpush1.msra.mxu0 %v1520_v7  ;;  %v1620_v5 = vld [vmem:[#allocation2 + $0x3b0] sm:$0xff]  ;;  %v1555_v6 = vld [vmem:[#allocation2 + $0x1a8] sm:$0xff] }
 0x127   :  { %1714 = vmatpush1.msra.mxu1 %v1584_v8  ;;  %1644 = vmatprep.subr.mxu0 %v1519_v9  ;;  %v1619_v7 = vld [vmem:[#allocation2 + $0x3a8] sm:$0xff]  ;;  %v1554_v8 = vld [vmem:[#allocation2 + $0x1a0] sm:$0xff] }
 0x128   :  { %1715 = vmatprep.subr.mxu1 %v1583_v10  ;;  %1645 = vmatpush1.msra.mxu0 %v1518_v11  ;;  %v1618_v9 = vld [vmem:[#allocation2 + $0x3a0] sm:$0xff]  ;;  %v1553_v10 = vld [vmem:[#allocation2 + $0x198] sm:$0xff] }
 0x129   :  { %1716 = vmatpush1.msra.mxu1 %v1582_v12  ;;  %1646 = vmatprep.subr.mxu0 %v1517_v14  ;;  %v1617_v11 = vld [vmem:[#allocation2 + $0x398] sm:$0xff]  ;;  %v1552_v12 = vld [vmem:[#allocation2 + $0x190] sm:$0xff] }
 0x12a   :  { %1717 = vmatprep.subr.mxu1 %v1581_v16  ;;  %1647 = vmatpush1.msra.mxu0 %v1516_v19  ;;  %v1616_v14 = vld [vmem:[#allocation2 + $0x390] sm:$0xff]  ;;  %v1551_v16 = vld [vmem:[#allocation2 + $0x188] sm:$0xff] }
 0x12b   :  { %1718 = vmatpush1.msra.mxu1 %v1580_v21  ;;  %1648 = vmatprep.subr.mxu0 %v1515_v38  ;;  %v1615_v19 = vld [vmem:[#allocation2 + $0x388] sm:$0xff]  ;;  %v1550_v21 = vld [vmem:[#allocation2 + $0x180] sm:$0xff] }
 0x12c   :  { %1719 = vmatprep.subr.mxu1 %v1579_v51  ;;  %1649 = vmatpush1.msra.mxu0 %v1514_v42  ;;  %v1614_v38 = vld [vmem:[#allocation2 + $0x380] sm:$0xff]  ;;  %v1549_v51 = vld [vmem:[#allocation2 + $0x178] sm:$0xff] }
 0x12d   :  { %1720 = vmatpush1.msra.mxu1 %v1578_v53  ;;  %1650 = vmatprep.subr.mxu0 %v1513_v45  ;;  %v1613_v42 = vld [vmem:[#allocation2 + $0x378] sm:$0xff]  ;;  %v1548_v53 = vld [vmem:[#allocation2 + $0x170] sm:$0xff] }
 0x12e   :  { %1721 = vmatprep.subr.mxu1 %v1577_v46  ;;  %1651 = vmatpush1.msra.mxu0 %v1512_v55  ;;  %v1612_v45 = vld [vmem:[#allocation2 + $0x370] sm:$0xff]  ;;  %v1547_v46 = vld [vmem:[#allocation2 + $0x168] sm:$0xff] }
 0x12f   :  { %1722 = vmatpush1.msra.mxu1 %v1576_v56  ;;  %1652 = vmatprep.subr.mxu0 %v1511_v22  ;;  %v1611_v55 = vld [vmem:[#allocation2 + $0x368] sm:$0xff]  ;;  %v1546_v56 = vld [vmem:[#allocation2 + $0x160] sm:$0xff] }
 0x130   :  { %1723 = vmatprep.subr.mxu1 %v1575_v23  ;;  %1653 = vmatpush1.msra.mxu0 %v1510_v24  ;;  %v1610_v22 = vld [vmem:[#allocation2 + $0x360] sm:$0xff]  ;;  %v1545_v23 = vld [vmem:[#allocation2 + $0x158] sm:$0xff] }
 0x131   :  { %1724 = vmatpush1.msra.mxu1 %v1574_v25  ;;  %1654 = vmatprep.subr.mxu0 %v1509_v26  ;;  %v1609_v24 = vld [vmem:[#allocation2 + $0x358] sm:$0xff]  ;;  %v1544_v25 = vld [vmem:[#allocation2 + $0x150] sm:$0xff] }
 0x132   :  { %1725 = vmatprep.subr.mxu1 %v1573_v30  ;;  %1655 = vmatpush1.msra.mxu0 %v1508_v32  ;;  %v1608_v26 = vld [vmem:[#allocation2 + $0x350] sm:$0xff]  ;;  %v1543_v30 = vld [vmem:[#allocation2 + $0x148] sm:$0xff] }
 0x133   :  { %1726 = vmatpush1.msra.mxu1 %v1572_v31  ;;  %1656 = vmatprep.subr.mxu0 %v1507_v34  ;;  %v1607_v32 = vld [vmem:[#allocation2 + $0x348] sm:$0xff]  ;;  %v1542_v31 = vld [vmem:[#allocation2 + $0x140] sm:$0xff] }
 0x134   :  { %1727 = vmatprep.subr.mxu1 %v1571_v35  ;;  %1657 = vmatpush1.msra.mxu0 %v1506_v37  ;;  %v1606_v34 = vld [vmem:[#allocation2 + $0x340] sm:$0xff]  ;;  %v1541_v35 = vld [vmem:[#allocation2 + $0x138] sm:$0xff] }
 0x135   :  { %1728 = vmatpush1.msra.mxu1 %v1570_v39  ;;  %1658 = vmatprep.subr.mxu0 %v1505_v36  ;;  %v1605_v37 = vld [vmem:[#allocation2 + $0x338] sm:$0xff]  ;;  %v807_v39 = vpop.f32.mrf.mxu0  ;;  %v1540_v36 = vld [vmem:[#allocation2 + $0x130] sm:$0xff] }
 0x136   :  { %1729 = vmatprep.subr.mxu1 %v1569_v43  ;;  %1659 = vmatpush1.msra.mxu0 %v1504_v44  ;;  %v1604_v43 = vld [vmem:[#allocation2 + $0x330] sm:$0xff]  ;;  %v1539_v44 = vld [vmem:[#allocation2 + $0x128] sm:$0xff] }
 0x137   :  { %1730 = vmatpush1.msra.mxu1 %v1568_v48  ;;  %1660 = vmatprep.subr.mxu0 %v1503_v49  ;;  %v1603_v48 = vld [vmem:[#allocation2 + $0x328] sm:$0xff]  ;;  %v1538_v49 = vld [vmem:[#allocation2 + $0x120] sm:$0xff] }
 0x138   :  { %1731 = vmatprep.subr.mxu1 %v1567_v2  ;;  %1661 = vmatpush1.msra.mxu0 %v1502_v40  ;;  %v1602_v2 = vld [vmem:[#allocation2 + $0x320] sm:$0xff]  ;;  %v1537_v40 = vld [vmem:[#allocation2 + $0x118] sm:$0xff] }
 0x139   :  { %1732 = vmatpush1.msra.mxu1 %v1566_v47  ;;  %1662 = vmatprep.subr.mxu0 %v1565_v13  ;;  %v1601_v47 = vld [vmem:[#allocation2 + $0x318] sm:$0xff]  ;;  %v878_v13 = vpop.f32.mrf.mxu1 }
 0x13a   :  { %1733 = vmatprep.subr.mxu1 %v1629_v58  ;;  %1663 = vmatpush2.msra.mxu0 %v1564_v18  ;;  %v809_v58 = vpop.f32.mrf.mxu0  ;;  %v1536_v18 = vld [vmem:[#allocation2 + $0x110] sm:$0xff] }
 0x13b   :  { %1734 = vmatpush2.msra.mxu1 %v1628_v50  ;;  %1664 = vmatprep.subr.mxu0 %v1563_v15  ;;  %v1600_v50 = vld [vmem:[#allocation2 + $0x310] sm:$0xff]  ;;  %v1535_v15 = vld [vmem:[#allocation2 + $0x108] sm:$0xff] }
 0x13c   :  { %1735 = vmatprep.subr.mxu1 %v1627_v61  ;;  %1665 = vmatpush2.msra.mxu0 %v1562_v20  ;;  %v1599_v61 = vld [vmem:[#allocation2 + $0x308] sm:$0xff] }
 0x13d   :  { %1736 = vmatpush2.msra.mxu1 %v1626_v52  ;;  %1666 = vmatprep.subr.mxu0 %v1561_v54  ;;  %v1534_v52 = vld [vmem:[#allocation2 + $0x100] sm:$0xff]  ;;  %v880_v54 = vpop.f32.mrf.mxu1 }
 0x13e   :  { %1737 = vmatprep.subr.mxu1 %v1625_v57  ;;  %1667 = vmatpush2.msra.mxu0 %v1560_v59  ;;  %v1598_v57 = vld [vmem:[#allocation2 + $0x300] sm:$0xff] }
 0x13f   :  { %1738 = vmatpush2.msra.mxu1 %v1624_v60  ;;  %1668 = vmatprep.subr.mxu0 %v1559_v62  ;;  %v881_v62 = vadd.f32 %v880_v54, %v809_v58 }
 0x140   :  { %1739 = vmatprep.subr.mxu1 %v1623_v63  ;;  %1669 = vmatpush2.msra.mxu0 %v1558_v0  ;;  %v879_v63 = vadd.f32 %v878_v13, %v807_v39 }
 0x141   :  { %1740 = vmatpush2.msra.mxu1 %v1622_v1  ;;  %1670 = vmatprep.subr.mxu0 %v1557_v3 }
 0x142   :  { %1741 = vmatprep.subr.mxu1 %v1621_v41  ;;  %1671 = vmatpush2.msra.mxu0 %v1556_v4 }
 0x143   :  { %1742 = vmatpush2.msra.mxu1 %v1620_v5  ;;  %1672 = vmatprep.subr.mxu0 %v1555_v6 }
 0x144   :  { %1743 = vmatprep.subr.mxu1 %v1619_v7  ;;  %1673 = vmatpush2.msra.mxu0 %v1554_v8 }
 0x145   :  { %1744 = vmatpush2.msra.mxu1 %v1618_v9  ;;  %1674 = vmatprep.subr.mxu0 %v1553_v10 }
 0x146   :  { %1745 = vmatprep.subr.mxu1 %v1617_v11  ;;  %1675 = vmatpush2.msra.mxu0 %v1552_v12 }
 0x147   :  { %1746 = vmatpush2.msra.mxu1 %v1616_v14  ;;  %1676 = vmatprep.subr.mxu0 %v1551_v16 }
 0x148   :  { %1747 = vmatprep.subr.mxu1 %v1615_v19  ;;  %1677 = vmatpush2.msra.mxu0 %v1550_v21 }
 0x149   :  { %1748 = vmatpush2.msra.mxu1 %v1614_v38  ;;  %1678 = vmatprep.subr.mxu0 %v1549_v51 }
 0x14a   :  { %1749 = vmatprep.subr.mxu1 %v1613_v42  ;;  %1679 = vmatpush2.msra.mxu0 %v1548_v53 }
 0x14b   :  { %1750 = vmatpush2.msra.mxu1 %v1612_v45  ;;  %1680 = vmatprep.subr.mxu0 %v1547_v46 }
 0x14c   :  { %1751 = vmatprep.subr.mxu1 %v1611_v55  ;;  %1681 = vmatpush2.msra.mxu0 %v1546_v56 }
 0x14d   :  { %1752 = vmatpush2.msra.mxu1 %v1610_v22  ;;  %1682 = vmatprep.subr.mxu0 %v1545_v23 }
 0x14e   :  { %1753 = vmatprep.subr.mxu1 %v1609_v24  ;;  %1683 = vmatpush2.msra.mxu0 %v1544_v25 }
 0x14f   :  { %1754 = vmatpush2.msra.mxu1 %v1608_v26  ;;  %1684 = vmatprep.subr.mxu0 %v1543_v30 }
 0x150   :  { %1755 = vmatprep.subr.mxu1 %v1607_v32  ;;  %1685 = vmatpush2.msra.mxu0 %v1542_v31 }
 0x151   :  { %1756 = vmatpush2.msra.mxu1 %v1606_v34  ;;  %1686 = vmatprep.subr.mxu0 %v1541_v35 }
 0x152   :  { %1757 = vmatprep.subr.mxu1 %v1605_v37  ;;  %1687 = vmatpush2.msra.mxu0 %v1540_v36 }
 0x153   :  { %1758 = vmatpush2.msra.mxu1 %v1604_v43  ;;  %1688 = vmatprep.subr.mxu0 %v1539_v44 }
 0x154   :  { %1759 = vmatprep.subr.mxu1 %v1603_v48  ;;  %1689 = vmatpush2.msra.mxu0 %v1538_v49  ;;  %v949_v20 = vpop.f32.mrf.mxu0 }
 0x155   :  { %1760 = vmatpush2.msra.mxu1 %v1602_v2  ;;  %1690 = vmatprep.subr.mxu0 %v1537_v40  ;;  %v950_v3 = vadd.f32 %v949_v20, %v879_v63 }
 0x156   :  { %1761 = vmatprep.subr.mxu1 %v1601_v47  ;;  %1691 = vmatpush2.msra.mxu0 %v1536_v18  ;;  %v1020_v59 = vpop.f32.mrf.mxu1  ;;  %v951_v60 = vpop.f32.mrf.mxu0 }
 0x157   :  { %1762 = vmatpush2.msra.mxu1 %v1600_v50  ;;  %1692 = vmatprep.subr.mxu0 %v1535_v15  ;;  %v952_v0 = vadd.f32 %v951_v60, %v881_v62  ;;  %v3918_v4 = vadd.f32 %v1020_v59, %v950_v3 }
 0x158   :  { %1763 = vmatprep.subr.mxu1 %v1599_v61  ;;  %1693 = vmatpush2.msra.mxu0 %v1534_v52  ;;  %v1022_v1 = vpop.f32.mrf.mxu1 }
 0x159   :  { %1764 = vmatpush2.msra.mxu1 %v1598_v57  ;;  %v3916_v41 = vadd.f32 %v1022_v1, %v952_v0  ;;  %v1311_v6 = vrot.slane %v3918_v4, 4 }
 0x15b   :  { %v1317_v5 = vrot.slane %v3916_v41, 4  ;;  %v1312_v8 = vadd.f32 %v1311_v6, %v3918_v4 }
 0x15d   :  { %v1318_v7 = vadd.f32 %v1317_v5, %v3916_v41  ;;  %v1313_v10 = vrot.slane %v1312_v8, 2 }
 0x15f   :  { %v1319_v9 = vrot.slane %v1318_v7, 2  ;;  %v1314_v12 = vadd.f32 %v1313_v10, %v1312_v8 }
 0x161   :  { %v1320_v11 = vadd.f32 %v1319_v9, %v1318_v7  ;;  %v1315_v16 = vrot.slane %v1314_v12, 1 }
 0x163   :  { %v1321_v14 = vrot.slane %v1320_v11, 1  ;;  %v1316_v21 = vadd.f32 %v1315_v16, %v1314_v12 }
 0x165   :  { %v1322_v19 = vadd.f32 %v1321_v14, %v1320_v11  ;;  %v3926_v53 = vmul.f32 0.125, %v1316_v21 }
 0x167   :  { %v3924_v38 = vmul.f32 0.125, %v1322_v19  ;;  %v1340_v56 = vsub.f32 %v3918_v4, %v3926_v53 }
 0x169   :  { %v1341_v45 = vsub.f32 %v3916_v41, %v3924_v38  ;;  %v1344_v31 = vmul.f32 %v1340_v56, %v1340_v56 }
 0x16b   :  { %v1345_v25 = vmul.f32 %v1341_v45, %v1341_v45  ;;  %v1348_v44 = vrot.slane %v1344_v31, 4 }
 0x16d   :  { %v1354_v39 = vrot.slane %v1345_v25, 4  ;;  %v1349_v13 = vadd.f32 %v1348_v44, %v1344_v31  ;;  %v2072_v31 = vmov 1966171168  }
 0x16f   :  { %v1355_v2 = vadd.f32 %v1354_v39, %v1345_v25  ;;  %v1350_v20 = vrot.slane %v1349_v13, 2 }
 0x171   :  { %v1356_v50 = vrot.slane %v1355_v2, 2  ;;  %v1351_v62 = vadd.f32 %v1350_v20, %v1349_v13 }
 0x173   :  { %v1357_v57 = vadd.f32 %v1356_v50, %v1355_v2  ;;  %v1352_v6 = vrot.slane %v1351_v62, 1 }
 0x175   :  { %v1358_v1 = vrot.slane %v1357_v57, 1  ;;  %v1353_v12 = vadd.f32 %v1352_v6, %v1351_v62 }
 0x177   :  { %v1359_v9 = vadd.f32 %v1358_v1, %v1357_v57 }
 0x179   :  { %v1373_v19 = vmul.f32 0.125, %v1359_v9 }
 0x196   :  { %v1091_v51 = vpop.f32.mrf.mxu0 }
 0x197   :  { %v1162_v42 = vpop.f32.mrf.mxu1 }
 0x198   :  { %v1093_v46 = vpop.f32.mrf.mxu0  ;;  %v1163_v22 = vadd.f32 %v1162_v42, %v1091_v51  ;;  %v1372_v42 = vmul.f32 0.125, %v1353_v12 }
 0x199   :  { %v1164_v55 = vpop.f32.mrf.mxu1 }
 0x19a   :  { %v1165_v26 = vadd.f32 %v1164_v55, %v1093_v46  ;;  %v1377_v55 = vadd.f32 1e-05, %v1373_v19 }
 0x19c   :  { %2034 = vrsqrt.f32 %v1377_v55  ;;  %v1891_v55 = vld [vmem:[%s4097_s10 + $0x68] sm:$0xff] }
 0x1a9   :  { %v2035_v39 = vpop.eup %2034 }
 0x1d8   :  { %v1233_v23 = vpop.f32.mrf.mxu0 }
 0x1d9   :  { %v1304_v24 = vpop.f32.mrf.mxu1  ;;  %v1234_v30 = vadd.f32 %v1233_v23, %v1163_v22  ;;  %v1376_v23 = vadd.f32 1e-05, %v1372_v42 }
 0x1da   :  { %v1235_v32 = vpop.f32.mrf.mxu0 }
 0x1db   :  { %v3932_v34 = vadd.f32 %v1304_v24, %v1234_v30  ;;  %v1236_v35 = vadd.f32 %v1235_v32, %v1165_v26  ;;  %v1306_v37 = vpop.f32.mrf.mxu1  ;;  %2036 = vrsqrt.f32 %v1376_v23  ;;  %v1905_v23 = vld [vmem:[%s4097_s10 + $0xd8] sm:$0xff] }
 0x1dd   :  { %v1323_v36 = vrot.slane %v3932_v34, 4  ;;  %v3935_v43 = vadd.f32 %v1306_v37, %v1236_v35  ;;  %v1391_v35 = vunpack.c.l.s4 %v2072_v31  ;;  %v1902_v31 = vld [vmem:[%s4097_s10 + $0xc0] sm:$0xff] }
 0x1df   :  { %v1324_v48 = vadd.f32 %v1323_v36, %v3932_v34  ;;  %v1329_v49 = vrot.slane %v3935_v43, 4  ;;  %v1392_v37 = vunpack.c.0.s8 %v1391_v35  ;;  %v1886_v35 = vld [vmem:[%s4097_s10 + $0x40] sm:$0xff] }
 0x1e1   :  { %v1325_v40 = vrot.slane %v1324_v48, 2  ;;  %v1330_v47 = vadd.f32 %v1329_v49, %v3935_v43  ;;  %v3943_v49 = vsub.s32 %v1392_v37, %v2381_v17  ;;  %v1901_v37 = vld [vmem:[%s4097_s10 + $0xb8] sm:$0xff] }
 0x1e3   :  { %v1326_v58 = vadd.f32 %v1325_v40, %v1324_v48  ;;  %v1331_v18 = vrot.slane %v1330_v47, 2 }
 0x1e5   :  { %v1327_v15 = vrot.slane %v1326_v58, 1  ;;  %v1332_v61 = vadd.f32 %v1331_v18, %v1330_v47  ;;  %v1309_v18 = vld [vmem:[%s4092_s5] sm:$0xf] }
 0x1e7   :  { %v1328_v52 = vadd.f32 %v1327_v15, %v1326_v58  ;;  %v1333_v54 = vrot.slane %v1332_v61, 1 }
 0x1e8   :  { %v2037_v36 = vpop.eup %2036 }
 0x1e9   :  { %v1338_v59 = vmul.f32 0.125, %v1328_v52  ;;  %v1334_v60 = vadd.f32 %v1333_v54, %v1332_v61  ;;  %v1388_v48 = vcombine.low %v2037_v36, %v2035_v39  ;;  %v1885_v39 = vld [vmem:[%s4097_s10 + $0x38] sm:$0xff]  ;;  %v1900_v36 = vld [vmem:[%s4097_s10 + $0xb0] sm:$0xff] }
 0x1eb   :  { %v1342_v63 = vsub.f32 %v3932_v34, %v1338_v59  ;;  %v1339_v0 = vmul.f32 0.125, %v1334_v60  ;;  %v1396_v47 = vrot.slane %v1388_v48, %v3943_v49  ;;  %v1899_v48 = vld [vmem:[%s4097_s10 + $0xa8] sm:$0xff] }
 0x1ed   :  { %v1346_v3 = vmul.f32 %v1342_v63, %v1342_v63  ;;  %v1343_v5 = vsub.f32 %v3935_v43, %v1339_v0 }
 0x1ef   :  { %v1360_v7 = vrot.slane %v1346_v3, 4  ;;  %v1347_v8 = vmul.f32 %v1343_v5, %v1343_v5 }
 0x1f1   :  { %v1361_v10 = vadd.f32 %v1360_v7, %v1346_v3  ;;  %v1366_v11 = vrot.slane %v1347_v8, 4  ;;  %v1310_v7 = vld [vmem:[%s4093_s6] sm:$0xf] }
 0x1f3   :  { %v1362_v14 = vrot.slane %v1361_v10, 2  ;;  %v1367_v16 = vadd.f32 %v1366_v11, %v1347_v8 }
 0x1f5   :  { %v1363_v21 = vadd.f32 %v1362_v14, %v1361_v10  ;;  %v1368_v51 = vrot.slane %v1367_v16, 2 }
 0x1f7   :  { %v1364_v45 = vrot.slane %v1363_v21, 1  ;;  %v1369_v46 = vadd.f32 %v1368_v51, %v1367_v16 }
 0x1f9   :  { %v1365_v56 = vadd.f32 %v1364_v45, %v1363_v21  ;;  %v1370_v22 = vrot.slane %v1369_v46, 1 }
 0x1fb   :  { %v1374_v24 = vmul.f32 0.125, %v1365_v56  ;;  %v1371_v25 = vadd.f32 %v1370_v22, %v1369_v46  ;;  %v1907_v46 = vld [vmem:[%s4097_s10 + $0xe8] sm:$0xff]  ;;  %v1906_v56 = vld [vmem:[%s4097_s10 + $0xe0] sm:$0xff] }
 0x1fc   :  { %v1890_v22 = vld [vmem:[%s4097_s10 + $0x60] sm:$0xff] }
 0x1fd   :  { %v1378_v26 = vadd.f32 1e-05, %v1374_v24  ;;  %v1375_v30 = vmul.f32 0.125, %v1371_v25  ;;  %v1889_v24 = vld [vmem:[%s4097_s10 + $0x58] sm:$0xff]  ;;  %v1904_v25 = vld [vmem:[%s4097_s10 + $0xd0] sm:$0xff] }
 0x1ff   :  { %v1379_v32 = vadd.f32 1e-05, %v1375_v30  ;;  %2038 = vrsqrt.f32 %v1378_v26  ;;  %v1888_v26 = vld [vmem:[%s4097_s10 + $0x50] sm:$0xff]  ;;  %v1903_v30 = vld [vmem:[%s4097_s10 + $0xc8] sm:$0xff] }
 0x201   :  { %2040 = vrsqrt.f32 %v1379_v32  ;;  %v1887_v32 = vld [vmem:[%s4097_s10 + $0x48] sm:$0xff] }
 0x20c   :  { %v2039_v44 = vpop.eup %2038 }
 0x20e   :  { %v2041_v2 = vpop.eup %2040 }
 0x20f   :  { %v1389_v40 = vcombine.low %v2039_v44, %v2041_v2  ;;  %v1884_v44 = vld [vmem:[%s4097_s10 + $0x30] sm:$0xff]  ;;  %v1883_v2 = vld [vmem:[%s4097_s10 + $0x28] sm:$0xff] }
 0x211   :  { %v1403_v13 = vrot.slane %v1389_v40, %v3943_v49  ;;  %v1898_v40 = vld [vmem:[%s4097_s10 + $0xa0] sm:$0xff] }
 0x213   :  { %v1404_v58 = vcombine.low %v1396_v47, %v1403_v13  ;;  %v1882_v47 = vld [vmem:[%s4097_s10 + $0x20] sm:$0xff]  ;;  %v1897_v13 = vld [vmem:[%s4097_s10 + $0x98] sm:$0xff] }
 0x215   :  { %v1411_v50 = vrot.slane %v1404_v58, %v3943_v49  ;;  %v1881_v58 = vld [vmem:[%s4097_s10 + $0x18] sm:$0xff] }
 0x217   :  { %v1413_v15 = vmul.f32 %v1411_v50, %v1309_v18  ;;  %v1896_v18 = vld [vmem:[%s4097_s10 + $0x90] sm:$0xff] }
 0x218   :  { %v1880_v50 = vld [vmem:[%s4097_s10 + $0x10] sm:$0xff] }
 0x219   :  { %v1426_v61 = vrot.slane %v1413_v15, %v2431_v33  ;;  %v1430_v20 = vrot.slane %v1413_v15, %v2414_v28  ;;  %v1418_v17 = vrot.slane %v1413_v15, %v2417_v29  ;;  %v1422_v52 = vrot.slane %v1413_v15, %v2411_v27  ;;  %v1895_v15 = vld [vmem:[%s4097_s10 + $0x88] sm:$0xff] }
 0x21b   :  { %v1441_v54 = vmul.f32 %v1426_v61, %v1338_v59  ;;  %v1442_v57 = vmul.f32 %v1430_v20, %v1339_v0  ;;  %v1439_v60 = vmul.f32 %v1418_v17, %v3926_v53  ;;  %v1440_v62 = vmul.f32 %v1422_v52, %v3924_v38 }
 0x21c   :  { %v1436_v59 = vmul.f32 %v1422_v52, %v3916_v41  ;;  %v1438_v53 = vmul.f32 %v1430_v20, %v3935_v43  ;;  %v1435_v38 = vmul.f32 %v1418_v17, %v3918_v4  ;;  %v1437_v0 = vmul.f32 %v1426_v61, %v3932_v34  ;;  %v1908_v4 = vld [vmem:[%s4097_s10 + $0xf0] sm:$0xff]  ;;  %v1879_v61 = vld [vmem:[%s4097_s10 + $0x8] sm:$0xff]  ;;  %v1894_v20 = vld [vmem:[%s4097_s10 + $0x80] sm:$0xff] }
 0x21d   :  { %v1448_v63 = vcombine.low %v1441_v54, %v1442_v57  ;;  %v1447_v1 = vcombine.low %v1439_v60, %v1440_v62  ;;  %v1892_v34 = vld [vmem:[%s4097_s10 + $0x70] sm:$0xff]  ;;  %v1878_v17 = vld [vmem:[%s4097_s10] sm:$0xff] }
 0x21f   :  { %v1462_v3 = vrot.slane %v1448_v63, %v3943_v49  ;;  %v1455_v5 = vrot.slane %v1447_v1, %v3943_v49 }
 0x221   :  { %v1463_v6 = vcombine.low %v1455_v5, %v1462_v3 }
 0x223   :  { %v1470_v8 = vrot.slane %v1463_v6, %v3943_v49 }
 0x225   :  { %v1472_v9 = vsub.f32 %v1310_v7, %v1470_v8 }
 0x227   :  { %v1481_v10 = vrot.slane %v1472_v9, %v2411_v27  ;;  %v1489_v11 = vrot.slane %v1472_v9, %v2414_v28  ;;  %v1477_v12 = vrot.slane %v1472_v9, %v2417_v29  ;;  %v1485_v14 = vrot.slane %v1472_v9, %v2431_v33  ;;  %v1909_v28 = vld [vmem:[%s4097_s10 + $0xf8] sm:$0xff] }
 0x228   :  { %v1893_v33 = vld [vmem:[%s4097_s10 + $0x78] sm:$0xff]  ;;  %1994 = vmatprep.subr.mxu0 %v1909_v28 }
 0x229   :  { %v1495_v16 = vadd.f32 %v1481_v10, %v1436_v59  ;;  %v1497_v19 = vadd.f32 %v1489_v11, %v1438_v53  ;;  %v1494_v21 = vadd.f32 %v1477_v12, %v1435_v38  ;;  %v1496_v51 = vadd.f32 %v1485_v14, %v1437_v0 }
 0x22b   :  { %v1499_v42 = vmax.f32 %v1495_v16, 0.0  ;;  %v1501_v41 = vmax.f32 %v1497_v19, 0.0  ;;  %v1498_v45 = vmax.f32 %v1494_v21, 0.0  ;;  %v1500_v43 = vmax.f32 %v1496_v51, 0.0 }
 0x22d   :  { %1694 = vmatprep.mubr.f32.mxu0 %v1499_v42  ;;  %1765 = vmatprep.mubr.f32.mxu1 %v1501_v41 }
 0x22e   :  { %1695 = vmatmul.mubr.f32.vlgmr.msra.gmra.mxu0 %v1498_v45  ;;  %1766 = vmatmul.mubr.f32.vlgmr.msra.gmra.mxu1 %v1500_v43 }
 0x22f   :  { %1995 = vmatpush3.msra.mxu0 %v1893_v33 }
 0x230   :  { %1996 = vmatprep.subr.mxu0 %v1908_v4 }
 0x231   :  { %1997 = vmatpush3.msra.mxu0 %v1892_v34 }
 0x232   :  { %1998 = vmatprep.subr.mxu0 %v1907_v46 }
 0x233   :  { %1999 = vmatpush3.msra.mxu0 %v1891_v55 }
 0x234   :  { %2000 = vmatprep.subr.mxu0 %v1906_v56 }
 0x235   :  { %2001 = vmatpush3.msra.mxu0 %v1890_v22 }
 0x236   :  { %2002 = vmatprep.subr.mxu0 %v1905_v23 }
 0x237   :  { %2003 = vmatpush3.msra.mxu0 %v1889_v24 }
 0x238   :  { %2004 = vmatprep.subr.mxu0 %v1904_v25 }
 0x239   :  { %2005 = vmatpush3.msra.mxu0 %v1888_v26 }
 0x23a   :  { %2006 = vmatprep.subr.mxu0 %v1903_v30 }
 0x23b   :  { %2007 = vmatpush3.msra.mxu0 %v1887_v32 }
 0x23c   :  { %2008 = vmatprep.subr.mxu0 %v1902_v31 }
 0x23d   :  { %2009 = vmatpush3.msra.mxu0 %v1886_v35  ;;  %v1772_v35 = vld [vmem:[%s4095_s8] sm:$0x3] }
 0x23e   :  { %2010 = vmatprep.subr.mxu0 %v1901_v37 }
 0x23f   :  { %2011 = vmatpush3.msra.mxu0 %v1885_v39 }
 0x240   :  { %2012 = vmatprep.subr.mxu0 %v1900_v36 }
 0x241   :  { %2013 = vmatpush3.msra.mxu0 %v1884_v44 }
 0x242   :  { %2014 = vmatprep.subr.mxu0 %v1899_v48 }
 0x243   :  { %2015 = vmatpush3.msra.mxu0 %v1883_v2 }
 0x244   :  { %2016 = vmatprep.subr.mxu0 %v1898_v40 }
 0x245   :  { %2017 = vmatpush3.msra.mxu0 %v1882_v47 }
 0x246   :  { %2018 = vmatprep.subr.mxu0 %v1897_v13  ;;  %v1773_v13 = vld [vmem:[%s4096_s9] sm:$0x3] }
 0x247   :  { %2019 = vmatpush3.msra.mxu0 %v1881_v58 }
 0x248   :  { %2020 = vmatprep.subr.mxu0 %v1896_v18 }
 0x249   :  { %2021 = vmatpush3.msra.mxu0 %v1880_v50 }
 0x24a   :  { %2022 = vmatprep.subr.mxu0 %v1895_v15 }
 0x24b   :  { %2023 = vmatpush3.msra.mxu0 %v1879_v61 }
 0x24c   :  { %2024 = vmatprep.subr.mxu0 %v1894_v20 }
 0x24d   :  { %2025 = vmatpush3.msra.mxu0 %v1878_v17 }
 0x2ee   :  { %v1696_v52 = vpop.f32.mrf.mxu0  ;;  %v1767_v54 = vpop.f32.mrf.mxu1 }
 0x2ef   :  { %v1768_v57 = vadd.f32 %v1767_v54, %v1696_v52 }
 0x2f0   :  { %v1698_v60 = vpop.f32.mrf.mxu0  ;;  %v1769_v62 = vpop.f32.mrf.mxu1 }
 0x2f1   :  { %v1774_v63 = vrot.slane %v1768_v57, 4  ;;  %v1770_v1 = vadd.f32 %v1769_v62, %v1698_v60 }
 0x2f3   :  { %v1775_v3 = vadd.f32 %v1774_v63, %v1768_v57  ;;  %v1780_v5 = vrot.slane %v1770_v1, 4  ;;  %v1993_v63 = vld [vmem:[%s4098_s11] ss:$0 sm:$0xff] }
 0x2f5   :  { %v1776_v6 = vrot.slane %v1775_v3, 2  ;;  %v1781_v7 = vadd.f32 %v1780_v5, %v1770_v1 }
 0x2f7   :  { %v1777_v8 = vadd.f32 %v1776_v6, %v1775_v3  ;;  %v1782_v9 = vrot.slane %v1781_v7, 2 }
 0x2f9   :  { %v1778_v59 = vrot.slane %v1777_v8, 1  ;;  %v1783_v53 = vadd.f32 %v1782_v9, %v1781_v7 }
 0x2fb   :  { %v1779_v38 = vadd.f32 %v1778_v59, %v1777_v8  ;;  %v1784_v0 = vrot.slane %v1783_v53, 1 }
 0x2fd   :  { %v1786_v10 = vmul.f32 0.125, %v1779_v38  ;;  %v1785_v11 = vadd.f32 %v1784_v0, %v1783_v53 }
 0x2ff   :  { %v1788_v12 = vsub.f32 %v1768_v57, %v1786_v10  ;;  %v1787_v14 = vmul.f32 0.125, %v1785_v11 }
 0x301   :  { %v1790_v16 = vmul.f32 %v1788_v12, %v1788_v12  ;;  %v1789_v19 = vsub.f32 %v1770_v1, %v1787_v14 }
 0x303   :  { %v1792_v21 = vrot.slane %v1790_v16, 4  ;;  %v1791_v51 = vmul.f32 %v1789_v19, %v1789_v19 }
 0x305   :  { %v1793_v42 = vadd.f32 %v1792_v21, %v1790_v16  ;;  %v1798_v41 = vrot.slane %v1791_v51, 4 }
 0x307   :  { %v1794_v45 = vrot.slane %v1793_v42, 2  ;;  %v1799_v43 = vadd.f32 %v1798_v41, %v1791_v51 }
 0x309   :  { %v1795_v28 = vadd.f32 %v1794_v45, %v1793_v42  ;;  %v1800_v33 = vrot.slane %v1799_v43, 2 }
 0x30b   :  { %v1796_v4 = vrot.slane %v1795_v28, 1  ;;  %v1801_v34 = vadd.f32 %v1800_v33, %v1799_v43 }
 0x30d   :  { %v1797_v46 = vadd.f32 %v1796_v4, %v1795_v28  ;;  %v1802_v55 = vrot.slane %v1801_v34, 1 }
 0x30f   :  { %v1804_v56 = vmul.f32 0.125, %v1797_v46  ;;  %v1803_v22 = vadd.f32 %v1802_v55, %v1801_v34 }
 0x311   :  { %v1806_v23 = vadd.f32 1e-05, %v1804_v56  ;;  %v1805_v24 = vmul.f32 0.125, %v1803_v22 }
 0x313   :  { %v1807_v25 = vadd.f32 1e-05, %v1805_v24  ;;  %2042 = vrsqrt.f32 %v1806_v23 }
 0x315   :  { %2044 = vrsqrt.f32 %v1807_v25 }
 0x320   :  { %v2043_v26 = vpop.eup %2042 }
 0x322   :  { %v2045_v30 = vpop.eup %2044 }
 0x323   :  { %v1812_v32 = vcombine.low %v2043_v26, %v2045_v30 }
 0x325   :  { %v1819_v31 = vrot.slane %v1812_v32, %v3943_v49 }
 0x327   :  { %v1826_v37 = vrot.slane %v1819_v31, %v3943_v49 }
 0x329   :  { %v1828_v39 = vmul.f32 %v1826_v37, %v1772_v35 }
 0x32b   :  { %v1833_v36 = vrot.slane %v1828_v39, %v2417_v29  ;;  %v1837_v44 = vrot.slane %v1828_v39, %v2411_v27 }
 0x32d   :  { %v1842_v48 = vmul.f32 %v1833_v36, %v1786_v10  ;;  %v1843_v2 = vmul.f32 %v1837_v44, %v1787_v14  ;;  %v1841_v50 = vmul.f32 %v1837_v44, %v1770_v1  ;;  %v1840_v61 = vmul.f32 %v1833_v36, %v1768_v57 }
 0x32f   :  { %v1846_v40 = vcombine.low %v1842_v48, %v1843_v2 }
 0x331   :  { %v1853_v47 = vrot.slane %v1846_v40, %v3943_v49 }
 0x333   :  { %v1860_v58 = vrot.slane %v1853_v47, %v3943_v49 }
 0x335   :  { %v1862_v18 = vsub.f32 %v1773_v13, %v1860_v58 }
 0x337   :  { %v1871_v15 = vrot.slane %v1862_v18, %v2411_v27  ;;  %v1867_v20 = vrot.slane %v1862_v18, %v2417_v29 }
 0x339   :  { %v1875_v17 = vadd.f32 %v1871_v15, %v1841_v50  ;;  %v1874_v52 = vadd.f32 %v1867_v20, %v1840_v61 }
 0x33b   :  { %v1877_v54 = vmax.f32 %v1875_v17, 0.0  ;;  %v1876_v60 = vmax.f32 %v1874_v52, 0.0 }
 0x33d   :  { %1981 = vmatprep.mubr.f32.mxu0 %v1877_v54 }
 0x33e   :  { %1982 = vmatmul.mubr.f32.vlgmr.msra.gmra.mxu0 %v1876_v60 }
 0x3fe   :  { %v2026_v62 = vpop.f32.mrf.mxu0 }
 0x400   :  { %v2027_v3 = vpop.f32.mrf.mxu0 }
 0x401   :  { %v2028_v49 = vadd.f32 %v2027_v3, %v2026_v62 }
 0x403   :  { %v1984_v5 = vadd.f32 %v2028_v49, %v1993_v63 }
 0x405   :  { %1987 = vst [vmem:[%s4099_s12] sm:$0xff] %v1984_v5 }
 0x406   :  { %1992 = vsyncpa [#allocation3], 1 }

</bundles_post_ra>
